<compile_context>
chip_gen: v7x
topology: tpu7x:2x2x1
jax: 0.10.0
libtpu: 0.0.40
codegen_flags: <defaults>
</compile_context>

<pallas_src>
import functools

import numpy as np

import jax
import jax.numpy as jnp
from jax.experimental import pallas as pl
from jax.experimental.pallas import tpu as pltpu

# Architecture constants fixed by the PyTorch module.
CONV1_OUT, CONV1_K, CONV1_S = 32, 8, 4
CONV2_OUT, CONV2_K, CONV2_S = 64, 4, 2
FC_HIDDEN = 512
LANE = 128


def _pad_last_to_lane(a):
    """Zero-pad the last dim up to a multiple of 128 (lane width)."""
    pad = (-a.shape[-1]) % LANE
    if pad == 0:
        return a
    return jnp.pad(a, [(0, 0)] * (a.ndim - 1) + [(0, pad)])


# ----------------------------------------------------------------------------
# The single fused kernel: conv1 GEMM -> conv2 (16 tap GEMMs) -> flatten ->
# fc1 -> fc2 -> fc_final.  fc weights arrive via async DMA overlapped with the
# conv GEMMs.  Everything between layers stays in VMEM.
# ----------------------------------------------------------------------------
def _fused_forward_kernel(p1e_ref, w1_ref, b1_ref, w2t_ref, b2_ref,
                          bf1_ref, bf2_ref, bf3_ref,
                          wf1_hbm, wf2_hbm, wf3_hbm,
                          out_ref,
                          wf1_v, wf2_v, wf3_v, t1_ref, y2_ref, fc_ref, sem,
                          *, n_pos, batch):
    # Kick off the fc-weight DMAs immediately so they overlap the conv GEMMs.
    cp1 = pltpu.make_async_copy(wf1_hbm, wf1_v, sem.at[0])
    cp2 = pltpu.make_async_copy(wf2_hbm, wf2_v, sem.at[1])
    cp3 = pltpu.make_async_copy(wf3_hbm, wf3_v, sem.at[2])
    cp1.start()
    cp2.start()
    cp3.start()

    n_pb = n_pos * batch
    n_taps = CONV2_K * CONV2_K

    # conv1: ONE GEMM over all (tap, position, batch) rows; bias + ReLU in f32.
    t1 = jnp.dot(p1e_ref[...], w1_ref[...], preferred_element_type=jnp.float32)
    t1_ref[...] = jnp.maximum(t1 + b1_ref[...], 0.0).astype(t1_ref.dtype)

    # conv2: accumulate the 16 kernel taps.  Each tap is one aligned
    # (n_pb, 128) x (128, 128) GEMM on an 8-sublane-aligned slice of t1.
    acc = jnp.zeros((n_pb, LANE), jnp.float32)
    for t in range(n_taps):
        acc = acc + jnp.dot(t1_ref[t * n_pb:(t + 1) * n_pb, :], w2t_ref[t],
                            preferred_element_type=jnp.float32)
    y2_ref[...] = jnp.maximum(acc + b2_ref[...], 0.0).astype(y2_ref.dtype)

    # Flatten: (pos, batch, 128ch) rows -> (batch, n_pos*128) fc input via
    # 128-lane-aligned stores (fc1 weight rows were permuted at prep time to
    # match this layout / torch's NCHW flatten).
    for p in range(n_pos):
        fc_ref[:, p * LANE:(p + 1) * LANE] = y2_ref[p * batch:(p + 1) * batch, :]
    fc_in = fc_ref[...]                                   # (B, n_pos*128) bf16

    # fc1 -> fc2 -> fc_final; wait on each weight DMA only right before use.
    cp1.wait()
    h = jnp.dot(fc_in, wf1_v[...], preferred_element_type=jnp.float32) + bf1_ref[...]
    h = jnp.maximum(h, 0.0).astype(jnp.bfloat16)
    cp2.wait()
    h = jnp.dot(h, wf2_v[...], preferred_element_type=jnp.float32) + bf2_ref[...]
    h = jnp.maximum(h, 0.0).astype(jnp.bfloat16)
    cp3.wait()
    out_ref[...] = (jnp.dot(h, wf3_v[...], preferred_element_type=jnp.float32)
                    + bf3_ref[...])


def _fused_forward_call(p1e, kp, batch, n_pos):
    """p1e: (16*n_pos*B, K1) bf16 tap-expanded conv1 patches."""
    n_out = kp["wf3"].shape[1]
    m_exp, k1 = p1e.shape
    n_pb = n_pos * batch

    flops = 2 * (m_exp * k1 * kp["w1"].shape[1]
                 + CONV2_K * CONV2_K * n_pb * LANE * LANE
                 + batch * kp["wf1"].shape[0] * kp["wf1"].shape[1]
                 + batch * kp["wf2"].shape[0] * kp["wf2"].shape[1]
                 + batch * kp["wf3"].shape[0] * kp["wf3"].shape[1])
    operands = (p1e, kp["w1"], kp["b1"], kp["w2t"], kp["b2"],
                kp["bf1"], kp["bf2"], kp["bf3"],
                kp["wf1"], kp["wf2"], kp["wf3"])
    bytes_accessed = int(sum(int(o.size) * o.dtype.itemsize for o in operands)
                         + batch * n_out * 4)

    kernel = functools.partial(_fused_forward_kernel, n_pos=n_pos, batch=batch)
    vmem = pltpu.MemorySpace.VMEM
    return pl.pallas_call(
        kernel,
        out_shape=jax.ShapeDtypeStruct((batch, n_out), jnp.float32),
        in_specs=([pl.BlockSpec(memory_space=vmem)] * 8
                  + [pl.BlockSpec(memory_space=pl.ANY)] * 3),
        out_specs=pl.BlockSpec(memory_space=vmem),
        scratch_shapes=[
            pltpu.VMEM(kp["wf1"].shape, jnp.bfloat16),     # wf1_v
            pltpu.VMEM(kp["wf2"].shape, jnp.bfloat16),     # wf2_v
            pltpu.VMEM(kp["wf3"].shape, jnp.bfloat16),     # wf3_v
            pltpu.VMEM((m_exp, LANE), jnp.bfloat16),       # t1_ref (relu(conv1))
            pltpu.VMEM((n_pb, LANE), jnp.bfloat16),        # y2_ref (relu(conv2))
            pltpu.VMEM((batch, n_pos * LANE), jnp.bfloat16),  # fc_ref (flatten)
            pltpu.SemaphoreType.DMA((3,)),
        ],
        cost_estimate=pl.CostEstimate(flops=int(flops), transcendentals=0,
                                      bytes_accessed=bytes_accessed),
    )(*operands)


# ----------------------------------------------------------------------------
# Wrapper: one im2col + one row gather, then the single fused kernel.
# ----------------------------------------------------------------------------
def _conv2_gather_indices(batch, oh1, ow1, oh2, ow2):
    """Row indices replicating conv1 patch rows into conv2-tap-major order.

    Expanded row (t, p, b) = t*(n_pos*B) + p*B + b pulls conv1 patch row
    b*(oh1*ow1) + (2*i+kh)*ow1 + (2*j+kw)  with t = kh*4+kw, p = i*ow2+j.
    """
    idx = np.empty((CONV2_K * CONV2_K, oh2 * ow2, batch), np.int32)
    for kh in range(CONV2_K):
        for kw in range(CONV2_K):
            t = kh * CONV2_K + kw
            for i in range(oh2):
                for j in range(ow2):
                    p = i * ow2 + j
                    for b in range(batch):
                        idx[t, p, b] = (b * oh1 * ow1
                                        + (CONV2_S * i + kh) * ow1
                                        + (CONV2_S * j + kw))
    return idx.reshape(-1)


def neural_network_forward(x, kp, *, n_actions):
    """x: (B, C, H, W) NCHW float32 (PyTorch convention)."""
    batch, _, height, width = x.shape
    oh1 = (height - CONV1_K) // CONV1_S + 1
    ow1 = (width - CONV1_K) // CONV1_S + 1
    oh2 = (oh1 - CONV2_K) // CONV2_S + 1
    ow2 = (ow1 - CONV2_K) // CONV2_S + 1
    n_pos = oh2 * ow2

    # conv1 im2col as ONE XLA op (identity-kernel conv), output NHWC.
    p1 = jax.lax.conv_general_dilated_patches(
        x.astype(jnp.bfloat16), filter_shape=(CONV1_K, CONV1_K),
        window_strides=(CONV1_S, CONV1_S), padding="VALID",
        dimension_numbers=("NCHW", "OIHW", "NHWC"))
    p1 = p1.reshape(batch * oh1 * ow1, -1)

    # ONE row gather replicates conv1 patches into conv2-tap order, so the fused
    # kernel needs no second im2col, no transpose, and no HBM round trip for y1.
    idx = _conv2_gather_indices(batch, oh1, ow1, oh2, ow2)   # trace-time numpy
    p1e = jnp.take(p1, jnp.asarray(idx), axis=0)             # (16*n_pos*B, K1)

    out = _fused_forward_call(p1e, kp, batch, n_pos)         # (B, 128) f32
    return out[:, :n_actions]


# ----------------------------------------------------------------------------
# Parameters: torch-layout init + conversion into kernel-ready GEMM operands.
# ----------------------------------------------------------------------------
def init_params(key, num_channels, height, width, n_actions):
    """PyTorch-layout parameters (what the nn.Module state_dict would hold)."""
    oh1 = (height - CONV1_K) // CONV1_S + 1
    ow1 = (width - CONV1_K) // CONV1_S + 1
    oh2 = (oh1 - CONV2_K) // CONV2_S + 1
    ow2 = (ow1 - CONV2_K) // CONV2_S + 1
    fc_size = CONV2_OUT * oh2 * ow2

    ks = jax.random.split(key, 10)
    s = 0.05
    params = {
        "conv1_w": s * jax.random.normal(ks[0], (CONV1_OUT, num_channels, CONV1_K, CONV1_K), jnp.float32),
        "conv1_b": s * jax.random.normal(ks[1], (CONV1_OUT,), jnp.float32),
        "conv2_w": s * jax.random.normal(ks[2], (CONV2_OUT, CONV1_OUT, CONV2_K, CONV2_K), jnp.float32),
        "conv2_b": s * jax.random.normal(ks[3], (CONV2_OUT,), jnp.float32),
        "fc1_w": s * jax.random.normal(ks[4], (FC_HIDDEN, fc_size), jnp.float32),   # torch Linear: (out, in)
        "fc1_b": s * jax.random.normal(ks[5], (FC_HIDDEN,), jnp.float32),
        "fc2_w": s * jax.random.normal(ks[6], (FC_HIDDEN, FC_HIDDEN), jnp.float32),
        "fc2_b": s * jax.random.normal(ks[7], (FC_HIDDEN,), jnp.float32),
        "fc_final_w": s * jax.random.normal(ks[8], (n_actions, FC_HIDDEN), jnp.float32),
        "fc_final_b": s * jax.random.normal(ks[9], (n_actions,), jnp.float32),
    }
    return params, fc_size, (oh2, ow2)


def _conv1_patch_feature_order(num_channels):
    """Map patch-extractor feature index -> torch (c, kh, kw) flat weight index.

    Derived by running the patch extractor on an index-valued probe, so the
    kernel does not rely on conv_general_dilated_patches' feature-order
    convention (review correctness concern)."""
    k = CONV1_K
    probe = np.arange(num_channels * k * k, dtype=np.float32).reshape(
        1, num_channels, k, k)
    feat = jax.lax.conv_general_dilated_patches(
        jnp.asarray(probe), filter_shape=(k, k), window_strides=(k, k),
        padding="VALID", dimension_numbers=("NCHW", "OIHW", "NHWC"))
    return np.asarray(feat, dtype=np.float32).reshape(-1).astype(np.int64)


def prepare_params(params, oh2, ow2):
    """Torch-layout params -> kernel-ready GEMM operands (one-time host cost).

    * conv1 weight -> (K1, 128) rhs whose rows follow the patch-feature order
    * conv2 weight -> per-tap (16, 128, 128) blocks, in/out channels zero-padded
    * fc1 input columns permuted from torch's NCHW flatten (c*n_pos + p) to the
      kernel's position-major / channel-padded layout (p*128 + c)
    * matmul operands bf16; biases f32 (1, N) rows, N padded to 128
    """
    f32, bf16 = jnp.float32, jnp.bfloat16
    n_pos = oh2 * ow2
    num_channels = params["conv1_w"].shape[1]

    order = _conv1_patch_feature_order(num_channels)
    w1 = params["conv1_w"].reshape(CONV1_OUT, -1)[:, order].T        # (K1, 32)
    w1 = _pad_last_to_lane(w1)                                       # (K1, 128)
    b1 = _pad_last_to_lane(params["conv1_b"][None, :])               # (1, 128)

    w2 = jnp.transpose(params["conv2_w"], (2, 3, 1, 0))              # (kh, kw, in, out)
    w2 = w2.reshape(CONV2_K * CONV2_K, CONV1_OUT, CONV2_OUT)
    w2 = jnp.pad(w2, ((0, 0), (0, LANE - CONV1_OUT), (0, LANE - CONV2_OUT)))
    b2 = _pad_last_to_lane(params["conv2_b"][None, :])               # (1, 128)

    wf1 = params["fc1_w"].reshape(FC_HIDDEN, CONV2_OUT, n_pos)       # [out, ch, p]
    wf1 = jnp.transpose(wf1, (2, 1, 0))                              # [p, ch, out]
    wf1 = jnp.pad(wf1, ((0, 0), (0, LANE - CONV2_OUT), (0, 0)))
    wf1 = wf1.reshape(n_pos * LANE, FC_HIDDEN)                       # row = p*128 + ch

    return {
        "w1": w1.astype(bf16), "b1": b1.astype(f32),
        "w2t": w2.astype(bf16), "b2": b2.astype(f32),
        "wf1": wf1.astype(bf16),
        "bf1": params["fc1_b"][None, :].astype(f32),
        "wf2": params["fc2_w"].T.astype(bf16),
        "bf2": params["fc2_b"][None, :].astype(f32),
        "wf3": _pad_last_to_lane(params["fc_final_w"].T).astype(bf16),
        "bf3": _pad_last_to_lane(params["fc_final_b"][None, :]).astype(f32),
    }


# ----------------------------------------------------------------------------
# Pure-JAX float32 reference (matches the PyTorch module exactly).
# ----------------------------------------------------------------------------
def reference_forward(x, params):
    y = jax.lax.conv_general_dilated(
        x, params["conv1_w"], (CONV1_S, CONV1_S), "VALID",
        dimension_numbers=("NCHW", "OIHW", "NCHW"))
    y = jax.nn.relu(y + params["conv1_b"][None, :, None, None])
    y = jax.lax.conv_general_dilated(
        y, params["conv2_w"], (CONV2_S, CONV2_S), "VALID",
        dimension_numbers=("NCHW", "OIHW", "NCHW"))
    y = jax.nn.relu(y + params["conv2_b"][None, :, None, None])
    y = y.reshape(y.shape[0], -1)                     # NCHW flatten == torch .view
    y = jax.nn.relu(y @ params["fc1_w"].T + params["fc1_b"])
    y = jax.nn.relu(y @ params["fc2_w"].T + params["fc2_b"])
    return y @ params["fc_final_w"].T + params["fc_final_b"]


if __name__ == "__main__":
    batch = 2
    num_channels = 4
    height = width = 32          # conv1 -> 7x7, conv2 -> 2x2, fc_size = 256
    n_actions = 6

    key = jax.random.PRNGKey(0)
    k_params, k_x = jax.random.split(key)
    torch_params, fc_size, (oh2, ow2) = init_params(
        k_params, num_channels, height, width, n_actions)
    kp = prepare_params(torch_params, oh2, ow2)

    x = jax.random.uniform(k_x, (batch, num_channels, height, width), jnp.float32)

    fwd = jax.jit(functools.partial(neural_network_forward, n_actions=n_actions))
    out = jax.block_until_ready(fwd(x, kp))
    assert out.shape == (batch, n_actions), out.shape
    assert out.dtype == jnp.float32

    # bf16 matmul operands -> compare against the f32 reference at loose tolerance.
    ref = reference_forward(x, torch_params)
    np.testing.assert_allclose(np.asarray(out), np.asarray(ref),
                               atol=5e-2, rtol=5e-2)
    print("KERNEL_OK")
</pallas_src>

<mosaic_0001>
module attributes {stable_mosaic.version = 11 : i64} {
  func.func @_fused_forward_kernel(%arg0: memref<128x256xbf16, #tpu.memory_space<vmem>>, %arg1: memref<256x128xbf16, #tpu.memory_space<vmem>>, %arg2: memref<1x128xf32, #tpu.memory_space<vmem>>, %arg3: memref<16x128x128xbf16, #tpu.memory_space<vmem>>, %arg4: memref<1x128xf32, #tpu.memory_space<vmem>>, %arg5: memref<1x512xf32, #tpu.memory_space<vmem>>, %arg6: memref<1x512xf32, #tpu.memory_space<vmem>>, %arg7: memref<1x128xf32, #tpu.memory_space<vmem>>, %arg8: memref<512x512xbf16, #tpu.memory_space<any>>, %arg9: memref<512x512xbf16, #tpu.memory_space<any>>, %arg10: memref<512x128xbf16, #tpu.memory_space<any>>, %arg11: memref<2x128xf32, #tpu.memory_space<vmem>>, %arg12: memref<512x512xbf16, #tpu.memory_space<vmem>>, %arg13: memref<512x512xbf16, #tpu.memory_space<vmem>>, %arg14: memref<512x128xbf16, #tpu.memory_space<vmem>>, %arg15: memref<128x128xbf16, #tpu.memory_space<vmem>>, %arg16: memref<8x128xbf16, #tpu.memory_space<vmem>>, %arg17: memref<2x512xbf16, #tpu.memory_space<vmem>>, %arg18: memref<3x!tpu.dma_semaphore, #tpu.memory_space<semaphore_mem>>) attributes {dimension_semantics = [], scalar_prefetch = 0 : i64, scratch_operands = 7 : i64, tpu.core_type = #tpu.core_type<tc>} {
    %c0_i32 = arith.constant 0 : i32
    %0 = tpu.memref_slice %arg18[%c0_i32] : memref<3x!tpu.dma_semaphore, #tpu.memory_space<semaphore_mem>> -> memref<1x!tpu.dma_semaphore, #tpu.memory_space<semaphore_mem>>
    %1 = tpu.memref_squeeze %0 : memref<1x!tpu.dma_semaphore, #tpu.memory_space<semaphore_mem>> -> memref<!tpu.dma_semaphore, #tpu.memory_space<semaphore_mem>>
    tpu.enqueue_dma source(%arg8 : memref<512x512xbf16, #tpu.memory_space<any>>) target(%arg12 : memref<512x512xbf16, #tpu.memory_space<vmem>>) target_semaphore(%1 : memref<!tpu.dma_semaphore, #tpu.memory_space<semaphore_mem>>)
    %c1_i32 = arith.constant 1 : i32
    %2 = tpu.memref_slice %arg18[%c1_i32] : memref<3x!tpu.dma_semaphore, #tpu.memory_space<semaphore_mem>> -> memref<1x!tpu.dma_semaphore, #tpu.memory_space<semaphore_mem>>
    %3 = tpu.memref_squeeze %2 : memref<1x!tpu.dma_semaphore, #tpu.memory_space<semaphore_mem>> -> memref<!tpu.dma_semaphore, #tpu.memory_space<semaphore_mem>>
    tpu.enqueue_dma source(%arg9 : memref<512x512xbf16, #tpu.memory_space<any>>) target(%arg13 : memref<512x512xbf16, #tpu.memory_space<vmem>>) target_semaphore(%3 : memref<!tpu.dma_semaphore, #tpu.memory_space<semaphore_mem>>)
    %c2_i32 = arith.constant 2 : i32
    %4 = tpu.memref_slice %arg18[%c2_i32] : memref<3x!tpu.dma_semaphore, #tpu.memory_space<semaphore_mem>> -> memref<1x!tpu.dma_semaphore, #tpu.memory_space<semaphore_mem>>
    %5 = tpu.memref_squeeze %4 : memref<1x!tpu.dma_semaphore, #tpu.memory_space<semaphore_mem>> -> memref<!tpu.dma_semaphore, #tpu.memory_space<semaphore_mem>>
    tpu.enqueue_dma source(%arg10 : memref<512x128xbf16, #tpu.memory_space<any>>) target(%arg14 : memref<512x128xbf16, #tpu.memory_space<vmem>>) target_semaphore(%5 : memref<!tpu.dma_semaphore, #tpu.memory_space<semaphore_mem>>)
    %c0 = arith.constant 0 : index
    %c0_0 = arith.constant 0 : index
    %6 = vector.load %arg0[%c0, %c0_0] : memref<128x256xbf16, #tpu.memory_space<vmem>>, vector<128x256xbf16>
    %c0_1 = arith.constant 0 : index
    %c0_2 = arith.constant 0 : index
    %7 = vector.load %arg1[%c0_1, %c0_2] : memref<256x128xbf16, #tpu.memory_space<vmem>>, vector<256x128xbf16>
    %cst = arith.constant dense<0.000000e+00> : vector<128x128xf32>
    %8 = tpu.matmul %6, %7, %cst {dimension_numbers = #tpu.dot_dimension_numbers<[1], [0], [0], [1], [0, 0, 1, 1], [], []>} : vector<128x256xbf16>, vector<256x128xbf16>, vector<128x128xf32> -> vector<128x128xf32>
    %c0_3 = arith.constant 0 : index
    %c0_4 = arith.constant 0 : index
    %9 = vector.load %arg2[%c0_3, %c0_4] : memref<1x128xf32, #tpu.memory_space<vmem>>, vector<1x128xf32>
    %10 = vector.broadcast %9 : vector<1x128xf32> to vector<128x128xf32>
    %11 = arith.addf %8, %10 : vector<128x128xf32>
    %cst_5 = arith.constant 0.000000e+00 : f32
    %12 = vector.broadcast %cst_5 : f32 to vector<128x128xf32>
    %13 = arith.maximumf %11, %12 : vector<128x128xf32>
    %14 = arith.truncf %13 : vector<128x128xf32> to vector<128x128xbf16>
    %c0_6 = arith.constant 0 : index
    %c0_7 = arith.constant 0 : index
    %15 = vector.load %arg15[%c0_6, %c0_7] : memref<128x128xbf16, #tpu.memory_space<vmem>>, vector<128x128xbf16>
    tpu.vector_store %arg15[%c0_6, %c0_7], %14 {strides = array<i32>} : memref<128x128xbf16, #tpu.memory_space<vmem>>, vector<128x128xbf16>,
    %cst_8 = arith.constant 0.000000e+00 : f32
    %16 = vector.broadcast %cst_8 : f32 to vector<8x128xf32>
    %c0_9 = arith.constant 0 : index
    %c0_10 = arith.constant 0 : index
    %17 = vector.load %arg15[%c0_9, %c0_10] : memref<128x128xbf16, #tpu.memory_space<vmem>>, vector<8x128xbf16>
    %c0_11 = arith.constant 0 : index
    %c0_12 = arith.constant 0 : index
    %c0_13 = arith.constant 0 : index
    %18 = vector.load %arg3[%c0_11, %c0_12, %c0_13] : memref<16x128x128xbf16, #tpu.memory_space<vmem>>, vector<1x128x128xbf16>
    %19 = vector.shape_cast %18 : vector<1x128x128xbf16> to vector<128x128xbf16>
    %cst_14 = arith.constant dense<0.000000e+00> : vector<8x128xf32>
    %20 = tpu.matmul %17, %19, %cst_14 {dimension_numbers = #tpu.dot_dimension_numbers<[1], [0], [0], [1], [0, 0, 1, 1], [], []>} : vector<8x128xbf16>, vector<128x128xbf16>, vector<8x128xf32> -> vector<8x128xf32>
    %21 = arith.addf %16, %20 : vector<8x128xf32>
    %c8 = arith.constant 8 : index
    %c0_15 = arith.constant 0 : index
    %22 = vector.load %arg15[%c8, %c0_15] : memref<128x128xbf16, #tpu.memory_space<vmem>>, vector<8x128xbf16>
    %c1 = arith.constant 1 : index
    %c0_16 = arith.constant 0 : index
    %c0_17 = arith.constant 0 : index
    %23 = vector.load %arg3[%c1, %c0_16, %c0_17] : memref<16x128x128xbf16, #tpu.memory_space<vmem>>, vector<1x128x128xbf16>
    %24 = vector.shape_cast %23 : vector<1x128x128xbf16> to vector<128x128xbf16>
    %cst_18 = arith.constant dense<0.000000e+00> : vector<8x128xf32>
    %25 = tpu.matmul %22, %24, %cst_18 {dimension_numbers = #tpu.dot_dimension_numbers<[1], [0], [0], [1], [0, 0, 1, 1], [], []>} : vector<8x128xbf16>, vector<128x128xbf16>, vector<8x128xf32> -> vector<8x128xf32>
    %26 = arith.addf %21, %25 : vector<8x128xf32>
    %c16 = arith.constant 16 : index
    %c0_19 = arith.constant 0 : index
    %27 = vector.load %arg15[%c16, %c0_19] : memref<128x128xbf16, #tpu.memory_space<vmem>>, vector<8x128xbf16>
    %c2 = arith.constant 2 : index
    %c0_20 = arith.constant 0 : index
    %c0_21 = arith.constant 0 : index
    %28 = vector.load %arg3[%c2, %c0_20, %c0_21] : memref<16x128x128xbf16, #tpu.memory_space<vmem>>, vector<1x128x128xbf16>
    %29 = vector.shape_cast %28 : vector<1x128x128xbf16> to vector<128x128xbf16>
    %cst_22 = arith.constant dense<0.000000e+00> : vector<8x128xf32>
    %30 = tpu.matmul %27, %29, %cst_22 {dimension_numbers = #tpu.dot_dimension_numbers<[1], [0], [0], [1], [0, 0, 1, 1], [], []>} : vector<8x128xbf16>, vector<128x128xbf16>, vector<8x128xf32> -> vector<8x128xf32>
    %31 = arith.addf %26, %30 : vector<8x128xf32>
    %c24 = arith.constant 24 : index
    %c0_23 = arith.constant 0 : index
    %32 = vector.load %arg15[%c24, %c0_23] : memref<128x128xbf16, #tpu.memory_space<vmem>>, vector<8x128xbf16>
    %c3 = arith.constant 3 : index
    %c0_24 = arith.constant 0 : index
    %c0_25 = arith.constant 0 : index
    %33 = vector.load %arg3[%c3, %c0_24, %c0_25] : memref<16x128x128xbf16, #tpu.memory_space<vmem>>, vector<1x128x128xbf16>
    %34 = vector.shape_cast %33 : vector<1x128x128xbf16> to vector<128x128xbf16>
    %cst_26 = arith.constant dense<0.000000e+00> : vector<8x128xf32>
    %35 = tpu.matmul %32, %34, %cst_26 {dimension_numbers = #tpu.dot_dimension_numbers<[1], [0], [0], [1], [0, 0, 1, 1], [], []>} : vector<8x128xbf16>, vector<128x128xbf16>, vector<8x128xf32> -> vector<8x128xf32>
    %36 = arith.addf %31, %35 : vector<8x128xf32>
    %c32 = arith.constant 32 : index
    %c0_27 = arith.constant 0 : index
    %37 = vector.load %arg15[%c32, %c0_27] : memref<128x128xbf16, #tpu.memory_space<vmem>>, vector<8x128xbf16>
    %c4 = arith.constant 4 : index
    %c0_28 = arith.constant 0 : index
    %c0_29 = arith.constant 0 : index
    %38 = vector.load %arg3[%c4, %c0_28, %c0_29] : memref<16x128x128xbf16, #tpu.memory_space<vmem>>, vector<1x128x128xbf16>
    %39 = vector.shape_cast %38 : vector<1x128x128xbf16> to vector<128x128xbf16>
    %cst_30 = arith.constant dense<0.000000e+00> : vector<8x128xf32>
    %40 = tpu.matmul %37, %39, %cst_30 {dimension_numbers = #tpu.dot_dimension_numbers<[1], [0], [0], [1], [0, 0, 1, 1], [], []>} : vector<8x128xbf16>, vector<128x128xbf16>, vector<8x128xf32> -> vector<8x128xf32>
    %41 = arith.addf %36, %40 : vector<8x128xf32>
    %c40 = arith.constant 40 : index
    %c0_31 = arith.constant 0 : index
    %42 = vector.load %arg15[%c40, %c0_31] : memref<128x128xbf16, #tpu.memory_space<vmem>>, vector<8x128xbf16>
    %c5 = arith.constant 5 : index
    %c0_32 = arith.constant 0 : index
    %c0_33 = arith.constant 0 : index
    %43 = vector.load %arg3[%c5, %c0_32, %c0_33] : memref<16x128x128xbf16, #tpu.memory_space<vmem>>, vector<1x128x128xbf16>
    %44 = vector.shape_cast %43 : vector<1x128x128xbf16> to vector<128x128xbf16>
    %cst_34 = arith.constant dense<0.000000e+00> : vector<8x128xf32>
    %45 = tpu.matmul %42, %44, %cst_34 {dimension_numbers = #tpu.dot_dimension_numbers<[1], [0], [0], [1], [0, 0, 1, 1], [], []>} : vector<8x128xbf16>, vector<128x128xbf16>, vector<8x128xf32> -> vector<8x128xf32>
    %46 = arith.addf %41, %45 : vector<8x128xf32>
    %c48 = arith.constant 48 : index
    %c0_35 = arith.constant 0 : index
    %47 = vector.load %arg15[%c48, %c0_35] : memref<128x128xbf16, #tpu.memory_space<vmem>>, vector<8x128xbf16>
    %c6 = arith.constant 6 : index
    %c0_36 = arith.constant 0 : index
    %c0_37 = arith.constant 0 : index
    %48 = vector.load %arg3[%c6, %c0_36, %c0_37] : memref<16x128x128xbf16, #tpu.memory_space<vmem>>, vector<1x128x128xbf16>
    %49 = vector.shape_cast %48 : vector<1x128x128xbf16> to vector<128x128xbf16>
    %cst_38 = arith.constant dense<0.000000e+00> : vector<8x128xf32>
    %50 = tpu.matmul %47, %49, %cst_38 {dimension_numbers = #tpu.dot_dimension_numbers<[1], [0], [0], [1], [0, 0, 1, 1], [], []>} : vector<8x128xbf16>, vector<128x128xbf16>, vector<8x128xf32> -> vector<8x128xf32>
    %51 = arith.addf %46, %50 : vector<8x128xf32>
    %c56 = arith.constant 56 : index
    %c0_39 = arith.constant 0 : index
    %52 = vector.load %arg15[%c56, %c0_39] : memref<128x128xbf16, #tpu.memory_space<vmem>>, vector<8x128xbf16>
    %c7 = arith.constant 7 : index
    %c0_40 = arith.constant 0 : index
    %c0_41 = arith.constant 0 : index
    %53 = vector.load %arg3[%c7, %c0_40, %c0_41] : memref<16x128x128xbf16, #tpu.memory_space<vmem>>, vector<1x128x128xbf16>
    %54 = vector.shape_cast %53 : vector<1x128x128xbf16> to vector<128x128xbf16>
    %cst_42 = arith.constant dense<0.000000e+00> : vector<8x128xf32>
    %55 = tpu.matmul %52, %54, %cst_42 {dimension_numbers = #tpu.dot_dimension_numbers<[1], [0], [0], [1], [0, 0, 1, 1], [], []>} : vector<8x128xbf16>, vector<128x128xbf16>, vector<8x128xf32> -> vector<8x128xf32>
    %56 = arith.addf %51, %55 : vector<8x128xf32>
    %c64 = arith.constant 64 : index
    %c0_43 = arith.constant 0 : index
    %57 = vector.load %arg15[%c64, %c0_43] : memref<128x128xbf16, #tpu.memory_space<vmem>>, vector<8x128xbf16>
    %c8_44 = arith.constant 8 : index
    %c0_45 = arith.constant 0 : index
    %c0_46 = arith.constant 0 : index
    %58 = vector.load %arg3[%c8_44, %c0_45, %c0_46] : memref<16x128x128xbf16, #tpu.memory_space<vmem>>, vector<1x128x128xbf16>
    %59 = vector.shape_cast %58 : vector<1x128x128xbf16> to vector<128x128xbf16>
    %cst_47 = arith.constant dense<0.000000e+00> : vector<8x128xf32>
    %60 = tpu.matmul %57, %59, %cst_47 {dimension_numbers = #tpu.dot_dimension_numbers<[1], [0], [0], [1], [0, 0, 1, 1], [], []>} : vector<8x128xbf16>, vector<128x128xbf16>, vector<8x128xf32> -> vector<8x128xf32>
    %61 = arith.addf %56, %60 : vector<8x128xf32>
    %c72 = arith.constant 72 : index
    %c0_48 = arith.constant 0 : index
    %62 = vector.load %arg15[%c72, %c0_48] : memref<128x128xbf16, #tpu.memory_space<vmem>>, vector<8x128xbf16>
    %c9 = arith.constant 9 : index
    %c0_49 = arith.constant 0 : index
    %c0_50 = arith.constant 0 : index
    %63 = vector.load %arg3[%c9, %c0_49, %c0_50] : memref<16x128x128xbf16, #tpu.memory_space<vmem>>, vector<1x128x128xbf16>
    %64 = vector.shape_cast %63 : vector<1x128x128xbf16> to vector<128x128xbf16>
    %cst_51 = arith.constant dense<0.000000e+00> : vector<8x128xf32>
    %65 = tpu.matmul %62, %64, %cst_51 {dimension_numbers = #tpu.dot_dimension_numbers<[1], [0], [0], [1], [0, 0, 1, 1], [], []>} : vector<8x128xbf16>, vector<128x128xbf16>, vector<8x128xf32> -> vector<8x128xf32>
    %66 = arith.addf %61, %65 : vector<8x128xf32>
    %c80 = arith.constant 80 : index
    %c0_52 = arith.constant 0 : index
    %67 = vector.load %arg15[%c80, %c0_52] : memref<128x128xbf16, #tpu.memory_space<vmem>>, vector<8x128xbf16>
    %c10 = arith.constant 10 : index
    %c0_53 = arith.constant 0 : index
    %c0_54 = arith.constant 0 : index
    %68 = vector.load %arg3[%c10, %c0_53, %c0_54] : memref<16x128x128xbf16, #tpu.memory_space<vmem>>, vector<1x128x128xbf16>
    %69 = vector.shape_cast %68 : vector<1x128x128xbf16> to vector<128x128xbf16>
    %cst_55 = arith.constant dense<0.000000e+00> : vector<8x128xf32>
    %70 = tpu.matmul %67, %69, %cst_55 {dimension_numbers = #tpu.dot_dimension_numbers<[1], [0], [0], [1], [0, 0, 1, 1], [], []>} : vector<8x128xbf16>, vector<128x128xbf16>, vector<8x128xf32> -> vector<8x128xf32>
    %71 = arith.addf %66, %70 : vector<8x128xf32>
    %c88 = arith.constant 88 : index
    %c0_56 = arith.constant 0 : index
    %72 = vector.load %arg15[%c88, %c0_56] : memref<128x128xbf16, #tpu.memory_space<vmem>>, vector<8x128xbf16>
    %c11 = arith.constant 11 : index
    %c0_57 = arith.constant 0 : index
    %c0_58 = arith.constant 0 : index
    %73 = vector.load %arg3[%c11, %c0_57, %c0_58] : memref<16x128x128xbf16, #tpu.memory_space<vmem>>, vector<1x128x128xbf16>
    %74 = vector.shape_cast %73 : vector<1x128x128xbf16> to vector<128x128xbf16>
    %cst_59 = arith.constant dense<0.000000e+00> : vector<8x128xf32>
    %75 = tpu.matmul %72, %74, %cst_59 {dimension_numbers = #tpu.dot_dimension_numbers<[1], [0], [0], [1], [0, 0, 1, 1], [], []>} : vector<8x128xbf16>, vector<128x128xbf16>, vector<8x128xf32> -> vector<8x128xf32>
    %76 = arith.addf %71, %75 : vector<8x128xf32>
    %c96 = arith.constant 96 : index
    %c0_60 = arith.constant 0 : index
    %77 = vector.load %arg15[%c96, %c0_60] : memref<128x128xbf16, #tpu.memory_space<vmem>>, vector<8x128xbf16>
    %c12 = arith.constant 12 : index
    %c0_61 = arith.constant 0 : index
    %c0_62 = arith.constant 0 : index
    %78 = vector.load %arg3[%c12, %c0_61, %c0_62] : memref<16x128x128xbf16, #tpu.memory_space<vmem>>, vector<1x128x128xbf16>
    %79 = vector.shape_cast %78 : vector<1x128x128xbf16> to vector<128x128xbf16>
    %cst_63 = arith.constant dense<0.000000e+00> : vector<8x128xf32>
    %80 = tpu.matmul %77, %79, %cst_63 {dimension_numbers = #tpu.dot_dimension_numbers<[1], [0], [0], [1], [0, 0, 1, 1], [], []>} : vector<8x128xbf16>, vector<128x128xbf16>, vector<8x128xf32> -> vector<8x128xf32>
    %81 = arith.addf %76, %80 : vector<8x128xf32>
    %c104 = arith.constant 104 : index
    %c0_64 = arith.constant 0 : index
    %82 = vector.load %arg15[%c104, %c0_64] : memref<128x128xbf16, #tpu.memory_space<vmem>>, vector<8x128xbf16>
    %c13 = arith.constant 13 : index
    %c0_65 = arith.constant 0 : index
    %c0_66 = arith.constant 0 : index
    %83 = vector.load %arg3[%c13, %c0_65, %c0_66] : memref<16x128x128xbf16, #tpu.memory_space<vmem>>, vector<1x128x128xbf16>
    %84 = vector.shape_cast %83 : vector<1x128x128xbf16> to vector<128x128xbf16>
    %cst_67 = arith.constant dense<0.000000e+00> : vector<8x128xf32>
    %85 = tpu.matmul %82, %84, %cst_67 {dimension_numbers = #tpu.dot_dimension_numbers<[1], [0], [0], [1], [0, 0, 1, 1], [], []>} : vector<8x128xbf16>, vector<128x128xbf16>, vector<8x128xf32> -> vector<8x128xf32>
    %86 = arith.addf %81, %85 : vector<8x128xf32>
    %c112 = arith.constant 112 : index
    %c0_68 = arith.constant 0 : index
    %87 = vector.load %arg15[%c112, %c0_68] : memref<128x128xbf16, #tpu.memory_space<vmem>>, vector<8x128xbf16>
    %c14 = arith.constant 14 : index
    %c0_69 = arith.constant 0 : index
    %c0_70 = arith.constant 0 : index
    %88 = vector.load %arg3[%c14, %c0_69, %c0_70] : memref<16x128x128xbf16, #tpu.memory_space<vmem>>, vector<1x128x128xbf16>
    %89 = vector.shape_cast %88 : vector<1x128x128xbf16> to vector<128x128xbf16>
    %cst_71 = arith.constant dense<0.000000e+00> : vector<8x128xf32>
    %90 = tpu.matmul %87, %89, %cst_71 {dimension_numbers = #tpu.dot_dimension_numbers<[1], [0], [0], [1], [0, 0, 1, 1], [], []>} : vector<8x128xbf16>, vector<128x128xbf16>, vector<8x128xf32> -> vector<8x128xf32>
    %91 = arith.addf %86, %90 : vector<8x128xf32>
    %c120 = arith.constant 120 : index
    %c0_72 = arith.constant 0 : index
    %92 = vector.load %arg15[%c120, %c0_72] : memref<128x128xbf16, #tpu.memory_space<vmem>>, vector<8x128xbf16>
    %c15 = arith.constant 15 : index
    %c0_73 = arith.constant 0 : index
    %c0_74 = arith.constant 0 : index
    %93 = vector.load %arg3[%c15, %c0_73, %c0_74] : memref<16x128x128xbf16, #tpu.memory_space<vmem>>, vector<1x128x128xbf16>
    %94 = vector.shape_cast %93 : vector<1x128x128xbf16> to vector<128x128xbf16>
    %cst_75 = arith.constant dense<0.000000e+00> : vector<8x128xf32>
    %95 = tpu.matmul %92, %94, %cst_75 {dimension_numbers = #tpu.dot_dimension_numbers<[1], [0], [0], [1], [0, 0, 1, 1], [], []>} : vector<8x128xbf16>, vector<128x128xbf16>, vector<8x128xf32> -> vector<8x128xf32>
    %96 = arith.addf %91, %95 : vector<8x128xf32>
    %c0_76 = arith.constant 0 : index
    %c0_77 = arith.constant 0 : index
    %97 = vector.load %arg4[%c0_76, %c0_77] : memref<1x128xf32, #tpu.memory_space<vmem>>, vector<1x128xf32>
    %98 = vector.broadcast %97 : vector<1x128xf32> to vector<8x128xf32>
    %99 = arith.addf %96, %98 : vector<8x128xf32>
    %cst_78 = arith.constant 0.000000e+00 : f32
    %100 = vector.broadcast %cst_78 : f32 to vector<8x128xf32>
    %101 = arith.maximumf %99, %100 : vector<8x128xf32>
    %102 = arith.truncf %101 : vector<8x128xf32> to vector<8x128xbf16>
    %c0_79 = arith.constant 0 : index
    %c0_80 = arith.constant 0 : index
    %103 = vector.load %arg16[%c0_79, %c0_80] : memref<8x128xbf16, #tpu.memory_space<vmem>>, vector<8x128xbf16>
    tpu.vector_store %arg16[%c0_79, %c0_80], %102 {strides = array<i32>} : memref<8x128xbf16, #tpu.memory_space<vmem>>, vector<8x128xbf16>,
    %c0_81 = arith.constant 0 : index
    %c0_82 = arith.constant 0 : index
    %104 = vector.load %arg16[%c0_81, %c0_82] : memref<8x128xbf16, #tpu.memory_space<vmem>>, vector<2x128xbf16>
    %c0_83 = arith.constant 0 : index
    %c0_84 = arith.constant 0 : index
    %105 = vector.load %arg17[%c0_83, %c0_84] : memref<2x512xbf16, #tpu.memory_space<vmem>>, vector<2x128xbf16>
    tpu.vector_store %arg17[%c0_83, %c0_84], %104 {strides = array<i32>} : memref<2x512xbf16, #tpu.memory_space<vmem>>, vector<2x128xbf16>,
    %c2_85 = arith.constant 2 : index
    %c0_86 = arith.constant 0 : index
    %106 = vector.load %arg16[%c2_85, %c0_86] : memref<8x128xbf16, #tpu.memory_space<vmem>>, vector<2x128xbf16>
    %c0_87 = arith.constant 0 : index
    %c128 = arith.constant 128 : index
    %107 = vector.load %arg17[%c0_87, %c128] : memref<2x512xbf16, #tpu.memory_space<vmem>>, vector<2x128xbf16>
    tpu.vector_store %arg17[%c0_87, %c128], %106 {strides = array<i32>} : memref<2x512xbf16, #tpu.memory_space<vmem>>, vector<2x128xbf16>,
    %c4_88 = arith.constant 4 : index
    %c0_89 = arith.constant 0 : index
    %108 = vector.load %arg16[%c4_88, %c0_89] : memref<8x128xbf16, #tpu.memory_space<vmem>>, vector<2x128xbf16>
    %c0_90 = arith.constant 0 : index
    %c256 = arith.constant 256 : index
    %109 = vector.load %arg17[%c0_90, %c256] : memref<2x512xbf16, #tpu.memory_space<vmem>>, vector<2x128xbf16>
    tpu.vector_store %arg17[%c0_90, %c256], %108 {strides = array<i32>} : memref<2x512xbf16, #tpu.memory_space<vmem>>, vector<2x128xbf16>,
    %c6_91 = arith.constant 6 : index
    %c0_92 = arith.constant 0 : index
    %110 = vector.load %arg16[%c6_91, %c0_92] : memref<8x128xbf16, #tpu.memory_space<vmem>>, vector<2x128xbf16>
    %c0_93 = arith.constant 0 : index
    %c384 = arith.constant 384 : index
    %111 = vector.load %arg17[%c0_93, %c384] : memref<2x512xbf16, #tpu.memory_space<vmem>>, vector<2x128xbf16>
    tpu.vector_store %arg17[%c0_93, %c384], %110 {strides = array<i32>} : memref<2x512xbf16, #tpu.memory_space<vmem>>, vector<2x128xbf16>,
    %c0_94 = arith.constant 0 : index
    %c0_95 = arith.constant 0 : index
    %112 = vector.load %arg17[%c0_94, %c0_95] : memref<2x512xbf16, #tpu.memory_space<vmem>>, vector<2x512xbf16>
    %c0_i32_96 = arith.constant 0 : i32
    %113 = tpu.memref_slice %arg18[%c0_i32_96] : memref<3x!tpu.dma_semaphore, #tpu.memory_space<semaphore_mem>> -> memref<1x!tpu.dma_semaphore, #tpu.memory_space<semaphore_mem>>
    %114 = tpu.memref_squeeze %113 : memref<1x!tpu.dma_semaphore, #tpu.memory_space<semaphore_mem>> -> memref<!tpu.dma_semaphore, #tpu.memory_space<semaphore_mem>>
    tpu.wait_dma2 semaphore(%114 : memref<!tpu.dma_semaphore, #tpu.memory_space<semaphore_mem>>) src(%arg8 : memref<512x512xbf16, #tpu.memory_space<any>>) dst(%arg12 : memref<512x512xbf16, #tpu.memory_space<vmem>>)
    %c0_97 = arith.constant 0 : index
    %c0_98 = arith.constant 0 : index
    %115 = vector.load %arg12[%c0_97, %c0_98] : memref<512x512xbf16, #tpu.memory_space<vmem>>, vector<512x512xbf16>
    %cst_99 = arith.constant dense<0.000000e+00> : vector<2x512xf32>
    %116 = tpu.matmul %112, %115, %cst_99 {dimension_numbers = #tpu.dot_dimension_numbers<[1], [0], [0], [1], [0, 0, 1, 1], [], []>} : vector<2x512xbf16>, vector<512x512xbf16>, vector<2x512xf32> -> vector<2x512xf32>
    %c0_100 = arith.constant 0 : index
    %c0_101 = arith.constant 0 : index
    %117 = vector.load %arg5[%c0_100, %c0_101] : memref<1x512xf32, #tpu.memory_space<vmem>>, vector<1x512xf32>
    %118 = vector.broadcast %117 : vector<1x512xf32> to vector<2x512xf32>
    %119 = arith.addf %116, %118 : vector<2x512xf32>
    %cst_102 = arith.constant 0.000000e+00 : f32
    %120 = vector.broadcast %cst_102 : f32 to vector<2x512xf32>
    %121 = arith.maximumf %119, %120 : vector<2x512xf32>
    %122 = arith.truncf %121 : vector<2x512xf32> to vector<2x512xbf16>
    %c1_i32_103 = arith.constant 1 : i32
    %123 = tpu.memref_slice %arg18[%c1_i32_103] : memref<3x!tpu.dma_semaphore, #tpu.memory_space<semaphore_mem>> -> memref<1x!tpu.dma_semaphore, #tpu.memory_space<semaphore_mem>>
    %124 = tpu.memref_squeeze %123 : memref<1x!tpu.dma_semaphore, #tpu.memory_space<semaphore_mem>> -> memref<!tpu.dma_semaphore, #tpu.memory_space<semaphore_mem>>
    tpu.wait_dma2 semaphore(%124 : memref<!tpu.dma_semaphore, #tpu.memory_space<semaphore_mem>>) src(%arg9 : memref<512x512xbf16, #tpu.memory_space<any>>) dst(%arg13 : memref<512x512xbf16, #tpu.memory_space<vmem>>)
    %c0_104 = arith.constant 0 : index
    %c0_105 = arith.constant 0 : index
    %125 = vector.load %arg13[%c0_104, %c0_105] : memref<512x512xbf16, #tpu.memory_space<vmem>>, vector<512x512xbf16>
    %cst_106 = arith.constant dense<0.000000e+00> : vector<2x512xf32>
    %126 = tpu.matmul %122, %125, %cst_106 {dimension_numbers = #tpu.dot_dimension_numbers<[1], [0], [0], [1], [0, 0, 1, 1], [], []>} : vector<2x512xbf16>, vector<512x512xbf16>, vector<2x512xf32> -> vector<2x512xf32>
    %c0_107 = arith.constant 0 : index
    %c0_108 = arith.constant 0 : index
    %127 = vector.load %arg6[%c0_107, %c0_108] : memref<1x512xf32, #tpu.memory_space<vmem>>, vector<1x512xf32>
    %128 = vector.broadcast %127 : vector<1x512xf32> to vector<2x512xf32>
    %129 = arith.addf %126, %128 : vector<2x512xf32>
    %cst_109 = arith.constant 0.000000e+00 : f32
    %130 = vector.broadcast %cst_109 : f32 to vector<2x512xf32>
    %131 = arith.maximumf %129, %130 : vector<2x512xf32>
    %132 = arith.truncf %131 : vector<2x512xf32> to vector<2x512xbf16>
    %c2_i32_110 = arith.constant 2 : i32
    %133 = tpu.memref_slice %arg18[%c2_i32_110] : memref<3x!tpu.dma_semaphore, #tpu.memory_space<semaphore_mem>> -> memref<1x!tpu.dma_semaphore, #tpu.memory_space<semaphore_mem>>
    %134 = tpu.memref_squeeze %133 : memref<1x!tpu.dma_semaphore, #tpu.memory_space<semaphore_mem>> -> memref<!tpu.dma_semaphore, #tpu.memory_space<semaphore_mem>>
    tpu.wait_dma2 semaphore(%134 : memref<!tpu.dma_semaphore, #tpu.memory_space<semaphore_mem>>) src(%arg10 : memref<512x128xbf16, #tpu.memory_space<any>>) dst(%arg14 : memref<512x128xbf16, #tpu.memory_space<vmem>>)
    %c0_111 = arith.constant 0 : index
    %c0_112 = arith.constant 0 : index
    %135 = vector.load %arg14[%c0_111, %c0_112] : memref<512x128xbf16, #tpu.memory_space<vmem>>, vector<512x128xbf16>
    %cst_113 = arith.constant dense<0.000000e+00> : vector<2x128xf32>
    %136 = tpu.matmul %132, %135, %cst_113 {dimension_numbers = #tpu.dot_dimension_numbers<[1], [0], [0], [1], [0, 0, 1, 1], [], []>} : vector<2x512xbf16>, vector<512x128xbf16>, vector<2x128xf32> -> vector<2x128xf32>
    %c0_114 = arith.constant 0 : index
    %c0_115 = arith.constant 0 : index
    %137 = vector.load %arg7[%c0_114, %c0_115] : memref<1x128xf32, #tpu.memory_space<vmem>>, vector<1x128xf32>
    %138 = vector.broadcast %137 : vector<1x128xf32> to vector<2x128xf32>
    %139 = arith.addf %136, %138 : vector<2x128xf32>
    %c0_116 = arith.constant 0 : index
    %c0_117 = arith.constant 0 : index
    %140 = vector.load %arg11[%c0_116, %c0_117] : memref<2x128xf32, #tpu.memory_space<vmem>>, vector<2x128xf32>
    tpu.vector_store %arg11[%c0_116, %c0_117], %139 {strides = array<i32>} : memref<2x128xf32, #tpu.memory_space<vmem>>, vector<2x128xf32>,
    return
  }
}

</mosaic_0001>

<bundles_post_ra>
// kernel: neural_network_forward.1
= control target key start
LH: loop header
LB: loop body
LE: loop exit
PB: predicated region body
PF: predicated region fallthrough
CT: control target
= control target key end

     0   :  { %16 = vsyncpa [#allocation10], 0  ;;  %s8879_s0 = inlined_call_operand.vmem [shape: bf16[128,256], index: 0, kind: input, shape index: {}]   ;;  %s8880_s1 = inlined_call_operand.vmem [shape: bf16[256,128], index: 1, kind: input, shape index: {}]   ;;  %s8881_s2 = inlined_call_operand.vmem [shape: f32[1,128], index: 2, kind: input, shape index: {}]   ;;  %s8882_s3 = inlined_call_operand.vmem [shape: bf16[16,128,128], index: 3, kind: input, shape index: {}]   ;;  %s8883_s4 = inlined_call_operand.vmem [shape: f32[1,128], index: 4, kind: input, shape index: {}]   ;;  %s8884_s5 = inlined_call_operand.vmem [shape: f32[1,512], index: 5, kind: input, shape index: {}]   ;;  %s8885_s6 = inlined_call_operand.vmem [shape: f32[1,512], index: 6, kind: input, shape index: {}]   ;;  %s8886_s7 = inlined_call_operand.vmem [shape: f32[1,128], index: 7, kind: input, shape index: {}]   ;;  %s8887_s8 = inlined_call_operand.vmem [shape: bf16[512,512], index: 8, kind: input, shape index: {}]   ;;  %s8888_s9 = inlined_call_operand.vmem [shape: bf16[512,512], index: 9, kind: input, shape index: {}]   ;;  %s8889_s10 = inlined_call_operand.vmem [shape: bf16[512,128], index: 10, kind: input, shape index: {}]   ;;  %s8890_s11 = inlined_call_operand.hbm [shape: f32[2,128], index: 11, kind: output, shape index: {}]  }
   0x1   :  { %v51_v0 = vld [vmem:[%s8887_s8] sm:$0xf]  ;;  %v53_v1 = vld [vmem:[%s8887_s8 + $0x10] sm:$0xf]  ;;  %v55_v2 = vld [vmem:[%s8887_s8 + $0x4] sm:$0xf] }
   0x2   :  { %52 = vst [vmem:[#allocation2] sm:$0xf] %v51_v0  ;;  %54 = vst [vmem:[#allocation2 + $0x4] sm:$0xf] %v53_v1  ;;  %v57_v3 = vld [vmem:[%s8887_s8 + $0x14] sm:$0xf] }
   0x3   :  { %v59_v4 = vld [vmem:[%s8887_s8 + $0x8] sm:$0xf]  ;;  %56 = vst [vmem:[#allocation2 + $0x8] sm:$0xf] %v55_v2  ;;  %58 = vst [vmem:[#allocation2 + $0xc] sm:$0xf] %v57_v3 }
   0x4   :  { %60 = vst [vmem:[#allocation2 + $0x10] sm:$0xf] %v59_v4  ;;  %v61_v5 = vld [vmem:[%s8887_s8 + $0x18] sm:$0xf]  ;;  %v63_v6 = vld [vmem:[%s8887_s8 + $0xc] sm:$0xf] }
   0x5   :  { %v65_v7 = vld [vmem:[%s8887_s8 + $0x1c] sm:$0xff]   ;;  %62 = vst [vmem:[#allocation2 + $0x14] sm:$0xf] %v61_v5  ;;  %64 = vst [vmem:[#allocation2 + $0x18] sm:$0xf] %v63_v6 }
   0x6   :  { %66 = vst [vmem:[#allocation2 + $0x1c] sm:$0xff] %v65_v7   ;;  %v69_v8 = vld [vmem:[%s8887_s8 + $0x30] sm:$0xf]  ;;  %v71_v9 = vld [vmem:[%s8887_s8 + $0x24] sm:$0xf]  ;;  %v81_v14 = vld [vmem:[%s8887_s8 + $0x3c] sm:$0xff]  }
   0x7   :  { %v73_v10 = vld [vmem:[%s8887_s8 + $0x34] sm:$0xf]  ;;  %70 = vst [vmem:[#allocation2 + $0x24] sm:$0xf] %v69_v8  ;;  %72 = vst [vmem:[#allocation2 + $0x28] sm:$0xf] %v71_v9 }
   0x8   :  { %74 = vst [vmem:[#allocation2 + $0x2c] sm:$0xf] %v73_v10  ;;  %v75_v11 = vld [vmem:[%s8887_s8 + $0x28] sm:$0xf]  ;;  %v77_v12 = vld [vmem:[%s8887_s8 + $0x38] sm:$0xf] }
   0x9   :  { %v79_v13 = vld [vmem:[%s8887_s8 + $0x2c] sm:$0xf]  ;;  %76 = vst [vmem:[#allocation2 + $0x30] sm:$0xf] %v75_v11  ;;  %78 = vst [vmem:[#allocation2 + $0x34] sm:$0xf] %v77_v12 }
   0xa   :  { %80 = vst [vmem:[#allocation2 + $0x38] sm:$0xf] %v79_v13  ;;  %v85_v15 = vld [vmem:[%s8887_s8 + $0x50] sm:$0xf]  ;;  %v87_v16 = vld [vmem:[%s8887_s8 + $0x44] sm:$0xf] }
   0xb   :  { %82 = vst [vmem:[#allocation2 + $0x3c] sm:$0xff] %v81_v14   ;;  %86 = vst [vmem:[#allocation2 + $0x44] sm:$0xf] %v85_v15  ;;  %v89_v17 = vld [vmem:[%s8887_s8 + $0x54] sm:$0xf]  ;;  %v97_v21 = vld [vmem:[%s8887_s8 + $0x5c] sm:$0xff]  }
   0xc   :  { %88 = vst [vmem:[#allocation2 + $0x48] sm:$0xf] %v87_v16  ;;  %v91_v18 = vld [vmem:[%s8887_s8 + $0x48] sm:$0xf]  ;;  %v93_v19 = vld [vmem:[%s8887_s8 + $0x58] sm:$0xf] }
   0xd   :  { %90 = vst [vmem:[#allocation2 + $0x4c] sm:$0xf] %v89_v17  ;;  %92 = vst [vmem:[#allocation2 + $0x50] sm:$0xf] %v91_v18  ;;  %v95_v20 = vld [vmem:[%s8887_s8 + $0x4c] sm:$0xf] }
   0xe   :  { %94 = vst [vmem:[#allocation2 + $0x54] sm:$0xf] %v93_v19  ;;  %v101_v22 = vld [vmem:[%s8887_s8 + $0x70] sm:$0xf]  ;;  %96 = vst [vmem:[#allocation2 + $0x58] sm:$0xf] %v95_v20 }
   0xf   :  { %98 = vst [vmem:[#allocation2 + $0x5c] sm:$0xff] %v97_v21   ;;  %102 = vst [vmem:[#allocation2 + $0x64] sm:$0xf] %v101_v22  ;;  %v103_v23 = vld [vmem:[%s8887_s8 + $0x64] sm:$0xf]  ;;  %v113_v28 = vld [vmem:[%s8887_s8 + $0x7c] sm:$0xff]  }
  0x10   :  { %v105_v24 = vld [vmem:[%s8887_s8 + $0x74] sm:$0xf]  ;;  %v107_v25 = vld [vmem:[%s8887_s8 + $0x68] sm:$0xf]  ;;  %104 = vst [vmem:[#allocation2 + $0x68] sm:$0xf] %v103_v23 }
  0x11   :  { %106 = vst [vmem:[#allocation2 + $0x6c] sm:$0xf] %v105_v24  ;;  %108 = vst [vmem:[#allocation2 + $0x70] sm:$0xf] %v107_v25  ;;  %v109_v26 = vld [vmem:[%s8887_s8 + $0x78] sm:$0xf] }
  0x12   :  { %v111_v27 = vld [vmem:[%s8887_s8 + $0x6c] sm:$0xf]  ;;  %110 = vst [vmem:[#allocation2 + $0x74] sm:$0xf] %v109_v26  ;;  %114 = vst [vmem:[#allocation2 + $0x7c] sm:$0xff] %v113_v28   ;;  %v129_v35 = vld [vmem:[%s8887_s8 + $0x9c] sm:$0xff]  }
  0x13   :  { %112 = vst [vmem:[#allocation2 + $0x78] sm:$0xf] %v111_v27  ;;  %v117_v29 = vld [vmem:[%s8887_s8 + $0x90] sm:$0xf]  ;;  %v119_v30 = vld [vmem:[%s8887_s8 + $0x84] sm:$0xf] }
  0x14   :  { %v121_v31 = vld [vmem:[%s8887_s8 + $0x94] sm:$0xf]  ;;  %118 = vst [vmem:[#allocation2 + $0x84] sm:$0xf] %v117_v29  ;;  %120 = vst [vmem:[#allocation2 + $0x88] sm:$0xf] %v119_v30 }
  0x15   :  { %122 = vst [vmem:[#allocation2 + $0x8c] sm:$0xf] %v121_v31  ;;  %v123_v32 = vld [vmem:[%s8887_s8 + $0x88] sm:$0xf]  ;;  %v125_v33 = vld [vmem:[%s8887_s8 + $0x98] sm:$0xf] }
  0x16   :  { %v127_v34 = vld [vmem:[%s8887_s8 + $0x8c] sm:$0xf]  ;;  %124 = vst [vmem:[#allocation2 + $0x90] sm:$0xf] %v123_v32  ;;  %126 = vst [vmem:[#allocation2 + $0x94] sm:$0xf] %v125_v33 }
  0x17   :  { %128 = vst [vmem:[#allocation2 + $0x98] sm:$0xf] %v127_v34  ;;  %v133_v36 = vld [vmem:[%s8887_s8 + $0xb0] sm:$0xf]  ;;  %v135_v37 = vld [vmem:[%s8887_s8 + $0xa4] sm:$0xf] }
  0x18   :  { %130 = vst [vmem:[#allocation2 + $0x9c] sm:$0xff] %v129_v35   ;;  %134 = vst [vmem:[#allocation2 + $0xa4] sm:$0xf] %v133_v36  ;;  %v137_v38 = vld [vmem:[%s8887_s8 + $0xb4] sm:$0xf]  ;;  %v145_v42 = vld [vmem:[%s8887_s8 + $0xbc] sm:$0xff]  }
  0x19   :  { %136 = vst [vmem:[#allocation2 + $0xa8] sm:$0xf] %v135_v37  ;;  %v139_v39 = vld [vmem:[%s8887_s8 + $0xa8] sm:$0xf]  ;;  %v141_v40 = vld [vmem:[%s8887_s8 + $0xb8] sm:$0xf] }
  0x1a   :  { %138 = vst [vmem:[#allocation2 + $0xac] sm:$0xf] %v137_v38  ;;  %140 = vst [vmem:[#allocation2 + $0xb0] sm:$0xf] %v139_v39  ;;  %v143_v41 = vld [vmem:[%s8887_s8 + $0xac] sm:$0xf] }
  0x1b   :  { %142 = vst [vmem:[#allocation2 + $0xb4] sm:$0xf] %v141_v40  ;;  %v149_v43 = vld [vmem:[%s8887_s8 + $0xd0] sm:$0xf]  ;;  %144 = vst [vmem:[#allocation2 + $0xb8] sm:$0xf] %v143_v41 }
  0x1c   :  { %146 = vst [vmem:[#allocation2 + $0xbc] sm:$0xff] %v145_v42   ;;  %150 = vst [vmem:[#allocation2 + $0xc4] sm:$0xf] %v149_v43  ;;  %v151_v44 = vld [vmem:[%s8887_s8 + $0xc4] sm:$0xf]  ;;  %v161_v49 = vld [vmem:[%s8887_s8 + $0xdc] sm:$0xff]  }
  0x1d   :  { %v153_v45 = vld [vmem:[%s8887_s8 + $0xd4] sm:$0xf]  ;;  %v155_v46 = vld [vmem:[%s8887_s8 + $0xc8] sm:$0xf]  ;;  %152 = vst [vmem:[#allocation2 + $0xc8] sm:$0xf] %v151_v44 }
  0x1e   :  { %154 = vst [vmem:[#allocation2 + $0xcc] sm:$0xf] %v153_v45  ;;  %156 = vst [vmem:[#allocation2 + $0xd0] sm:$0xf] %v155_v46  ;;  %v157_v47 = vld [vmem:[%s8887_s8 + $0xd8] sm:$0xf] }
  0x1f   :  { %v159_v48 = vld [vmem:[%s8887_s8 + $0xcc] sm:$0xf]  ;;  %158 = vst [vmem:[#allocation2 + $0xd4] sm:$0xf] %v157_v47  ;;  %162 = vst [vmem:[#allocation2 + $0xdc] sm:$0xff] %v161_v49   ;;  %v177_v56 = vld [vmem:[%s8887_s8 + $0xfc] sm:$0xff]  }
  0x20   :  { %160 = vst [vmem:[#allocation2 + $0xd8] sm:$0xf] %v159_v48  ;;  %v165_v50 = vld [vmem:[%s8887_s8 + $0xf0] sm:$0xf]  ;;  %v167_v51 = vld [vmem:[%s8887_s8 + $0xe4] sm:$0xf] }
  0x21   :  { %v169_v52 = vld [vmem:[%s8887_s8 + $0xf4] sm:$0xf]  ;;  %166 = vst [vmem:[#allocation2 + $0xe4] sm:$0xf] %v165_v50  ;;  %168 = vst [vmem:[#allocation2 + $0xe8] sm:$0xf] %v167_v51 }
  0x22   :  { %170 = vst [vmem:[#allocation2 + $0xec] sm:$0xf] %v169_v52  ;;  %v171_v53 = vld [vmem:[%s8887_s8 + $0xe8] sm:$0xf]  ;;  %v173_v54 = vld [vmem:[%s8887_s8 + $0xf8] sm:$0xf] }
  0x23   :  { %v175_v55 = vld [vmem:[%s8887_s8 + $0xec] sm:$0xf]  ;;  %172 = vst [vmem:[#allocation2 + $0xf0] sm:$0xf] %v171_v53  ;;  %174 = vst [vmem:[#allocation2 + $0xf4] sm:$0xf] %v173_v54 }
  0x24   :  { %176 = vst [vmem:[#allocation2 + $0xf8] sm:$0xf] %v175_v55  ;;  %v181_v57 = vld [vmem:[%s8887_s8 + $0x110] sm:$0xf]  ;;  %v183_v58 = vld [vmem:[%s8887_s8 + $0x104] sm:$0xf] }
  0x25   :  { %178 = vst [vmem:[#allocation2 + $0xfc] sm:$0xff] %v177_v56   ;;  %182 = vst [vmem:[#allocation2 + $0x104] sm:$0xf] %v181_v57  ;;  %v185_v59 = vld [vmem:[%s8887_s8 + $0x114] sm:$0xf]  ;;  %v193_v63 = vld [vmem:[%s8887_s8 + $0x11c] sm:$0xff]  }
  0x26   :  { %184 = vst [vmem:[#allocation2 + $0x108] sm:$0xf] %v183_v58  ;;  %v187_v60 = vld [vmem:[%s8887_s8 + $0x108] sm:$0xf]  ;;  %v189_v61 = vld [vmem:[%s8887_s8 + $0x118] sm:$0xf] }
  0x27   :  { %186 = vst [vmem:[#allocation2 + $0x10c] sm:$0xf] %v185_v59  ;;  %188 = vst [vmem:[#allocation2 + $0x110] sm:$0xf] %v187_v60  ;;  %v191_v62 = vld [vmem:[%s8887_s8 + $0x10c] sm:$0xf] }
  0x28   :  { %190 = vst [vmem:[#allocation2 + $0x114] sm:$0xf] %v189_v61  ;;  %v197_v0 = vld [vmem:[%s8887_s8 + $0x130] sm:$0xf]  ;;  %192 = vst [vmem:[#allocation2 + $0x118] sm:$0xf] %v191_v62 }
  0x29   :  { %194 = vst [vmem:[#allocation2 + $0x11c] sm:$0xff] %v193_v63   ;;  %198 = vst [vmem:[#allocation2 + $0x124] sm:$0xf] %v197_v0  ;;  %v199_v1 = vld [vmem:[%s8887_s8 + $0x124] sm:$0xf]  ;;  %v209_v6 = vld [vmem:[%s8887_s8 + $0x13c] sm:$0xff]  }
  0x2a   :  { %v201_v2 = vld [vmem:[%s8887_s8 + $0x134] sm:$0xf]  ;;  %v203_v3 = vld [vmem:[%s8887_s8 + $0x128] sm:$0xf]  ;;  %200 = vst [vmem:[#allocation2 + $0x128] sm:$0xf] %v199_v1 }
  0x2b   :  { %202 = vst [vmem:[#allocation2 + $0x12c] sm:$0xf] %v201_v2  ;;  %204 = vst [vmem:[#allocation2 + $0x130] sm:$0xf] %v203_v3  ;;  %v205_v4 = vld [vmem:[%s8887_s8 + $0x138] sm:$0xf] }
  0x2c   :  { %v207_v5 = vld [vmem:[%s8887_s8 + $0x12c] sm:$0xf]  ;;  %206 = vst [vmem:[#allocation2 + $0x134] sm:$0xf] %v205_v4  ;;  %210 = vst [vmem:[#allocation2 + $0x13c] sm:$0xff] %v209_v6   ;;  %v225_v13 = vld [vmem:[%s8887_s8 + $0x15c] sm:$0xff]  }
  0x2d   :  { %208 = vst [vmem:[#allocation2 + $0x138] sm:$0xf] %v207_v5  ;;  %v213_v7 = vld [vmem:[%s8887_s8 + $0x150] sm:$0xf]  ;;  %v215_v8 = vld [vmem:[%s8887_s8 + $0x144] sm:$0xf] }
  0x2e   :  { %v217_v9 = vld [vmem:[%s8887_s8 + $0x154] sm:$0xf]  ;;  %214 = vst [vmem:[#allocation2 + $0x144] sm:$0xf] %v213_v7  ;;  %216 = vst [vmem:[#allocation2 + $0x148] sm:$0xf] %v215_v8 }
  0x2f   :  { %218 = vst [vmem:[#allocation2 + $0x14c] sm:$0xf] %v217_v9  ;;  %v219_v10 = vld [vmem:[%s8887_s8 + $0x148] sm:$0xf]  ;;  %v221_v11 = vld [vmem:[%s8887_s8 + $0x158] sm:$0xf] }
  0x30   :  { %v223_v12 = vld [vmem:[%s8887_s8 + $0x14c] sm:$0xf]  ;;  %220 = vst [vmem:[#allocation2 + $0x150] sm:$0xf] %v219_v10  ;;  %222 = vst [vmem:[#allocation2 + $0x154] sm:$0xf] %v221_v11 }
  0x31   :  { %224 = vst [vmem:[#allocation2 + $0x158] sm:$0xf] %v223_v12  ;;  %v229_v14 = vld [vmem:[%s8887_s8 + $0x170] sm:$0xf]  ;;  %v231_v15 = vld [vmem:[%s8887_s8 + $0x164] sm:$0xf] }
  0x32   :  { %226 = vst [vmem:[#allocation2 + $0x15c] sm:$0xff] %v225_v13   ;;  %230 = vst [vmem:[#allocation2 + $0x164] sm:$0xf] %v229_v14  ;;  %v233_v16 = vld [vmem:[%s8887_s8 + $0x174] sm:$0xf]  ;;  %v241_v20 = vld [vmem:[%s8887_s8 + $0x17c] sm:$0xff]  }
  0x33   :  { %232 = vst [vmem:[#allocation2 + $0x168] sm:$0xf] %v231_v15  ;;  %v235_v17 = vld [vmem:[%s8887_s8 + $0x168] sm:$0xf]  ;;  %v237_v18 = vld [vmem:[%s8887_s8 + $0x178] sm:$0xf] }
  0x34   :  { %234 = vst [vmem:[#allocation2 + $0x16c] sm:$0xf] %v233_v16  ;;  %236 = vst [vmem:[#allocation2 + $0x170] sm:$0xf] %v235_v17  ;;  %v239_v19 = vld [vmem:[%s8887_s8 + $0x16c] sm:$0xf] }
  0x35   :  { %238 = vst [vmem:[#allocation2 + $0x174] sm:$0xf] %v237_v18  ;;  %v245_v21 = vld [vmem:[%s8887_s8 + $0x190] sm:$0xf]  ;;  %240 = vst [vmem:[#allocation2 + $0x178] sm:$0xf] %v239_v19 }
  0x36   :  { %242 = vst [vmem:[#allocation2 + $0x17c] sm:$0xff] %v241_v20   ;;  %246 = vst [vmem:[#allocation2 + $0x184] sm:$0xf] %v245_v21  ;;  %v247_v22 = vld [vmem:[%s8887_s8 + $0x184] sm:$0xf]  ;;  %v257_v27 = vld [vmem:[%s8887_s8 + $0x19c] sm:$0xff]  }
  0x37   :  { %v249_v23 = vld [vmem:[%s8887_s8 + $0x194] sm:$0xf]  ;;  %v251_v24 = vld [vmem:[%s8887_s8 + $0x188] sm:$0xf]  ;;  %248 = vst [vmem:[#allocation2 + $0x188] sm:$0xf] %v247_v22 }
  0x38   :  { %250 = vst [vmem:[#allocation2 + $0x18c] sm:$0xf] %v249_v23  ;;  %252 = vst [vmem:[#allocation2 + $0x190] sm:$0xf] %v251_v24  ;;  %v253_v25 = vld [vmem:[%s8887_s8 + $0x198] sm:$0xf] }
  0x39   :  { %v255_v26 = vld [vmem:[%s8887_s8 + $0x18c] sm:$0xf]  ;;  %254 = vst [vmem:[#allocation2 + $0x194] sm:$0xf] %v253_v25  ;;  %258 = vst [vmem:[#allocation2 + $0x19c] sm:$0xff] %v257_v27   ;;  %v273_v34 = vld [vmem:[%s8887_s8 + $0x1bc] sm:$0xff]  }
  0x3a   :  { %256 = vst [vmem:[#allocation2 + $0x198] sm:$0xf] %v255_v26  ;;  %v261_v28 = vld [vmem:[%s8887_s8 + $0x1b0] sm:$0xf]  ;;  %v263_v29 = vld [vmem:[%s8887_s8 + $0x1a4] sm:$0xf] }
  0x3b   :  { %v265_v30 = vld [vmem:[%s8887_s8 + $0x1b4] sm:$0xf]  ;;  %262 = vst [vmem:[#allocation2 + $0x1a4] sm:$0xf] %v261_v28  ;;  %264 = vst [vmem:[#allocation2 + $0x1a8] sm:$0xf] %v263_v29 }
  0x3c   :  { %266 = vst [vmem:[#allocation2 + $0x1ac] sm:$0xf] %v265_v30  ;;  %v267_v31 = vld [vmem:[%s8887_s8 + $0x1a8] sm:$0xf]  ;;  %v269_v32 = vld [vmem:[%s8887_s8 + $0x1b8] sm:$0xf] }
  0x3d   :  { %v271_v33 = vld [vmem:[%s8887_s8 + $0x1ac] sm:$0xf]  ;;  %268 = vst [vmem:[#allocation2 + $0x1b0] sm:$0xf] %v267_v31  ;;  %270 = vst [vmem:[#allocation2 + $0x1b4] sm:$0xf] %v269_v32 }
  0x3e   :  { %272 = vst [vmem:[#allocation2 + $0x1b8] sm:$0xf] %v271_v33  ;;  %v277_v35 = vld [vmem:[%s8887_s8 + $0x1d0] sm:$0xf]  ;;  %v279_v36 = vld [vmem:[%s8887_s8 + $0x1c4] sm:$0xf] }
  0x3f   :  { %274 = vst [vmem:[#allocation2 + $0x1bc] sm:$0xff] %v273_v34   ;;  %278 = vst [vmem:[#allocation2 + $0x1c4] sm:$0xf] %v277_v35  ;;  %v281_v37 = vld [vmem:[%s8887_s8 + $0x1d4] sm:$0xf]  ;;  %v289_v41 = vld [vmem:[%s8887_s8 + $0x1dc] sm:$0xff]  }
  0x40   :  { %280 = vst [vmem:[#allocation2 + $0x1c8] sm:$0xf] %v279_v36  ;;  %v283_v38 = vld [vmem:[%s8887_s8 + $0x1c8] sm:$0xf]  ;;  %v285_v39 = vld [vmem:[%s8887_s8 + $0x1d8] sm:$0xf] }
  0x41   :  { %282 = vst [vmem:[#allocation2 + $0x1cc] sm:$0xf] %v281_v37  ;;  %284 = vst [vmem:[#allocation2 + $0x1d0] sm:$0xf] %v283_v38  ;;  %v287_v40 = vld [vmem:[%s8887_s8 + $0x1cc] sm:$0xf] }
  0x42   :  { %286 = vst [vmem:[#allocation2 + $0x1d4] sm:$0xf] %v285_v39  ;;  %v293_v42 = vld [vmem:[%s8887_s8 + $0x1f0] sm:$0xf]  ;;  %288 = vst [vmem:[#allocation2 + $0x1d8] sm:$0xf] %v287_v40 }
  0x43   :  { %290 = vst [vmem:[#allocation2 + $0x1dc] sm:$0xff] %v289_v41   ;;  %294 = vst [vmem:[#allocation2 + $0x1e4] sm:$0xf] %v293_v42  ;;  %v295_v43 = vld [vmem:[%s8887_s8 + $0x1e4] sm:$0xf]  ;;  %v305_v48 = vld [vmem:[%s8887_s8 + $0x1fc] sm:$0xff]  }
  0x44   :  { %v297_v44 = vld [vmem:[%s8887_s8 + $0x1f4] sm:$0xf]  ;;  %v299_v45 = vld [vmem:[%s8887_s8 + $0x1e8] sm:$0xf]  ;;  %296 = vst [vmem:[#allocation2 + $0x1e8] sm:$0xf] %v295_v43 }
  0x45   :  { %298 = vst [vmem:[#allocation2 + $0x1ec] sm:$0xf] %v297_v44  ;;  %300 = vst [vmem:[#allocation2 + $0x1f0] sm:$0xf] %v299_v45  ;;  %v301_v46 = vld [vmem:[%s8887_s8 + $0x1f8] sm:$0xf] }
  0x46   :  { %v303_v47 = vld [vmem:[%s8887_s8 + $0x1ec] sm:$0xf]  ;;  %302 = vst [vmem:[#allocation2 + $0x1f4] sm:$0xf] %v301_v46  ;;  %306 = vst [vmem:[#allocation2 + $0x1fc] sm:$0xff] %v305_v48   ;;  %v321_v55 = vld [vmem:[%s8887_s8 + $0x21c] sm:$0xff]  }
  0x47   :  { %304 = vst [vmem:[#allocation2 + $0x1f8] sm:$0xf] %v303_v47  ;;  %v309_v49 = vld [vmem:[%s8887_s8 + $0x210] sm:$0xf]  ;;  %v311_v50 = vld [vmem:[%s8887_s8 + $0x204] sm:$0xf] }
  0x48   :  { %v313_v51 = vld [vmem:[%s8887_s8 + $0x214] sm:$0xf]  ;;  %310 = vst [vmem:[#allocation2 + $0x204] sm:$0xf] %v309_v49  ;;  %312 = vst [vmem:[#allocation2 + $0x208] sm:$0xf] %v311_v50 }
  0x49   :  { %314 = vst [vmem:[#allocation2 + $0x20c] sm:$0xf] %v313_v51  ;;  %v315_v52 = vld [vmem:[%s8887_s8 + $0x208] sm:$0xf]  ;;  %v317_v53 = vld [vmem:[%s8887_s8 + $0x218] sm:$0xf] }
  0x4a   :  { %v319_v54 = vld [vmem:[%s8887_s8 + $0x20c] sm:$0xf]  ;;  %316 = vst [vmem:[#allocation2 + $0x210] sm:$0xf] %v315_v52  ;;  %318 = vst [vmem:[#allocation2 + $0x214] sm:$0xf] %v317_v53 }
  0x4b   :  { %320 = vst [vmem:[#allocation2 + $0x218] sm:$0xf] %v319_v54  ;;  %v325_v56 = vld [vmem:[%s8887_s8 + $0x230] sm:$0xf]  ;;  %v327_v57 = vld [vmem:[%s8887_s8 + $0x224] sm:$0xf] }
  0x4c   :  { %322 = vst [vmem:[#allocation2 + $0x21c] sm:$0xff] %v321_v55   ;;  %326 = vst [vmem:[#allocation2 + $0x224] sm:$0xf] %v325_v56  ;;  %v329_v58 = vld [vmem:[%s8887_s8 + $0x234] sm:$0xf]  ;;  %v337_v62 = vld [vmem:[%s8887_s8 + $0x23c] sm:$0xff]  }
  0x4d   :  { %328 = vst [vmem:[#allocation2 + $0x228] sm:$0xf] %v327_v57  ;;  %v331_v59 = vld [vmem:[%s8887_s8 + $0x228] sm:$0xf]  ;;  %v333_v60 = vld [vmem:[%s8887_s8 + $0x238] sm:$0xf] }
  0x4e   :  { %330 = vst [vmem:[#allocation2 + $0x22c] sm:$0xf] %v329_v58  ;;  %332 = vst [vmem:[#allocation2 + $0x230] sm:$0xf] %v331_v59  ;;  %v335_v61 = vld [vmem:[%s8887_s8 + $0x22c] sm:$0xf] }
  0x4f   :  { %334 = vst [vmem:[#allocation2 + $0x234] sm:$0xf] %v333_v60  ;;  %v341_v63 = vld [vmem:[%s8887_s8 + $0x250] sm:$0xf]  ;;  %336 = vst [vmem:[#allocation2 + $0x238] sm:$0xf] %v335_v61 }
  0x50   :  { %338 = vst [vmem:[#allocation2 + $0x23c] sm:$0xff] %v337_v62   ;;  %342 = vst [vmem:[#allocation2 + $0x244] sm:$0xf] %v341_v63  ;;  %v343_v0 = vld [vmem:[%s8887_s8 + $0x244] sm:$0xf]  ;;  %v353_v5 = vld [vmem:[%s8887_s8 + $0x25c] sm:$0xff]  }
  0x51   :  { %v345_v1 = vld [vmem:[%s8887_s8 + $0x254] sm:$0xf]  ;;  %v347_v2 = vld [vmem:[%s8887_s8 + $0x248] sm:$0xf]  ;;  %344 = vst [vmem:[#allocation2 + $0x248] sm:$0xf] %v343_v0 }
  0x52   :  { %346 = vst [vmem:[#allocation2 + $0x24c] sm:$0xf] %v345_v1  ;;  %348 = vst [vmem:[#allocation2 + $0x250] sm:$0xf] %v347_v2  ;;  %v349_v3 = vld [vmem:[%s8887_s8 + $0x258] sm:$0xf] }
  0x53   :  { %v351_v4 = vld [vmem:[%s8887_s8 + $0x24c] sm:$0xf]  ;;  %350 = vst [vmem:[#allocation2 + $0x254] sm:$0xf] %v349_v3  ;;  %354 = vst [vmem:[#allocation2 + $0x25c] sm:$0xff] %v353_v5   ;;  %v369_v12 = vld [vmem:[%s8887_s8 + $0x27c] sm:$0xff]  }
  0x54   :  { %352 = vst [vmem:[#allocation2 + $0x258] sm:$0xf] %v351_v4  ;;  %v357_v6 = vld [vmem:[%s8887_s8 + $0x270] sm:$0xf]  ;;  %v359_v7 = vld [vmem:[%s8887_s8 + $0x264] sm:$0xf] }
  0x55   :  { %v361_v8 = vld [vmem:[%s8887_s8 + $0x274] sm:$0xf]  ;;  %358 = vst [vmem:[#allocation2 + $0x264] sm:$0xf] %v357_v6  ;;  %360 = vst [vmem:[#allocation2 + $0x268] sm:$0xf] %v359_v7 }
  0x56   :  { %362 = vst [vmem:[#allocation2 + $0x26c] sm:$0xf] %v361_v8  ;;  %v363_v9 = vld [vmem:[%s8887_s8 + $0x268] sm:$0xf]  ;;  %v365_v10 = vld [vmem:[%s8887_s8 + $0x278] sm:$0xf] }
  0x57   :  { %v367_v11 = vld [vmem:[%s8887_s8 + $0x26c] sm:$0xf]  ;;  %364 = vst [vmem:[#allocation2 + $0x270] sm:$0xf] %v363_v9  ;;  %366 = vst [vmem:[#allocation2 + $0x274] sm:$0xf] %v365_v10 }
  0x58   :  { %368 = vst [vmem:[#allocation2 + $0x278] sm:$0xf] %v367_v11  ;;  %v373_v13 = vld [vmem:[%s8887_s8 + $0x290] sm:$0xf]  ;;  %v375_v14 = vld [vmem:[%s8887_s8 + $0x284] sm:$0xf] }
  0x59   :  { %370 = vst [vmem:[#allocation2 + $0x27c] sm:$0xff] %v369_v12   ;;  %374 = vst [vmem:[#allocation2 + $0x284] sm:$0xf] %v373_v13  ;;  %v377_v15 = vld [vmem:[%s8887_s8 + $0x294] sm:$0xf]  ;;  %v385_v19 = vld [vmem:[%s8887_s8 + $0x29c] sm:$0xff]  }
  0x5a   :  { %376 = vst [vmem:[#allocation2 + $0x288] sm:$0xf] %v375_v14  ;;  %v379_v16 = vld [vmem:[%s8887_s8 + $0x288] sm:$0xf]  ;;  %v381_v17 = vld [vmem:[%s8887_s8 + $0x298] sm:$0xf] }
  0x5b   :  { %378 = vst [vmem:[#allocation2 + $0x28c] sm:$0xf] %v377_v15  ;;  %380 = vst [vmem:[#allocation2 + $0x290] sm:$0xf] %v379_v16  ;;  %v383_v18 = vld [vmem:[%s8887_s8 + $0x28c] sm:$0xf] }
  0x5c   :  { %382 = vst [vmem:[#allocation2 + $0x294] sm:$0xf] %v381_v17  ;;  %v389_v20 = vld [vmem:[%s8887_s8 + $0x2b0] sm:$0xf]  ;;  %384 = vst [vmem:[#allocation2 + $0x298] sm:$0xf] %v383_v18 }
  0x5d   :  { %386 = vst [vmem:[#allocation2 + $0x29c] sm:$0xff] %v385_v19   ;;  %390 = vst [vmem:[#allocation2 + $0x2a4] sm:$0xf] %v389_v20  ;;  %v391_v21 = vld [vmem:[%s8887_s8 + $0x2a4] sm:$0xf]  ;;  %v401_v26 = vld [vmem:[%s8887_s8 + $0x2bc] sm:$0xff]  }
  0x5e   :  { %v393_v22 = vld [vmem:[%s8887_s8 + $0x2b4] sm:$0xf]  ;;  %v395_v23 = vld [vmem:[%s8887_s8 + $0x2a8] sm:$0xf]  ;;  %392 = vst [vmem:[#allocation2 + $0x2a8] sm:$0xf] %v391_v21 }
  0x5f   :  { %394 = vst [vmem:[#allocation2 + $0x2ac] sm:$0xf] %v393_v22  ;;  %396 = vst [vmem:[#allocation2 + $0x2b0] sm:$0xf] %v395_v23  ;;  %v397_v24 = vld [vmem:[%s8887_s8 + $0x2b8] sm:$0xf] }
  0x60   :  { %v399_v25 = vld [vmem:[%s8887_s8 + $0x2ac] sm:$0xf]  ;;  %398 = vst [vmem:[#allocation2 + $0x2b4] sm:$0xf] %v397_v24  ;;  %402 = vst [vmem:[#allocation2 + $0x2bc] sm:$0xff] %v401_v26   ;;  %v417_v33 = vld [vmem:[%s8887_s8 + $0x2dc] sm:$0xff]  }
  0x61   :  { %400 = vst [vmem:[#allocation2 + $0x2b8] sm:$0xf] %v399_v25  ;;  %v405_v27 = vld [vmem:[%s8887_s8 + $0x2d0] sm:$0xf]  ;;  %v407_v28 = vld [vmem:[%s8887_s8 + $0x2c4] sm:$0xf] }
  0x62   :  { %v409_v29 = vld [vmem:[%s8887_s8 + $0x2d4] sm:$0xf]  ;;  %406 = vst [vmem:[#allocation2 + $0x2c4] sm:$0xf] %v405_v27  ;;  %408 = vst [vmem:[#allocation2 + $0x2c8] sm:$0xf] %v407_v28 }
  0x63   :  { %410 = vst [vmem:[#allocation2 + $0x2cc] sm:$0xf] %v409_v29  ;;  %v411_v30 = vld [vmem:[%s8887_s8 + $0x2c8] sm:$0xf]  ;;  %v413_v31 = vld [vmem:[%s8887_s8 + $0x2d8] sm:$0xf] }
  0x64   :  { %v415_v32 = vld [vmem:[%s8887_s8 + $0x2cc] sm:$0xf]  ;;  %412 = vst [vmem:[#allocation2 + $0x2d0] sm:$0xf] %v411_v30  ;;  %414 = vst [vmem:[#allocation2 + $0x2d4] sm:$0xf] %v413_v31 }
  0x65   :  { %416 = vst [vmem:[#allocation2 + $0x2d8] sm:$0xf] %v415_v32  ;;  %v421_v34 = vld [vmem:[%s8887_s8 + $0x2f0] sm:$0xf]  ;;  %v423_v35 = vld [vmem:[%s8887_s8 + $0x2e4] sm:$0xf] }
  0x66   :  { %418 = vst [vmem:[#allocation2 + $0x2dc] sm:$0xff] %v417_v33   ;;  %422 = vst [vmem:[#allocation2 + $0x2e4] sm:$0xf] %v421_v34  ;;  %v425_v36 = vld [vmem:[%s8887_s8 + $0x2f4] sm:$0xf]  ;;  %v433_v40 = vld [vmem:[%s8887_s8 + $0x2fc] sm:$0xff]  }
  0x67   :  { %424 = vst [vmem:[#allocation2 + $0x2e8] sm:$0xf] %v423_v35  ;;  %v427_v37 = vld [vmem:[%s8887_s8 + $0x2e8] sm:$0xf]  ;;  %v429_v38 = vld [vmem:[%s8887_s8 + $0x2f8] sm:$0xf] }
  0x68   :  { %426 = vst [vmem:[#allocation2 + $0x2ec] sm:$0xf] %v425_v36  ;;  %428 = vst [vmem:[#allocation2 + $0x2f0] sm:$0xf] %v427_v37  ;;  %v431_v39 = vld [vmem:[%s8887_s8 + $0x2ec] sm:$0xf] }
  0x69   :  { %430 = vst [vmem:[#allocation2 + $0x2f4] sm:$0xf] %v429_v38  ;;  %v437_v41 = vld [vmem:[%s8887_s8 + $0x310] sm:$0xf]  ;;  %432 = vst [vmem:[#allocation2 + $0x2f8] sm:$0xf] %v431_v39 }
  0x6a   :  { %434 = vst [vmem:[#allocation2 + $0x2fc] sm:$0xff] %v433_v40   ;;  %438 = vst [vmem:[#allocation2 + $0x304] sm:$0xf] %v437_v41  ;;  %v439_v42 = vld [vmem:[%s8887_s8 + $0x304] sm:$0xf]  ;;  %v449_v47 = vld [vmem:[%s8887_s8 + $0x31c] sm:$0xff]  }
  0x6b   :  { %v441_v43 = vld [vmem:[%s8887_s8 + $0x314] sm:$0xf]  ;;  %v443_v44 = vld [vmem:[%s8887_s8 + $0x308] sm:$0xf]  ;;  %440 = vst [vmem:[#allocation2 + $0x308] sm:$0xf] %v439_v42 }
  0x6c   :  { %442 = vst [vmem:[#allocation2 + $0x30c] sm:$0xf] %v441_v43  ;;  %444 = vst [vmem:[#allocation2 + $0x310] sm:$0xf] %v443_v44  ;;  %v445_v45 = vld [vmem:[%s8887_s8 + $0x318] sm:$0xf] }
  0x6d   :  { %v447_v46 = vld [vmem:[%s8887_s8 + $0x30c] sm:$0xf]  ;;  %446 = vst [vmem:[#allocation2 + $0x314] sm:$0xf] %v445_v45  ;;  %450 = vst [vmem:[#allocation2 + $0x31c] sm:$0xff] %v449_v47   ;;  %v465_v54 = vld [vmem:[%s8887_s8 + $0x33c] sm:$0xff]  }
  0x6e   :  { %448 = vst [vmem:[#allocation2 + $0x318] sm:$0xf] %v447_v46  ;;  %v453_v48 = vld [vmem:[%s8887_s8 + $0x330] sm:$0xf]  ;;  %v455_v49 = vld [vmem:[%s8887_s8 + $0x324] sm:$0xf] }
  0x6f   :  { %v457_v50 = vld [vmem:[%s8887_s8 + $0x334] sm:$0xf]  ;;  %454 = vst [vmem:[#allocation2 + $0x324] sm:$0xf] %v453_v48  ;;  %456 = vst [vmem:[#allocation2 + $0x328] sm:$0xf] %v455_v49 }
  0x70   :  { %458 = vst [vmem:[#allocation2 + $0x32c] sm:$0xf] %v457_v50  ;;  %v459_v51 = vld [vmem:[%s8887_s8 + $0x328] sm:$0xf]  ;;  %v461_v52 = vld [vmem:[%s8887_s8 + $0x338] sm:$0xf] }
  0x71   :  { %v463_v53 = vld [vmem:[%s8887_s8 + $0x32c] sm:$0xf]  ;;  %460 = vst [vmem:[#allocation2 + $0x330] sm:$0xf] %v459_v51  ;;  %462 = vst [vmem:[#allocation2 + $0x334] sm:$0xf] %v461_v52 }
  0x72   :  { %464 = vst [vmem:[#allocation2 + $0x338] sm:$0xf] %v463_v53  ;;  %v469_v55 = vld [vmem:[%s8887_s8 + $0x350] sm:$0xf]  ;;  %v471_v56 = vld [vmem:[%s8887_s8 + $0x344] sm:$0xf] }
  0x73   :  { %466 = vst [vmem:[#allocation2 + $0x33c] sm:$0xff] %v465_v54   ;;  %470 = vst [vmem:[#allocation2 + $0x344] sm:$0xf] %v469_v55  ;;  %v473_v57 = vld [vmem:[%s8887_s8 + $0x354] sm:$0xf]  ;;  %v481_v61 = vld [vmem:[%s8887_s8 + $0x35c] sm:$0xff]  }
  0x74   :  { %472 = vst [vmem:[#allocation2 + $0x348] sm:$0xf] %v471_v56  ;;  %v475_v58 = vld [vmem:[%s8887_s8 + $0x348] sm:$0xf]  ;;  %v477_v59 = vld [vmem:[%s8887_s8 + $0x358] sm:$0xf] }
  0x75   :  { %474 = vst [vmem:[#allocation2 + $0x34c] sm:$0xf] %v473_v57  ;;  %476 = vst [vmem:[#allocation2 + $0x350] sm:$0xf] %v475_v58  ;;  %v479_v60 = vld [vmem:[%s8887_s8 + $0x34c] sm:$0xf] }
  0x76   :  { %478 = vst [vmem:[#allocation2 + $0x354] sm:$0xf] %v477_v59  ;;  %v485_v62 = vld [vmem:[%s8887_s8 + $0x370] sm:$0xf]  ;;  %480 = vst [vmem:[#allocation2 + $0x358] sm:$0xf] %v479_v60 }
  0x77   :  { %482 = vst [vmem:[#allocation2 + $0x35c] sm:$0xff] %v481_v61   ;;  %486 = vst [vmem:[#allocation2 + $0x364] sm:$0xf] %v485_v62  ;;  %v487_v63 = vld [vmem:[%s8887_s8 + $0x364] sm:$0xf]  ;;  %v497_v4 = vld [vmem:[%s8887_s8 + $0x37c] sm:$0xff]  }
  0x78   :  { %v489_v0 = vld [vmem:[%s8887_s8 + $0x374] sm:$0xf]  ;;  %v491_v1 = vld [vmem:[%s8887_s8 + $0x368] sm:$0xf]  ;;  %488 = vst [vmem:[#allocation2 + $0x368] sm:$0xf] %v487_v63 }
  0x79   :  { %490 = vst [vmem:[#allocation2 + $0x36c] sm:$0xf] %v489_v0  ;;  %492 = vst [vmem:[#allocation2 + $0x370] sm:$0xf] %v491_v1  ;;  %v493_v2 = vld [vmem:[%s8887_s8 + $0x378] sm:$0xf] }
  0x7a   :  { %v495_v3 = vld [vmem:[%s8887_s8 + $0x36c] sm:$0xf]  ;;  %494 = vst [vmem:[#allocation2 + $0x374] sm:$0xf] %v493_v2  ;;  %498 = vst [vmem:[#allocation2 + $0x37c] sm:$0xff] %v497_v4   ;;  %v513_v11 = vld [vmem:[%s8887_s8 + $0x39c] sm:$0xff]  }
  0x7b   :  { %496 = vst [vmem:[#allocation2 + $0x378] sm:$0xf] %v495_v3  ;;  %v501_v5 = vld [vmem:[%s8887_s8 + $0x390] sm:$0xf]  ;;  %v503_v6 = vld [vmem:[%s8887_s8 + $0x384] sm:$0xf] }
  0x7c   :  { %v505_v7 = vld [vmem:[%s8887_s8 + $0x394] sm:$0xf]  ;;  %502 = vst [vmem:[#allocation2 + $0x384] sm:$0xf] %v501_v5  ;;  %504 = vst [vmem:[#allocation2 + $0x388] sm:$0xf] %v503_v6 }
  0x7d   :  { %506 = vst [vmem:[#allocation2 + $0x38c] sm:$0xf] %v505_v7  ;;  %v507_v8 = vld [vmem:[%s8887_s8 + $0x388] sm:$0xf]  ;;  %v509_v9 = vld [vmem:[%s8887_s8 + $0x398] sm:$0xf] }
  0x7e   :  { %v511_v10 = vld [vmem:[%s8887_s8 + $0x38c] sm:$0xf]  ;;  %508 = vst [vmem:[#allocation2 + $0x390] sm:$0xf] %v507_v8  ;;  %510 = vst [vmem:[#allocation2 + $0x394] sm:$0xf] %v509_v9 }
  0x7f   :  { %512 = vst [vmem:[#allocation2 + $0x398] sm:$0xf] %v511_v10  ;;  %v517_v12 = vld [vmem:[%s8887_s8 + $0x3b0] sm:$0xf]  ;;  %v519_v13 = vld [vmem:[%s8887_s8 + $0x3a4] sm:$0xf] }
  0x80   :  { %514 = vst [vmem:[#allocation2 + $0x39c] sm:$0xff] %v513_v11   ;;  %518 = vst [vmem:[#allocation2 + $0x3a4] sm:$0xf] %v517_v12  ;;  %v521_v14 = vld [vmem:[%s8887_s8 + $0x3b4] sm:$0xf]  ;;  %v529_v18 = vld [vmem:[%s8887_s8 + $0x3bc] sm:$0xff]  }
  0x81   :  { %520 = vst [vmem:[#allocation2 + $0x3a8] sm:$0xf] %v519_v13  ;;  %v523_v15 = vld [vmem:[%s8887_s8 + $0x3a8] sm:$0xf]  ;;  %v525_v16 = vld [vmem:[%s8887_s8 + $0x3b8] sm:$0xf] }
  0x82   :  { %522 = vst [vmem:[#allocation2 + $0x3ac] sm:$0xf] %v521_v14  ;;  %524 = vst [vmem:[#allocation2 + $0x3b0] sm:$0xf] %v523_v15  ;;  %v527_v17 = vld [vmem:[%s8887_s8 + $0x3ac] sm:$0xf] }
  0x83   :  { %526 = vst [vmem:[#allocation2 + $0x3b4] sm:$0xf] %v525_v16  ;;  %v533_v19 = vld [vmem:[%s8887_s8 + $0x3d0] sm:$0xf]  ;;  %528 = vst [vmem:[#allocation2 + $0x3b8] sm:$0xf] %v527_v17 }
  0x84   :  { %530 = vst [vmem:[#allocation2 + $0x3bc] sm:$0xff] %v529_v18   ;;  %534 = vst [vmem:[#allocation2 + $0x3c4] sm:$0xf] %v533_v19  ;;  %v535_v20 = vld [vmem:[%s8887_s8 + $0x3c4] sm:$0xf]  ;;  %v545_v25 = vld [vmem:[%s8887_s8 + $0x3dc] sm:$0xff]  }
  0x85   :  { %v537_v21 = vld [vmem:[%s8887_s8 + $0x3d4] sm:$0xf]  ;;  %v539_v22 = vld [vmem:[%s8887_s8 + $0x3c8] sm:$0xf]  ;;  %536 = vst [vmem:[#allocation2 + $0x3c8] sm:$0xf] %v535_v20 }
  0x86   :  { %538 = vst [vmem:[#allocation2 + $0x3cc] sm:$0xf] %v537_v21  ;;  %540 = vst [vmem:[#allocation2 + $0x3d0] sm:$0xf] %v539_v22  ;;  %v541_v23 = vld [vmem:[%s8887_s8 + $0x3d8] sm:$0xf] }
  0x87   :  { %v543_v24 = vld [vmem:[%s8887_s8 + $0x3cc] sm:$0xf]  ;;  %542 = vst [vmem:[#allocation2 + $0x3d4] sm:$0xf] %v541_v23  ;;  %546 = vst [vmem:[#allocation2 + $0x3dc] sm:$0xff] %v545_v25  }
  0x88   :  { %544 = vst [vmem:[#allocation2 + $0x3d8] sm:$0xf] %v543_v24  ;;  %v549_v26 = vld [vmem:[%s8887_s8 + $0x3f0] sm:$0xf]  ;;  %v551_v27 = vld [vmem:[%s8887_s8 + $0x3e4] sm:$0xf] }
  0x89   :  { %v553_v28 = vld [vmem:[%s8887_s8 + $0x3f4] sm:$0xf]  ;;  %550 = vst [vmem:[#allocation2 + $0x3e4] sm:$0xf] %v549_v26  ;;  %552 = vst [vmem:[#allocation2 + $0x3e8] sm:$0xf] %v551_v27 }
  0x8a   :  { %554 = vst [vmem:[#allocation2 + $0x3ec] sm:$0xf] %v553_v28  ;;  %v555_v29 = vld [vmem:[%s8887_s8 + $0x3e8] sm:$0xf]  ;;  %v557_v30 = vld [vmem:[%s8887_s8 + $0x3f8] sm:$0xf] }
  0x8b   :  { %v559_v31 = vld [vmem:[%s8887_s8 + $0x3ec] sm:$0xf]  ;;  %556 = vst [vmem:[#allocation2 + $0x3f0] sm:$0xf] %v555_v29  ;;  %558 = vst [vmem:[#allocation2 + $0x3f4] sm:$0xf] %v557_v30 }
  0x8c   :  { %560 = vst [vmem:[#allocation2 + $0x3f8] sm:$0xf] %v559_v31  ;;  %v561_v32 = vld [vmem:[%s8887_s8 + $0x3fc] sm:$0xf] }
  0x8d   :  { %562 = vst [vmem:[#allocation2 + $0x3fc] sm:$0xf] %v561_v32 }
  0x8e   :  { %1105 = vsyncadd [#allocation8], 16384  ;;  %v1124_v33 = vld [vmem:[%s8888_s9] sm:$0xf]  ;;  %v1126_v34 = vld [vmem:[%s8888_s9 + $0x10] sm:$0xf] }
  0x8f   :  { %1125 = vst [vmem:[#allocation3] sm:$0xf] %v1124_v33  ;;  %1127 = vst [vmem:[#allocation3 + $0x4] sm:$0xf] %v1126_v34  ;;  %v1128_v35 = vld [vmem:[%s8888_s9 + $0x4] sm:$0xf] }
  0x90   :  { %v1130_v36 = vld [vmem:[%s8888_s9 + $0x14] sm:$0xf]  ;;  %v1132_v37 = vld [vmem:[%s8888_s9 + $0x8] sm:$0xf]  ;;  %1129 = vst [vmem:[#allocation3 + $0x8] sm:$0xf] %v1128_v35 }
  0x91   :  { %1131 = vst [vmem:[#allocation3 + $0xc] sm:$0xf] %v1130_v36  ;;  %1133 = vst [vmem:[#allocation3 + $0x10] sm:$0xf] %v1132_v37  ;;  %v1134_v38 = vld [vmem:[%s8888_s9 + $0x18] sm:$0xf] }
  0x92   :  { %v1136_v39 = vld [vmem:[%s8888_s9 + $0xc] sm:$0xf]  ;;  %v1138_v40 = vld [vmem:[%s8888_s9 + $0x1c] sm:$0xff]   ;;  %1135 = vst [vmem:[#allocation3 + $0x14] sm:$0xf] %v1134_v38 }
  0x93   :  { %1137 = vst [vmem:[#allocation3 + $0x18] sm:$0xf] %v1136_v39  ;;  %1139 = vst [vmem:[#allocation3 + $0x1c] sm:$0xff] %v1138_v40   ;;  %v1142_v41 = vld [vmem:[%s8888_s9 + $0x30] sm:$0xf]  ;;  %v1154_v47 = vld [vmem:[%s8888_s9 + $0x3c] sm:$0xff]  }
  0x94   :  { %v1144_v42 = vld [vmem:[%s8888_s9 + $0x24] sm:$0xf]  ;;  %v1146_v43 = vld [vmem:[%s8888_s9 + $0x34] sm:$0xf]  ;;  %1143 = vst [vmem:[#allocation3 + $0x24] sm:$0xf] %v1142_v41 }
  0x95   :  { %1145 = vst [vmem:[#allocation3 + $0x28] sm:$0xf] %v1144_v42  ;;  %1147 = vst [vmem:[#allocation3 + $0x2c] sm:$0xf] %v1146_v43  ;;  %v1148_v44 = vld [vmem:[%s8888_s9 + $0x28] sm:$0xf] }
  0x96   :  { %v1150_v45 = vld [vmem:[%s8888_s9 + $0x38] sm:$0xf]  ;;  %v1152_v46 = vld [vmem:[%s8888_s9 + $0x2c] sm:$0xf]  ;;  %1149 = vst [vmem:[#allocation3 + $0x30] sm:$0xf] %v1148_v44 }
  0x97   :  { %1151 = vst [vmem:[#allocation3 + $0x34] sm:$0xf] %v1150_v45  ;;  %1153 = vst [vmem:[#allocation3 + $0x38] sm:$0xf] %v1152_v46  ;;  %v1158_v48 = vld [vmem:[%s8888_s9 + $0x50] sm:$0xf] }
  0x98   :  { %v1160_v49 = vld [vmem:[%s8888_s9 + $0x44] sm:$0xf]  ;;  %1155 = vst [vmem:[#allocation3 + $0x3c] sm:$0xff] %v1154_v47   ;;  %1159 = vst [vmem:[#allocation3 + $0x44] sm:$0xf] %v1158_v48  ;;  %v1170_v54 = vld [vmem:[%s8888_s9 + $0x5c] sm:$0xff]  }
  0x99   :  { %1161 = vst [vmem:[#allocation3 + $0x48] sm:$0xf] %v1160_v49  ;;  %v1162_v50 = vld [vmem:[%s8888_s9 + $0x54] sm:$0xf]  ;;  %v1164_v51 = vld [vmem:[%s8888_s9 + $0x48] sm:$0xf] }
  0x9a   :  { %v1166_v52 = vld [vmem:[%s8888_s9 + $0x58] sm:$0xf]  ;;  %1163 = vst [vmem:[#allocation3 + $0x4c] sm:$0xf] %v1162_v50  ;;  %1165 = vst [vmem:[#allocation3 + $0x50] sm:$0xf] %v1164_v51 }
  0x9b   :  { %1167 = vst [vmem:[#allocation3 + $0x54] sm:$0xf] %v1166_v52  ;;  %v1168_v53 = vld [vmem:[%s8888_s9 + $0x4c] sm:$0xf]  ;;  %v1174_v55 = vld [vmem:[%s8888_s9 + $0x70] sm:$0xf] }
  0x9c   :  { %1169 = vst [vmem:[#allocation3 + $0x58] sm:$0xf] %v1168_v53  ;;  %1171 = vst [vmem:[#allocation3 + $0x5c] sm:$0xff] %v1170_v54   ;;  %v1176_v56 = vld [vmem:[%s8888_s9 + $0x64] sm:$0xf]  ;;  %v1186_v61 = vld [vmem:[%s8888_s9 + $0x7c] sm:$0xff]  }
  0x9d   :  { %1175 = vst [vmem:[#allocation3 + $0x64] sm:$0xf] %v1174_v55  ;;  %v1178_v57 = vld [vmem:[%s8888_s9 + $0x74] sm:$0xf]  ;;  %v1180_v58 = vld [vmem:[%s8888_s9 + $0x68] sm:$0xf] }
  0x9e   :  { %1177 = vst [vmem:[#allocation3 + $0x68] sm:$0xf] %v1176_v56  ;;  %1179 = vst [vmem:[#allocation3 + $0x6c] sm:$0xf] %v1178_v57  ;;  %v1182_v59 = vld [vmem:[%s8888_s9 + $0x78] sm:$0xf] }
  0x9f   :  { %1181 = vst [vmem:[#allocation3 + $0x70] sm:$0xf] %v1180_v58  ;;  %v1184_v60 = vld [vmem:[%s8888_s9 + $0x6c] sm:$0xf]  ;;  %1183 = vst [vmem:[#allocation3 + $0x74] sm:$0xf] %v1182_v59 }
  0xa0   :  { %1185 = vst [vmem:[#allocation3 + $0x78] sm:$0xf] %v1184_v60  ;;  %1187 = vst [vmem:[#allocation3 + $0x7c] sm:$0xff] %v1186_v61   ;;  %v1190_v62 = vld [vmem:[%s8888_s9 + $0x90] sm:$0xf]  ;;  %v1202_v4 = vld [vmem:[%s8888_s9 + $0x9c] sm:$0xff]  }
  0xa1   :  { %v1192_v63 = vld [vmem:[%s8888_s9 + $0x84] sm:$0xf]  ;;  %v1194_v0 = vld [vmem:[%s8888_s9 + $0x94] sm:$0xf]  ;;  %1191 = vst [vmem:[#allocation3 + $0x84] sm:$0xf] %v1190_v62 }
  0xa2   :  { %1193 = vst [vmem:[#allocation3 + $0x88] sm:$0xf] %v1192_v63  ;;  %1195 = vst [vmem:[#allocation3 + $0x8c] sm:$0xf] %v1194_v0  ;;  %v1196_v1 = vld [vmem:[%s8888_s9 + $0x88] sm:$0xf] }
  0xa3   :  { %v1198_v2 = vld [vmem:[%s8888_s9 + $0x98] sm:$0xf]  ;;  %v1200_v3 = vld [vmem:[%s8888_s9 + $0x8c] sm:$0xf]  ;;  %1197 = vst [vmem:[#allocation3 + $0x90] sm:$0xf] %v1196_v1 }
  0xa4   :  { %1199 = vst [vmem:[#allocation3 + $0x94] sm:$0xf] %v1198_v2  ;;  %1201 = vst [vmem:[#allocation3 + $0x98] sm:$0xf] %v1200_v3  ;;  %v1206_v5 = vld [vmem:[%s8888_s9 + $0xb0] sm:$0xf] }
  0xa5   :  { %v1208_v6 = vld [vmem:[%s8888_s9 + $0xa4] sm:$0xf]  ;;  %1203 = vst [vmem:[#allocation3 + $0x9c] sm:$0xff] %v1202_v4   ;;  %1207 = vst [vmem:[#allocation3 + $0xa4] sm:$0xf] %v1206_v5  ;;  %v1218_v11 = vld [vmem:[%s8888_s9 + $0xbc] sm:$0xff]  }
  0xa6   :  { %1209 = vst [vmem:[#allocation3 + $0xa8] sm:$0xf] %v1208_v6  ;;  %v1210_v7 = vld [vmem:[%s8888_s9 + $0xb4] sm:$0xf]  ;;  %v1212_v8 = vld [vmem:[%s8888_s9 + $0xa8] sm:$0xf] }
  0xa7   :  { %v1214_v9 = vld [vmem:[%s8888_s9 + $0xb8] sm:$0xf]  ;;  %1211 = vst [vmem:[#allocation3 + $0xac] sm:$0xf] %v1210_v7  ;;  %1213 = vst [vmem:[#allocation3 + $0xb0] sm:$0xf] %v1212_v8 }
  0xa8   :  { %1215 = vst [vmem:[#allocation3 + $0xb4] sm:$0xf] %v1214_v9  ;;  %v1216_v10 = vld [vmem:[%s8888_s9 + $0xac] sm:$0xf]  ;;  %v1222_v12 = vld [vmem:[%s8888_s9 + $0xd0] sm:$0xf] }
  0xa9   :  { %1217 = vst [vmem:[#allocation3 + $0xb8] sm:$0xf] %v1216_v10  ;;  %1219 = vst [vmem:[#allocation3 + $0xbc] sm:$0xff] %v1218_v11   ;;  %v1224_v13 = vld [vmem:[%s8888_s9 + $0xc4] sm:$0xf]  ;;  %v1234_v18 = vld [vmem:[%s8888_s9 + $0xdc] sm:$0xff]  }
  0xaa   :  { %1223 = vst [vmem:[#allocation3 + $0xc4] sm:$0xf] %v1222_v12  ;;  %v1226_v14 = vld [vmem:[%s8888_s9 + $0xd4] sm:$0xf]  ;;  %v1228_v15 = vld [vmem:[%s8888_s9 + $0xc8] sm:$0xf] }
  0xab   :  { %1225 = vst [vmem:[#allocation3 + $0xc8] sm:$0xf] %v1224_v13  ;;  %1227 = vst [vmem:[#allocation3 + $0xcc] sm:$0xf] %v1226_v14  ;;  %v1230_v16 = vld [vmem:[%s8888_s9 + $0xd8] sm:$0xf] }
  0xac   :  { %1229 = vst [vmem:[#allocation3 + $0xd0] sm:$0xf] %v1228_v15  ;;  %v1232_v17 = vld [vmem:[%s8888_s9 + $0xcc] sm:$0xf]  ;;  %1231 = vst [vmem:[#allocation3 + $0xd4] sm:$0xf] %v1230_v16 }
  0xad   :  { %1233 = vst [vmem:[#allocation3 + $0xd8] sm:$0xf] %v1232_v17  ;;  %1235 = vst [vmem:[#allocation3 + $0xdc] sm:$0xff] %v1234_v18   ;;  %v1238_v19 = vld [vmem:[%s8888_s9 + $0xf0] sm:$0xf]  ;;  %v1250_v25 = vld [vmem:[%s8888_s9 + $0xfc] sm:$0xff]  }
  0xae   :  { %v1240_v20 = vld [vmem:[%s8888_s9 + $0xe4] sm:$0xf]  ;;  %v1242_v21 = vld [vmem:[%s8888_s9 + $0xf4] sm:$0xf]  ;;  %1239 = vst [vmem:[#allocation3 + $0xe4] sm:$0xf] %v1238_v19 }
  0xaf   :  { %1241 = vst [vmem:[#allocation3 + $0xe8] sm:$0xf] %v1240_v20  ;;  %1243 = vst [vmem:[#allocation3 + $0xec] sm:$0xf] %v1242_v21  ;;  %v1244_v22 = vld [vmem:[%s8888_s9 + $0xe8] sm:$0xf] }
  0xb0   :  { %v1246_v23 = vld [vmem:[%s8888_s9 + $0xf8] sm:$0xf]  ;;  %v1248_v24 = vld [vmem:[%s8888_s9 + $0xec] sm:$0xf]  ;;  %1245 = vst [vmem:[#allocation3 + $0xf0] sm:$0xf] %v1244_v22 }
  0xb1   :  { %1247 = vst [vmem:[#allocation3 + $0xf4] sm:$0xf] %v1246_v23  ;;  %1249 = vst [vmem:[#allocation3 + $0xf8] sm:$0xf] %v1248_v24  ;;  %v1254_v26 = vld [vmem:[%s8888_s9 + $0x110] sm:$0xf] }
  0xb2   :  { %v1256_v27 = vld [vmem:[%s8888_s9 + $0x104] sm:$0xf]  ;;  %1251 = vst [vmem:[#allocation3 + $0xfc] sm:$0xff] %v1250_v25   ;;  %1255 = vst [vmem:[#allocation3 + $0x104] sm:$0xf] %v1254_v26  ;;  %v1266_v32 = vld [vmem:[%s8888_s9 + $0x11c] sm:$0xff]  }
  0xb3   :  { %1257 = vst [vmem:[#allocation3 + $0x108] sm:$0xf] %v1256_v27  ;;  %v1258_v28 = vld [vmem:[%s8888_s9 + $0x114] sm:$0xf]  ;;  %v1260_v29 = vld [vmem:[%s8888_s9 + $0x108] sm:$0xf] }
  0xb4   :  { %v1262_v30 = vld [vmem:[%s8888_s9 + $0x118] sm:$0xf]  ;;  %1259 = vst [vmem:[#allocation3 + $0x10c] sm:$0xf] %v1258_v28  ;;  %1261 = vst [vmem:[#allocation3 + $0x110] sm:$0xf] %v1260_v29 }
  0xb5   :  { %1263 = vst [vmem:[#allocation3 + $0x114] sm:$0xf] %v1262_v30  ;;  %v1264_v31 = vld [vmem:[%s8888_s9 + $0x10c] sm:$0xf]  ;;  %v1270_v33 = vld [vmem:[%s8888_s9 + $0x130] sm:$0xf] }
  0xb6   :  { %1265 = vst [vmem:[#allocation3 + $0x118] sm:$0xf] %v1264_v31  ;;  %1267 = vst [vmem:[#allocation3 + $0x11c] sm:$0xff] %v1266_v32   ;;  %v1272_v34 = vld [vmem:[%s8888_s9 + $0x124] sm:$0xf]  ;;  %v1282_v39 = vld [vmem:[%s8888_s9 + $0x13c] sm:$0xff]  }
  0xb7   :  { %1271 = vst [vmem:[#allocation3 + $0x124] sm:$0xf] %v1270_v33  ;;  %v1274_v35 = vld [vmem:[%s8888_s9 + $0x134] sm:$0xf]  ;;  %v1276_v36 = vld [vmem:[%s8888_s9 + $0x128] sm:$0xf] }
  0xb8   :  { %1273 = vst [vmem:[#allocation3 + $0x128] sm:$0xf] %v1272_v34  ;;  %1275 = vst [vmem:[#allocation3 + $0x12c] sm:$0xf] %v1274_v35  ;;  %v1278_v37 = vld [vmem:[%s8888_s9 + $0x138] sm:$0xf] }
  0xb9   :  { %1277 = vst [vmem:[#allocation3 + $0x130] sm:$0xf] %v1276_v36  ;;  %v1280_v38 = vld [vmem:[%s8888_s9 + $0x12c] sm:$0xf]  ;;  %1279 = vst [vmem:[#allocation3 + $0x134] sm:$0xf] %v1278_v37 }
  0xba   :  { %1281 = vst [vmem:[#allocation3 + $0x138] sm:$0xf] %v1280_v38  ;;  %1283 = vst [vmem:[#allocation3 + $0x13c] sm:$0xff] %v1282_v39   ;;  %v1286_v40 = vld [vmem:[%s8888_s9 + $0x150] sm:$0xf]  ;;  %v1298_v46 = vld [vmem:[%s8888_s9 + $0x15c] sm:$0xff]  }
  0xbb   :  { %v1288_v41 = vld [vmem:[%s8888_s9 + $0x144] sm:$0xf]  ;;  %v1290_v42 = vld [vmem:[%s8888_s9 + $0x154] sm:$0xf]  ;;  %1287 = vst [vmem:[#allocation3 + $0x144] sm:$0xf] %v1286_v40 }
  0xbc   :  { %1289 = vst [vmem:[#allocation3 + $0x148] sm:$0xf] %v1288_v41  ;;  %1291 = vst [vmem:[#allocation3 + $0x14c] sm:$0xf] %v1290_v42  ;;  %v1292_v43 = vld [vmem:[%s8888_s9 + $0x148] sm:$0xf] }
  0xbd   :  { %v1294_v44 = vld [vmem:[%s8888_s9 + $0x158] sm:$0xf]  ;;  %v1296_v45 = vld [vmem:[%s8888_s9 + $0x14c] sm:$0xf]  ;;  %1293 = vst [vmem:[#allocation3 + $0x150] sm:$0xf] %v1292_v43 }
  0xbe   :  { %1295 = vst [vmem:[#allocation3 + $0x154] sm:$0xf] %v1294_v44  ;;  %1297 = vst [vmem:[#allocation3 + $0x158] sm:$0xf] %v1296_v45  ;;  %v1302_v47 = vld [vmem:[%s8888_s9 + $0x170] sm:$0xf] }
  0xbf   :  { %v1304_v48 = vld [vmem:[%s8888_s9 + $0x164] sm:$0xf]  ;;  %1299 = vst [vmem:[#allocation3 + $0x15c] sm:$0xff] %v1298_v46   ;;  %1303 = vst [vmem:[#allocation3 + $0x164] sm:$0xf] %v1302_v47  ;;  %v1314_v53 = vld [vmem:[%s8888_s9 + $0x17c] sm:$0xff]  }
  0xc0   :  { %1305 = vst [vmem:[#allocation3 + $0x168] sm:$0xf] %v1304_v48  ;;  %v1306_v49 = vld [vmem:[%s8888_s9 + $0x174] sm:$0xf]  ;;  %v1308_v50 = vld [vmem:[%s8888_s9 + $0x168] sm:$0xf] }
  0xc1   :  { %v1310_v51 = vld [vmem:[%s8888_s9 + $0x178] sm:$0xf]  ;;  %1307 = vst [vmem:[#allocation3 + $0x16c] sm:$0xf] %v1306_v49  ;;  %1309 = vst [vmem:[#allocation3 + $0x170] sm:$0xf] %v1308_v50 }
  0xc2   :  { %1311 = vst [vmem:[#allocation3 + $0x174] sm:$0xf] %v1310_v51  ;;  %v1312_v52 = vld [vmem:[%s8888_s9 + $0x16c] sm:$0xf]  ;;  %v1318_v54 = vld [vmem:[%s8888_s9 + $0x190] sm:$0xf] }
  0xc3   :  { %1313 = vst [vmem:[#allocation3 + $0x178] sm:$0xf] %v1312_v52  ;;  %1315 = vst [vmem:[#allocation3 + $0x17c] sm:$0xff] %v1314_v53   ;;  %v1320_v55 = vld [vmem:[%s8888_s9 + $0x184] sm:$0xf]  ;;  %v1330_v60 = vld [vmem:[%s8888_s9 + $0x19c] sm:$0xff]  }
  0xc4   :  { %1319 = vst [vmem:[#allocation3 + $0x184] sm:$0xf] %v1318_v54  ;;  %v1322_v56 = vld [vmem:[%s8888_s9 + $0x194] sm:$0xf]  ;;  %v1324_v57 = vld [vmem:[%s8888_s9 + $0x188] sm:$0xf] }
  0xc5   :  { %1321 = vst [vmem:[#allocation3 + $0x188] sm:$0xf] %v1320_v55  ;;  %1323 = vst [vmem:[#allocation3 + $0x18c] sm:$0xf] %v1322_v56  ;;  %v1326_v58 = vld [vmem:[%s8888_s9 + $0x198] sm:$0xf] }
  0xc6   :  { %1325 = vst [vmem:[#allocation3 + $0x190] sm:$0xf] %v1324_v57  ;;  %v1328_v59 = vld [vmem:[%s8888_s9 + $0x18c] sm:$0xf]  ;;  %1327 = vst [vmem:[#allocation3 + $0x194] sm:$0xf] %v1326_v58 }
  0xc7   :  { %1329 = vst [vmem:[#allocation3 + $0x198] sm:$0xf] %v1328_v59  ;;  %1331 = vst [vmem:[#allocation3 + $0x19c] sm:$0xff] %v1330_v60   ;;  %v1334_v61 = vld [vmem:[%s8888_s9 + $0x1b0] sm:$0xf]  ;;  %v1346_v3 = vld [vmem:[%s8888_s9 + $0x1bc] sm:$0xff]  }
  0xc8   :  { %v1336_v62 = vld [vmem:[%s8888_s9 + $0x1a4] sm:$0xf]  ;;  %v1338_v63 = vld [vmem:[%s8888_s9 + $0x1b4] sm:$0xf]  ;;  %1335 = vst [vmem:[#allocation3 + $0x1a4] sm:$0xf] %v1334_v61 }
  0xc9   :  { %1337 = vst [vmem:[#allocation3 + $0x1a8] sm:$0xf] %v1336_v62  ;;  %1339 = vst [vmem:[#allocation3 + $0x1ac] sm:$0xf] %v1338_v63  ;;  %v1340_v0 = vld [vmem:[%s8888_s9 + $0x1a8] sm:$0xf] }
  0xca   :  { %v1342_v1 = vld [vmem:[%s8888_s9 + $0x1b8] sm:$0xf]  ;;  %v1344_v2 = vld [vmem:[%s8888_s9 + $0x1ac] sm:$0xf]  ;;  %1341 = vst [vmem:[#allocation3 + $0x1b0] sm:$0xf] %v1340_v0 }
  0xcb   :  { %1343 = vst [vmem:[#allocation3 + $0x1b4] sm:$0xf] %v1342_v1  ;;  %1345 = vst [vmem:[#allocation3 + $0x1b8] sm:$0xf] %v1344_v2  ;;  %v1350_v4 = vld [vmem:[%s8888_s9 + $0x1d0] sm:$0xf] }
  0xcc   :  { %v1352_v5 = vld [vmem:[%s8888_s9 + $0x1c4] sm:$0xf]  ;;  %1347 = vst [vmem:[#allocation3 + $0x1bc] sm:$0xff] %v1346_v3   ;;  %1351 = vst [vmem:[#allocation3 + $0x1c4] sm:$0xf] %v1350_v4  ;;  %v1362_v10 = vld [vmem:[%s8888_s9 + $0x1dc] sm:$0xff]  }
  0xcd   :  { %1353 = vst [vmem:[#allocation3 + $0x1c8] sm:$0xf] %v1352_v5  ;;  %v1354_v6 = vld [vmem:[%s8888_s9 + $0x1d4] sm:$0xf]  ;;  %v1356_v7 = vld [vmem:[%s8888_s9 + $0x1c8] sm:$0xf] }
  0xce   :  { %v1358_v8 = vld [vmem:[%s8888_s9 + $0x1d8] sm:$0xf]  ;;  %1355 = vst [vmem:[#allocation3 + $0x1cc] sm:$0xf] %v1354_v6  ;;  %1357 = vst [vmem:[#allocation3 + $0x1d0] sm:$0xf] %v1356_v7 }
  0xcf   :  { %1359 = vst [vmem:[#allocation3 + $0x1d4] sm:$0xf] %v1358_v8  ;;  %v1360_v9 = vld [vmem:[%s8888_s9 + $0x1cc] sm:$0xf]  ;;  %v1366_v11 = vld [vmem:[%s8888_s9 + $0x1f0] sm:$0xf] }
  0xd0   :  { %1361 = vst [vmem:[#allocation3 + $0x1d8] sm:$0xf] %v1360_v9  ;;  %1363 = vst [vmem:[#allocation3 + $0x1dc] sm:$0xff] %v1362_v10   ;;  %v1368_v12 = vld [vmem:[%s8888_s9 + $0x1e4] sm:$0xf]  ;;  %v1378_v17 = vld [vmem:[%s8888_s9 + $0x1fc] sm:$0xff]  }
  0xd1   :  { %1367 = vst [vmem:[#allocation3 + $0x1e4] sm:$0xf] %v1366_v11  ;;  %v1370_v13 = vld [vmem:[%s8888_s9 + $0x1f4] sm:$0xf]  ;;  %v1372_v14 = vld [vmem:[%s8888_s9 + $0x1e8] sm:$0xf] }
  0xd2   :  { %1369 = vst [vmem:[#allocation3 + $0x1e8] sm:$0xf] %v1368_v12  ;;  %1371 = vst [vmem:[#allocation3 + $0x1ec] sm:$0xf] %v1370_v13  ;;  %v1374_v15 = vld [vmem:[%s8888_s9 + $0x1f8] sm:$0xf] }
  0xd3   :  { %1373 = vst [vmem:[#allocation3 + $0x1f0] sm:$0xf] %v1372_v14  ;;  %v1376_v16 = vld [vmem:[%s8888_s9 + $0x1ec] sm:$0xf]  ;;  %1375 = vst [vmem:[#allocation3 + $0x1f4] sm:$0xf] %v1374_v15 }
  0xd4   :  { %1377 = vst [vmem:[#allocation3 + $0x1f8] sm:$0xf] %v1376_v16  ;;  %1379 = vst [vmem:[#allocation3 + $0x1fc] sm:$0xff] %v1378_v17   ;;  %v1382_v18 = vld [vmem:[%s8888_s9 + $0x210] sm:$0xf]  ;;  %v1394_v24 = vld [vmem:[%s8888_s9 + $0x21c] sm:$0xff]  }
  0xd5   :  { %v1384_v19 = vld [vmem:[%s8888_s9 + $0x204] sm:$0xf]  ;;  %v1386_v20 = vld [vmem:[%s8888_s9 + $0x214] sm:$0xf]  ;;  %1383 = vst [vmem:[#allocation3 + $0x204] sm:$0xf] %v1382_v18 }
  0xd6   :  { %1385 = vst [vmem:[#allocation3 + $0x208] sm:$0xf] %v1384_v19  ;;  %1387 = vst [vmem:[#allocation3 + $0x20c] sm:$0xf] %v1386_v20  ;;  %v1388_v21 = vld [vmem:[%s8888_s9 + $0x208] sm:$0xf] }
  0xd7   :  { %v1390_v22 = vld [vmem:[%s8888_s9 + $0x218] sm:$0xf]  ;;  %v1392_v23 = vld [vmem:[%s8888_s9 + $0x20c] sm:$0xf]  ;;  %1389 = vst [vmem:[#allocation3 + $0x210] sm:$0xf] %v1388_v21 }
  0xd8   :  { %1391 = vst [vmem:[#allocation3 + $0x214] sm:$0xf] %v1390_v22  ;;  %1393 = vst [vmem:[#allocation3 + $0x218] sm:$0xf] %v1392_v23  ;;  %v1398_v25 = vld [vmem:[%s8888_s9 + $0x230] sm:$0xf] }
  0xd9   :  { %v1400_v26 = vld [vmem:[%s8888_s9 + $0x224] sm:$0xf]  ;;  %1395 = vst [vmem:[#allocation3 + $0x21c] sm:$0xff] %v1394_v24   ;;  %1399 = vst [vmem:[#allocation3 + $0x224] sm:$0xf] %v1398_v25  ;;  %v1410_v31 = vld [vmem:[%s8888_s9 + $0x23c] sm:$0xff]  }
  0xda   :  { %1401 = vst [vmem:[#allocation3 + $0x228] sm:$0xf] %v1400_v26  ;;  %v1402_v27 = vld [vmem:[%s8888_s9 + $0x234] sm:$0xf]  ;;  %v1404_v28 = vld [vmem:[%s8888_s9 + $0x228] sm:$0xf] }
  0xdb   :  { %v1406_v29 = vld [vmem:[%s8888_s9 + $0x238] sm:$0xf]  ;;  %1403 = vst [vmem:[#allocation3 + $0x22c] sm:$0xf] %v1402_v27  ;;  %1405 = vst [vmem:[#allocation3 + $0x230] sm:$0xf] %v1404_v28 }
  0xdc   :  { %1407 = vst [vmem:[#allocation3 + $0x234] sm:$0xf] %v1406_v29  ;;  %v1408_v30 = vld [vmem:[%s8888_s9 + $0x22c] sm:$0xf]  ;;  %v1414_v32 = vld [vmem:[%s8888_s9 + $0x250] sm:$0xf] }
  0xdd   :  { %1409 = vst [vmem:[#allocation3 + $0x238] sm:$0xf] %v1408_v30  ;;  %1411 = vst [vmem:[#allocation3 + $0x23c] sm:$0xff] %v1410_v31   ;;  %v1416_v33 = vld [vmem:[%s8888_s9 + $0x244] sm:$0xf]  ;;  %v1426_v38 = vld [vmem:[%s8888_s9 + $0x25c] sm:$0xff]  }
  0xde   :  { %1415 = vst [vmem:[#allocation3 + $0x244] sm:$0xf] %v1414_v32  ;;  %v1418_v34 = vld [vmem:[%s8888_s9 + $0x254] sm:$0xf]  ;;  %v1420_v35 = vld [vmem:[%s8888_s9 + $0x248] sm:$0xf] }
  0xdf   :  { %1417 = vst [vmem:[#allocation3 + $0x248] sm:$0xf] %v1416_v33  ;;  %1419 = vst [vmem:[#allocation3 + $0x24c] sm:$0xf] %v1418_v34  ;;  %v1422_v36 = vld [vmem:[%s8888_s9 + $0x258] sm:$0xf] }
  0xe0   :  { %1421 = vst [vmem:[#allocation3 + $0x250] sm:$0xf] %v1420_v35  ;;  %v1424_v37 = vld [vmem:[%s8888_s9 + $0x24c] sm:$0xf]  ;;  %1423 = vst [vmem:[#allocation3 + $0x254] sm:$0xf] %v1422_v36 }
  0xe1   :  { %1425 = vst [vmem:[#allocation3 + $0x258] sm:$0xf] %v1424_v37  ;;  %1427 = vst [vmem:[#allocation3 + $0x25c] sm:$0xff] %v1426_v38   ;;  %v1430_v39 = vld [vmem:[%s8888_s9 + $0x270] sm:$0xf]  ;;  %v1442_v45 = vld [vmem:[%s8888_s9 + $0x27c] sm:$0xff]  }
  0xe2   :  { %v1432_v40 = vld [vmem:[%s8888_s9 + $0x264] sm:$0xf]  ;;  %v1434_v41 = vld [vmem:[%s8888_s9 + $0x274] sm:$0xf]  ;;  %1431 = vst [vmem:[#allocation3 + $0x264] sm:$0xf] %v1430_v39 }
  0xe3   :  { %1433 = vst [vmem:[#allocation3 + $0x268] sm:$0xf] %v1432_v40  ;;  %1435 = vst [vmem:[#allocation3 + $0x26c] sm:$0xf] %v1434_v41  ;;  %v1436_v42 = vld [vmem:[%s8888_s9 + $0x268] sm:$0xf] }
  0xe4   :  { %v1438_v43 = vld [vmem:[%s8888_s9 + $0x278] sm:$0xf]  ;;  %v1440_v44 = vld [vmem:[%s8888_s9 + $0x26c] sm:$0xf]  ;;  %1437 = vst [vmem:[#allocation3 + $0x270] sm:$0xf] %v1436_v42 }
  0xe5   :  { %1439 = vst [vmem:[#allocation3 + $0x274] sm:$0xf] %v1438_v43  ;;  %1441 = vst [vmem:[#allocation3 + $0x278] sm:$0xf] %v1440_v44  ;;  %v1446_v46 = vld [vmem:[%s8888_s9 + $0x290] sm:$0xf] }
  0xe6   :  { %v1448_v47 = vld [vmem:[%s8888_s9 + $0x284] sm:$0xf]  ;;  %1443 = vst [vmem:[#allocation3 + $0x27c] sm:$0xff] %v1442_v45   ;;  %1447 = vst [vmem:[#allocation3 + $0x284] sm:$0xf] %v1446_v46  ;;  %v1458_v52 = vld [vmem:[%s8888_s9 + $0x29c] sm:$0xff]  }
  0xe7   :  { %1449 = vst [vmem:[#allocation3 + $0x288] sm:$0xf] %v1448_v47  ;;  %v1450_v48 = vld [vmem:[%s8888_s9 + $0x294] sm:$0xf]  ;;  %v1452_v49 = vld [vmem:[%s8888_s9 + $0x288] sm:$0xf] }
  0xe8   :  { %v1454_v50 = vld [vmem:[%s8888_s9 + $0x298] sm:$0xf]  ;;  %1451 = vst [vmem:[#allocation3 + $0x28c] sm:$0xf] %v1450_v48  ;;  %1453 = vst [vmem:[#allocation3 + $0x290] sm:$0xf] %v1452_v49 }
  0xe9   :  { %1455 = vst [vmem:[#allocation3 + $0x294] sm:$0xf] %v1454_v50  ;;  %v1456_v51 = vld [vmem:[%s8888_s9 + $0x28c] sm:$0xf]  ;;  %v1462_v53 = vld [vmem:[%s8888_s9 + $0x2b0] sm:$0xf] }
  0xea   :  { %1457 = vst [vmem:[#allocation3 + $0x298] sm:$0xf] %v1456_v51  ;;  %1459 = vst [vmem:[#allocation3 + $0x29c] sm:$0xff] %v1458_v52   ;;  %v1464_v54 = vld [vmem:[%s8888_s9 + $0x2a4] sm:$0xf]  ;;  %v1474_v59 = vld [vmem:[%s8888_s9 + $0x2bc] sm:$0xff]  }
  0xeb   :  { %1463 = vst [vmem:[#allocation3 + $0x2a4] sm:$0xf] %v1462_v53  ;;  %v1466_v55 = vld [vmem:[%s8888_s9 + $0x2b4] sm:$0xf]  ;;  %v1468_v56 = vld [vmem:[%s8888_s9 + $0x2a8] sm:$0xf] }
  0xec   :  { %1465 = vst [vmem:[#allocation3 + $0x2a8] sm:$0xf] %v1464_v54  ;;  %1467 = vst [vmem:[#allocation3 + $0x2ac] sm:$0xf] %v1466_v55  ;;  %v1470_v57 = vld [vmem:[%s8888_s9 + $0x2b8] sm:$0xf] }
  0xed   :  { %1469 = vst [vmem:[#allocation3 + $0x2b0] sm:$0xf] %v1468_v56  ;;  %v1472_v58 = vld [vmem:[%s8888_s9 + $0x2ac] sm:$0xf]  ;;  %1471 = vst [vmem:[#allocation3 + $0x2b4] sm:$0xf] %v1470_v57 }
  0xee   :  { %1473 = vst [vmem:[#allocation3 + $0x2b8] sm:$0xf] %v1472_v58  ;;  %1475 = vst [vmem:[#allocation3 + $0x2bc] sm:$0xff] %v1474_v59   ;;  %v1478_v60 = vld [vmem:[%s8888_s9 + $0x2d0] sm:$0xf]  ;;  %v1490_v2 = vld [vmem:[%s8888_s9 + $0x2dc] sm:$0xff]  }
  0xef   :  { %v1480_v61 = vld [vmem:[%s8888_s9 + $0x2c4] sm:$0xf]  ;;  %v1482_v62 = vld [vmem:[%s8888_s9 + $0x2d4] sm:$0xf]  ;;  %1479 = vst [vmem:[#allocation3 + $0x2c4] sm:$0xf] %v1478_v60 }
  0xf0   :  { %1481 = vst [vmem:[#allocation3 + $0x2c8] sm:$0xf] %v1480_v61  ;;  %1483 = vst [vmem:[#allocation3 + $0x2cc] sm:$0xf] %v1482_v62  ;;  %v1484_v63 = vld [vmem:[%s8888_s9 + $0x2c8] sm:$0xf] }
  0xf1   :  { %v1486_v0 = vld [vmem:[%s8888_s9 + $0x2d8] sm:$0xf]  ;;  %v1488_v1 = vld [vmem:[%s8888_s9 + $0x2cc] sm:$0xf]  ;;  %1485 = vst [vmem:[#allocation3 + $0x2d0] sm:$0xf] %v1484_v63 }
  0xf2   :  { %1487 = vst [vmem:[#allocation3 + $0x2d4] sm:$0xf] %v1486_v0  ;;  %1489 = vst [vmem:[#allocation3 + $0x2d8] sm:$0xf] %v1488_v1  ;;  %v1494_v3 = vld [vmem:[%s8888_s9 + $0x2f0] sm:$0xf] }
  0xf3   :  { %v1496_v4 = vld [vmem:[%s8888_s9 + $0x2e4] sm:$0xf]  ;;  %1491 = vst [vmem:[#allocation3 + $0x2dc] sm:$0xff] %v1490_v2   ;;  %1495 = vst [vmem:[#allocation3 + $0x2e4] sm:$0xf] %v1494_v3  ;;  %v1506_v9 = vld [vmem:[%s8888_s9 + $0x2fc] sm:$0xff]  }
  0xf4   :  { %1497 = vst [vmem:[#allocation3 + $0x2e8] sm:$0xf] %v1496_v4  ;;  %v1498_v5 = vld [vmem:[%s8888_s9 + $0x2f4] sm:$0xf]  ;;  %v1500_v6 = vld [vmem:[%s8888_s9 + $0x2e8] sm:$0xf] }
  0xf5   :  { %v1502_v7 = vld [vmem:[%s8888_s9 + $0x2f8] sm:$0xf]  ;;  %1499 = vst [vmem:[#allocation3 + $0x2ec] sm:$0xf] %v1498_v5  ;;  %1501 = vst [vmem:[#allocation3 + $0x2f0] sm:$0xf] %v1500_v6 }
  0xf6   :  { %1503 = vst [vmem:[#allocation3 + $0x2f4] sm:$0xf] %v1502_v7  ;;  %v1504_v8 = vld [vmem:[%s8888_s9 + $0x2ec] sm:$0xf]  ;;  %v1510_v10 = vld [vmem:[%s8888_s9 + $0x310] sm:$0xf] }
  0xf7   :  { %1505 = vst [vmem:[#allocation3 + $0x2f8] sm:$0xf] %v1504_v8  ;;  %1507 = vst [vmem:[#allocation3 + $0x2fc] sm:$0xff] %v1506_v9   ;;  %v1512_v11 = vld [vmem:[%s8888_s9 + $0x304] sm:$0xf]  ;;  %v1522_v16 = vld [vmem:[%s8888_s9 + $0x31c] sm:$0xff]  }
  0xf8   :  { %1511 = vst [vmem:[#allocation3 + $0x304] sm:$0xf] %v1510_v10  ;;  %v1514_v12 = vld [vmem:[%s8888_s9 + $0x314] sm:$0xf]  ;;  %v1516_v13 = vld [vmem:[%s8888_s9 + $0x308] sm:$0xf] }
  0xf9   :  { %1513 = vst [vmem:[#allocation3 + $0x308] sm:$0xf] %v1512_v11  ;;  %1515 = vst [vmem:[#allocation3 + $0x30c] sm:$0xf] %v1514_v12  ;;  %v1518_v14 = vld [vmem:[%s8888_s9 + $0x318] sm:$0xf] }
  0xfa   :  { %1517 = vst [vmem:[#allocation3 + $0x310] sm:$0xf] %v1516_v13  ;;  %v1520_v15 = vld [vmem:[%s8888_s9 + $0x30c] sm:$0xf]  ;;  %1519 = vst [vmem:[#allocation3 + $0x314] sm:$0xf] %v1518_v14 }
  0xfb   :  { %1521 = vst [vmem:[#allocation3 + $0x318] sm:$0xf] %v1520_v15  ;;  %1523 = vst [vmem:[#allocation3 + $0x31c] sm:$0xff] %v1522_v16   ;;  %v1526_v17 = vld [vmem:[%s8888_s9 + $0x330] sm:$0xf]  ;;  %v1538_v23 = vld [vmem:[%s8888_s9 + $0x33c] sm:$0xff]  }
  0xfc   :  { %v1528_v18 = vld [vmem:[%s8888_s9 + $0x324] sm:$0xf]  ;;  %v1530_v19 = vld [vmem:[%s8888_s9 + $0x334] sm:$0xf]  ;;  %1527 = vst [vmem:[#allocation3 + $0x324] sm:$0xf] %v1526_v17 }
  0xfd   :  { %1529 = vst [vmem:[#allocation3 + $0x328] sm:$0xf] %v1528_v18  ;;  %1531 = vst [vmem:[#allocation3 + $0x32c] sm:$0xf] %v1530_v19  ;;  %v1532_v20 = vld [vmem:[%s8888_s9 + $0x328] sm:$0xf] }
  0xfe   :  { %v1534_v21 = vld [vmem:[%s8888_s9 + $0x338] sm:$0xf]  ;;  %v1536_v22 = vld [vmem:[%s8888_s9 + $0x32c] sm:$0xf]  ;;  %1533 = vst [vmem:[#allocation3 + $0x330] sm:$0xf] %v1532_v20 }
  0xff   :  { %1535 = vst [vmem:[#allocation3 + $0x334] sm:$0xf] %v1534_v21  ;;  %1537 = vst [vmem:[#allocation3 + $0x338] sm:$0xf] %v1536_v22  ;;  %v1542_v24 = vld [vmem:[%s8888_s9 + $0x350] sm:$0xf] }
 0x100   :  { %v1544_v25 = vld [vmem:[%s8888_s9 + $0x344] sm:$0xf]  ;;  %1539 = vst [vmem:[#allocation3 + $0x33c] sm:$0xff] %v1538_v23   ;;  %1543 = vst [vmem:[#allocation3 + $0x344] sm:$0xf] %v1542_v24  ;;  %v1554_v30 = vld [vmem:[%s8888_s9 + $0x35c] sm:$0xff]  }
 0x101   :  { %1545 = vst [vmem:[#allocation3 + $0x348] sm:$0xf] %v1544_v25  ;;  %v1546_v26 = vld [vmem:[%s8888_s9 + $0x354] sm:$0xf]  ;;  %v1548_v27 = vld [vmem:[%s8888_s9 + $0x348] sm:$0xf] }
 0x102   :  { %v1550_v28 = vld [vmem:[%s8888_s9 + $0x358] sm:$0xf]  ;;  %1547 = vst [vmem:[#allocation3 + $0x34c] sm:$0xf] %v1546_v26  ;;  %1549 = vst [vmem:[#allocation3 + $0x350] sm:$0xf] %v1548_v27 }
 0x103   :  { %1551 = vst [vmem:[#allocation3 + $0x354] sm:$0xf] %v1550_v28  ;;  %v1552_v29 = vld [vmem:[%s8888_s9 + $0x34c] sm:$0xf]  ;;  %v1558_v31 = vld [vmem:[%s8888_s9 + $0x370] sm:$0xf] }
 0x104   :  { %1553 = vst [vmem:[#allocation3 + $0x358] sm:$0xf] %v1552_v29  ;;  %1555 = vst [vmem:[#allocation3 + $0x35c] sm:$0xff] %v1554_v30   ;;  %v1560_v32 = vld [vmem:[%s8888_s9 + $0x364] sm:$0xf]  ;;  %v1570_v37 = vld [vmem:[%s8888_s9 + $0x37c] sm:$0xff]  }
 0x105   :  { %1559 = vst [vmem:[#allocation3 + $0x364] sm:$0xf] %v1558_v31  ;;  %v1562_v33 = vld [vmem:[%s8888_s9 + $0x374] sm:$0xf]  ;;  %v1564_v34 = vld [vmem:[%s8888_s9 + $0x368] sm:$0xf] }
 0x106   :  { %1561 = vst [vmem:[#allocation3 + $0x368] sm:$0xf] %v1560_v32  ;;  %1563 = vst [vmem:[#allocation3 + $0x36c] sm:$0xf] %v1562_v33  ;;  %v1566_v35 = vld [vmem:[%s8888_s9 + $0x378] sm:$0xf] }
 0x107   :  { %1565 = vst [vmem:[#allocation3 + $0x370] sm:$0xf] %v1564_v34  ;;  %v1568_v36 = vld [vmem:[%s8888_s9 + $0x36c] sm:$0xf]  ;;  %1567 = vst [vmem:[#allocation3 + $0x374] sm:$0xf] %v1566_v35 }
 0x108   :  { %1569 = vst [vmem:[#allocation3 + $0x378] sm:$0xf] %v1568_v36  ;;  %1571 = vst [vmem:[#allocation3 + $0x37c] sm:$0xff] %v1570_v37   ;;  %v1574_v38 = vld [vmem:[%s8888_s9 + $0x390] sm:$0xf]  ;;  %v1586_v44 = vld [vmem:[%s8888_s9 + $0x39c] sm:$0xff]  }
 0x109   :  { %v1576_v39 = vld [vmem:[%s8888_s9 + $0x384] sm:$0xf]  ;;  %v1578_v40 = vld [vmem:[%s8888_s9 + $0x394] sm:$0xf]  ;;  %1575 = vst [vmem:[#allocation3 + $0x384] sm:$0xf] %v1574_v38 }
 0x10a   :  { %1577 = vst [vmem:[#allocation3 + $0x388] sm:$0xf] %v1576_v39  ;;  %1579 = vst [vmem:[#allocation3 + $0x38c] sm:$0xf] %v1578_v40  ;;  %v1580_v41 = vld [vmem:[%s8888_s9 + $0x388] sm:$0xf] }
 0x10b   :  { %v1582_v42 = vld [vmem:[%s8888_s9 + $0x398] sm:$0xf]  ;;  %v1584_v43 = vld [vmem:[%s8888_s9 + $0x38c] sm:$0xf]  ;;  %1581 = vst [vmem:[#allocation3 + $0x390] sm:$0xf] %v1580_v41 }
 0x10c   :  { %1583 = vst [vmem:[#allocation3 + $0x394] sm:$0xf] %v1582_v42  ;;  %1585 = vst [vmem:[#allocation3 + $0x398] sm:$0xf] %v1584_v43  ;;  %v1590_v45 = vld [vmem:[%s8888_s9 + $0x3b0] sm:$0xf] }
 0x10d   :  { %v1592_v46 = vld [vmem:[%s8888_s9 + $0x3a4] sm:$0xf]  ;;  %1587 = vst [vmem:[#allocation3 + $0x39c] sm:$0xff] %v1586_v44   ;;  %1591 = vst [vmem:[#allocation3 + $0x3a4] sm:$0xf] %v1590_v45  ;;  %v1602_v51 = vld [vmem:[%s8888_s9 + $0x3bc] sm:$0xff]  }
 0x10e   :  { %1593 = vst [vmem:[#allocation3 + $0x3a8] sm:$0xf] %v1592_v46  ;;  %v1594_v47 = vld [vmem:[%s8888_s9 + $0x3b4] sm:$0xf]  ;;  %v1596_v48 = vld [vmem:[%s8888_s9 + $0x3a8] sm:$0xf] }
 0x10f   :  { %v1598_v49 = vld [vmem:[%s8888_s9 + $0x3b8] sm:$0xf]  ;;  %1595 = vst [vmem:[#allocation3 + $0x3ac] sm:$0xf] %v1594_v47  ;;  %1597 = vst [vmem:[#allocation3 + $0x3b0] sm:$0xf] %v1596_v48 }
 0x110   :  { %1599 = vst [vmem:[#allocation3 + $0x3b4] sm:$0xf] %v1598_v49  ;;  %v1600_v50 = vld [vmem:[%s8888_s9 + $0x3ac] sm:$0xf]  ;;  %v1606_v52 = vld [vmem:[%s8888_s9 + $0x3d0] sm:$0xf] }
 0x111   :  { %1601 = vst [vmem:[#allocation3 + $0x3b8] sm:$0xf] %v1600_v50  ;;  %1603 = vst [vmem:[#allocation3 + $0x3bc] sm:$0xff] %v1602_v51   ;;  %v1608_v53 = vld [vmem:[%s8888_s9 + $0x3c4] sm:$0xf]  ;;  %v1618_v58 = vld [vmem:[%s8888_s9 + $0x3dc] sm:$0xff]  }
 0x112   :  { %1607 = vst [vmem:[#allocation3 + $0x3c4] sm:$0xf] %v1606_v52  ;;  %v1610_v54 = vld [vmem:[%s8888_s9 + $0x3d4] sm:$0xf]  ;;  %v1612_v55 = vld [vmem:[%s8888_s9 + $0x3c8] sm:$0xf] }
 0x113   :  { %1609 = vst [vmem:[#allocation3 + $0x3c8] sm:$0xf] %v1608_v53  ;;  %1611 = vst [vmem:[#allocation3 + $0x3cc] sm:$0xf] %v1610_v54  ;;  %v1614_v56 = vld [vmem:[%s8888_s9 + $0x3d8] sm:$0xf] }
 0x114   :  { %1613 = vst [vmem:[#allocation3 + $0x3d0] sm:$0xf] %v1612_v55  ;;  %v1616_v57 = vld [vmem:[%s8888_s9 + $0x3cc] sm:$0xf]  ;;  %1615 = vst [vmem:[#allocation3 + $0x3d4] sm:$0xf] %v1614_v56 }
 0x115   :  { %1617 = vst [vmem:[#allocation3 + $0x3d8] sm:$0xf] %v1616_v57  ;;  %1619 = vst [vmem:[#allocation3 + $0x3dc] sm:$0xff] %v1618_v58   ;;  %v1622_v59 = vld [vmem:[%s8888_s9 + $0x3f0] sm:$0xf] }
 0x116   :  { %v1624_v60 = vld [vmem:[%s8888_s9 + $0x3e4] sm:$0xf]  ;;  %v1626_v61 = vld [vmem:[%s8888_s9 + $0x3f4] sm:$0xf]  ;;  %1623 = vst [vmem:[#allocation3 + $0x3e4] sm:$0xf] %v1622_v59 }
 0x117   :  { %1625 = vst [vmem:[#allocation3 + $0x3e8] sm:$0xf] %v1624_v60  ;;  %1627 = vst [vmem:[#allocation3 + $0x3ec] sm:$0xf] %v1626_v61  ;;  %v1628_v62 = vld [vmem:[%s8888_s9 + $0x3e8] sm:$0xf] }
 0x118   :  { %v1630_v63 = vld [vmem:[%s8888_s9 + $0x3f8] sm:$0xf]  ;;  %v1632_v0 = vld [vmem:[%s8888_s9 + $0x3ec] sm:$0xf]  ;;  %1629 = vst [vmem:[#allocation3 + $0x3f0] sm:$0xf] %v1628_v62 }
 0x119   :  { %1631 = vst [vmem:[#allocation3 + $0x3f4] sm:$0xf] %v1630_v63  ;;  %1633 = vst [vmem:[#allocation3 + $0x3f8] sm:$0xf] %v1632_v0  ;;  %v1634_v1 = vld [vmem:[%s8888_s9 + $0x3fc] sm:$0xf] }
 0x11a   :  { %1635 = vst [vmem:[#allocation3 + $0x3fc] sm:$0xf] %v1634_v1 }
 0x11b   :  { %2178 = vsyncadd [#allocation8 + $0x1], 16384  ;;  %v7947_v2 = vld [vmem:[%s8889_s10] sm:$0xff]  ;;  %v7952_v3 = vld [vmem:[%s8889_s10 + $0x8] sm:$0xff] }
 0x11c   :  { %v7957_v4 = vld [vmem:[%s8889_s10 + $0x10] sm:$0xff]  ;;  %v7962_v5 = vld [vmem:[%s8889_s10 + $0x18] sm:$0xff]  ;;  %v7967_v6 = vld [vmem:[%s8889_s10 + $0x20] sm:$0xff] }
 0x11d   :  { %v7972_v7 = vld [vmem:[%s8889_s10 + $0x28] sm:$0xff]  ;;  %v7977_v8 = vld [vmem:[%s8889_s10 + $0x30] sm:$0xff]  ;;  %v7982_v9 = vld [vmem:[%s8889_s10 + $0x38] sm:$0xff] }
 0x11e   :  { %v7987_v10 = vld [vmem:[%s8889_s10 + $0x40] sm:$0xff]  ;;  %v7992_v11 = vld [vmem:[%s8889_s10 + $0x48] sm:$0xff]  ;;  %v7997_v12 = vld [vmem:[%s8889_s10 + $0x50] sm:$0xff] }
 0x11f   :  { %v8002_v13 = vld [vmem:[%s8889_s10 + $0x58] sm:$0xff]  ;;  %v8007_v14 = vld [vmem:[%s8889_s10 + $0x60] sm:$0xff]  ;;  %v8012_v15 = vld [vmem:[%s8889_s10 + $0x68] sm:$0xff] }
 0x120   :  { %v8017_v16 = vld [vmem:[%s8889_s10 + $0x70] sm:$0xff]  ;;  %v8022_v17 = vld [vmem:[%s8889_s10 + $0x78] sm:$0xff]  ;;  %v8027_v18 = vld [vmem:[%s8889_s10 + $0x80] sm:$0xff] }
 0x121   :  { %v8032_v19 = vld [vmem:[%s8889_s10 + $0x88] sm:$0xff]  ;;  %v8037_v20 = vld [vmem:[%s8889_s10 + $0x90] sm:$0xff]  ;;  %v8042_v21 = vld [vmem:[%s8889_s10 + $0x98] sm:$0xff] }
 0x122   :  { %v8047_v22 = vld [vmem:[%s8889_s10 + $0xa0] sm:$0xff]  ;;  %v8052_v23 = vld [vmem:[%s8889_s10 + $0xa8] sm:$0xff]  ;;  %v8057_v24 = vld [vmem:[%s8889_s10 + $0xb0] sm:$0xff] }
 0x123   :  { %v8062_v25 = vld [vmem:[%s8889_s10 + $0xb8] sm:$0xff]  ;;  %v8067_v26 = vld [vmem:[%s8889_s10 + $0xc0] sm:$0xff]  ;;  %v8072_v27 = vld [vmem:[%s8889_s10 + $0xc8] sm:$0xff] }
 0x124   :  { %v8077_v28 = vld [vmem:[%s8889_s10 + $0xd0] sm:$0xff]  ;;  %v8082_v29 = vld [vmem:[%s8889_s10 + $0xd8] sm:$0xff]  ;;  %v8087_v30 = vld [vmem:[%s8889_s10 + $0xe0] sm:$0xff] }
 0x125   :  { %v8092_v31 = vld [vmem:[%s8889_s10 + $0xe8] sm:$0xff]  ;;  %v8097_v32 = vld [vmem:[%s8889_s10 + $0xf0] sm:$0xff]  ;;  %v8102_v33 = vld [vmem:[%s8889_s10 + $0xf8] sm:$0xff] }
 0x126   :  { %2283 = vsyncadd [#allocation8 + $0x2], 4096  ;;  %v6332_v34 = vld [vmem:[%s8880_s1 + $0x40] sm:$0xff]   ;;  %v6530_v36 = vmov 0.0   ;;  %v6334_v37 = vld [vmem:[%s8880_s1 + $0x48] sm:$0xff]   ;;  %vm6531_vm0 = vmmov 0  }
 0x127   :  { %v6333_v35 = vld [vmem:[%s8880_s1] sm:$0xff]   ;;  %5984 = vmatprep.subr.bf16.mxu1 %v6530_v36  ;;  %5732 = vmatprep.subr.bf16.mxu0 %v6332_v34  ;;  %v6335_v38 = vld [vmem:[%s8880_s1 + $0x8] sm:$0xff]   ;;  %v6336_v39 = vld [vmem:[%s8880_s1 + $0x50] sm:$0xff]  }
 0x128   :  { %5733 = vmatpush3.bf16.msra.mxu0 %v6333_v35  ;;  %v6337_v40 = vld [vmem:[%s8880_s1 + $0x10] sm:$0xff]   ;;  %v6338_v41 = vld [vmem:[%s8880_s1 + $0x58] sm:$0xff]   ;;  %v6340_v43 = vld [vmem:[%s8880_s1 + $0x60] sm:$0xff]   ;;  %6000 = vmatprep.mubr.msk.bf16.mxu1 %vm6531_vm0, %v6530_v36 }
 0x129   :  { %5734 = vmatprep.subr.bf16.mxu0 %v6334_v37  ;;  %v6339_v42 = vld [vmem:[%s8880_s1 + $0x18] sm:$0xff]   ;;  %v6341_v44 = vld [vmem:[%s8880_s1 + $0x20] sm:$0xff]   ;;  %v6342_v45 = vld [vmem:[%s8880_s1 + $0x68] sm:$0xff]  }
 0x12a   :  { %v6350_v46 = vld [vmem:[%s8879_s0 + $0x4] ss:$8 sps:$4 sm:$0xff]   ;;  %v6344_v48 = vld [vmem:[%s8880_s1 + $0x70] sm:$0xff]   ;;  %v6346_v50 = vld [vmem:[%s8880_s1 + $0x78] sm:$0xff]  }
 0x12b   :  { %2547 = vmatprep.mubr.bf16.mxu0 %v6350_v46  ;;  %v6343_v47 = vld [vmem:[%s8880_s1 + $0x28] sm:$0xff]   ;;  %v6345_v49 = vld [vmem:[%s8880_s1 + $0x30] sm:$0xff]   ;;  %v6369_v51 = vld [vmem:[%s8882_s3 + $0x40] sm:$0xff]  }
 0x12c   :  { %5735 = vmatpush3.bf16.msra.mxu0 %v6335_v38  ;;  %v6347_v52 = vld [vmem:[%s8880_s1 + $0x38] sm:$0xff]   ;;  %5985 = vmatpush3.bf16.msra.mxu1 %v6369_v51  ;;  %v6370_v53 = vld [vmem:[%s8882_s3 + $0x48] sm:$0xff]   ;;  %v6371_v56 = vld [vmem:[%s8882_s3 + $0x50] sm:$0xff]  }
 0x12d   :  { %5736 = vmatprep.subr.bf16.mxu0 %v6336_v39  ;;  %v6348_v54 = vld [vmem:[%s8879_s0] ss:$8 sps:$4 sm:$0xff]   ;;  %5986 = vmatprep.subr.bf16.mxu1 %v6530_v36  ;;  %v6351_v55 = vld [vmem:[%s8879_s0 + $0x14] ss:$8 sps:$4 sm:$0xff]   ;;  %v6353_v57 = vld [vmem:[%s8879_s0 + $0x10] ss:$8 sps:$4 sm:$0xff]  }
 0x12e   :  { %v6354_v58 = vld [vmem:[%s8879_s0 + $0x24] ss:$8 sps:$4 sm:$0xff]   ;;  %v6356_v59 = vld [vmem:[%s8879_s0 + $0x20] ss:$8 sps:$4 sm:$0xff]   ;;  %v6357_v60 = vld [vmem:[%s8879_s0 + $0x34] ss:$8 sps:$4 sm:$0xff]  }
 0x12f   :  { %v6359_v61 = vld [vmem:[%s8879_s0 + $0x30] ss:$8 sps:$4 sm:$0xff]   ;;  %v6360_v62 = vld [vmem:[%s8879_s0 + $0x44] ss:$8 sps:$4 sm:$0xff]   ;;  %v6362_v63 = vld [vmem:[%s8879_s0 + $0x40] ss:$8 sps:$4 sm:$0xff]  }
 0x130   :  { %5737 = vmatpush3.bf16.msra.mxu0 %v6337_v40  ;;  %5987 = vmatpush3.bf16.msra.mxu1 %v6370_v53  ;;  %v6363_v0 = vld [vmem:[%s8879_s0 + $0x54] ss:$8 sps:$4 sm:$0xff]   ;;  %v6365_v1 = vld [vmem:[%s8879_s0 + $0x50] ss:$8 sps:$4 sm:$0xff]   ;;  %v6366_v34 = vld [vmem:[%s8879_s0 + $0x64] ss:$8 sps:$4 sm:$0xff]  }
 0x131   :  { %5738 = vmatprep.subr.bf16.mxu0 %v6338_v41  ;;  %5988 = vmatprep.subr.bf16.mxu1 %v6530_v36  ;;  %v6368_v35 = vld [vmem:[%s8879_s0 + $0x60] ss:$8 sps:$4 sm:$0xff]   ;;  %v6372_v37 = vld [vmem:[%s8882_s3 + $0x58] sm:$0xff]   ;;  %v6375_v40 = vld [vmem:[%s8882_s3 + $0x70] sm:$0xff]  }
 0x132   :  { %v6373_v38 = vld [vmem:[%s8882_s3 + $0x60] sm:$0xff]   ;;  %v6374_v39 = vld [vmem:[%s8882_s3 + $0x68] sm:$0xff]   ;;  %v6376_v41 = vld [vmem:[%s8879_s0 + $0x74] ss:$8 sps:$4 sm:$0xff]  }
 0x133   :  { %v6385_v46 = vld [vmem:[%s8882_s3 + $0x90] sm:$0xff]   ;;  %v6395_v51 = vld [vmem:[%s8882_s3 + $0xb8] sm:$0xff]   ;;  %v8273_v53 = vld [vmem:[%s8881_s2] ss:$0 sm:$0xff] }
 0x134   :  { %5739 = vmatpush3.bf16.msra.mxu0 %v6339_v42  ;;  %5989 = vmatpush3.bf16.msra.mxu1 %v6371_v56  ;;  %v6378_v42 = vld [vmem:[%s8879_s0 + $0x70] ss:$8 sps:$4 sm:$0xff]  }
 0x135   :  { %5740 = vmatprep.subr.bf16.mxu0 %v6340_v43  ;;  %5990 = vmatprep.subr.bf16.mxu1 %v6530_v36  ;;  %v6380_v43 = vld [vmem:[%s8882_s3 + $0x80] sm:$0xff]  }
 0x138   :  { %5741 = vmatpush3.bf16.msra.mxu0 %v6341_v44  ;;  %5991 = vmatpush3.bf16.msra.mxu1 %v6372_v37  ;;  %v6379_v44 = vld [vmem:[%s8882_s3 + $0x78] sm:$0xff]  }
 0x139   :  { %5742 = vmatprep.subr.bf16.mxu0 %v6342_v45  ;;  %5992 = vmatprep.subr.bf16.mxu1 %v6530_v36  ;;  %v6383_v45 = vld [vmem:[%s8882_s3 + $0x88] sm:$0xff]  }
 0x13c   :  { %5743 = vmatpush3.bf16.msra.mxu0 %v6343_v47  ;;  %5993 = vmatpush3.bf16.msra.mxu1 %v6373_v38  ;;  %v6387_v47 = vld [vmem:[%s8882_s3 + $0x98] sm:$0xff]  }
 0x13d   :  { %5744 = vmatprep.subr.bf16.mxu0 %v6344_v48  ;;  %5994 = vmatprep.subr.bf16.mxu1 %v6530_v36  ;;  %v6389_v48 = vld [vmem:[%s8882_s3 + $0xa0] sm:$0xff]  }
 0x140   :  { %5745 = vmatpush3.bf16.msra.mxu0 %v6345_v49  ;;  %5995 = vmatpush3.bf16.msra.mxu1 %v6374_v39  ;;  %v6391_v49 = vld [vmem:[%s8882_s3 + $0xa8] sm:$0xff]  }
 0x141   :  { %5746 = vmatprep.subr.bf16.mxu0 %v6346_v50  ;;  %5996 = vmatprep.subr.bf16.mxu1 %v6530_v36  ;;  %v6393_v50 = vld [vmem:[%s8882_s3 + $0xb0] sm:$0xff]  }
 0x144   :  { %5747 = vmatpush3.bf16.msra.mxu0 %v6347_v52  ;;  %5997 = vmatpush3.bf16.msra.mxu1 %v6375_v40 }
 0x145   :  { %6024 = vmatprep.subr.bf16.mxu0 %v6530_v36  ;;  %5998 = vmatprep.subr.bf16.mxu1 %v6530_v36 }
 0x147   :  { %2548 = vmatmul.mubr.bf16.vlgmr.msra.gmra.mrb[0].mxu0 %v6348_v54 }
 0x148   :  { %2555 = vmatprep.mubr.bf16.mxu0 %v6351_v55  ;;  %6025 = vmatpush3.bf16.msra.mxu0 %v6380_v43 }
 0x149   :  { %6026 = vmatprep.subr.bf16.mxu0 %v6530_v36  ;;  %5999 = vmatpush3.bf16.msra.mxu1 %v6379_v44 }
 0x14a   :  { %6004 = vmatprep.subr.bf16.mxu1 %v6530_v36 }
 0x14c   :  { %6027 = vmatpush3.bf16.msra.mxu0 %v6383_v45 }
 0x14d   :  { %6028 = vmatprep.subr.bf16.mxu0 %v6530_v36 }
 0x14f   :  { %2556 = vmatmul.mubr.bf16.gmra.mrb[4].mxu0 %v6353_v57 }
 0x150   :  { %2563 = vmatprep.mubr.bf16.mxu0 %v6354_v58  ;;  %6029 = vmatpush3.bf16.msra.mxu0 %v6385_v46 }
 0x151   :  { %6030 = vmatprep.subr.bf16.mxu0 %v6530_v36 }
 0x154   :  { %6031 = vmatpush3.bf16.msra.mxu0 %v6387_v47 }
 0x155   :  { %6032 = vmatprep.subr.bf16.mxu0 %v6530_v36 }
 0x157   :  { %2564 = vmatmul.mubr.bf16.gmra.mrb[8].mxu0 %v6356_v59 }
 0x158   :  { %2571 = vmatprep.mubr.bf16.mxu0 %v6357_v60  ;;  %6033 = vmatpush3.bf16.msra.mxu0 %v6389_v48 }
 0x159   :  { %6034 = vmatprep.subr.bf16.mxu0 %v6530_v36 }
 0x15c   :  { %6035 = vmatpush3.bf16.msra.mxu0 %v6391_v49  ;;  %v6381_v49 = vld [vmem:[%s8882_s3] sm:$0xff]  }
 0x15d   :  { %6036 = vmatprep.subr.bf16.mxu0 %v6530_v36 }
 0x15f   :  { %2572 = vmatmul.mubr.bf16.gmra.mrb[12].mxu0 %v6359_v61 }
 0x160   :  { %2579 = vmatprep.mubr.bf16.mxu0 %v6360_v62  ;;  %6037 = vmatpush3.bf16.msra.mxu0 %v6393_v50 }
 0x161   :  { %6038 = vmatprep.subr.bf16.mxu0 %v6530_v36 }
 0x164   :  { %6039 = vmatpush3.bf16.msra.mxu0 %v6395_v51 }
 0x165   :  { %6064 = vmatprep.subr.bf16.mxu0 %v6530_v36 }
 0x167   :  { %2580 = vmatmul.mubr.bf16.gmra.mrb[16].mxu0 %v6362_v63 }
 0x168   :  { %2587 = vmatprep.mubr.bf16.mxu0 %v6363_v0 }
 0x16f   :  { %2588 = vmatmul.mubr.bf16.gmra.mrb[20].mxu0 %v6365_v1 }
 0x170   :  { %2595 = vmatprep.mubr.bf16.mxu0 %v6366_v34 }
 0x177   :  { %2596 = vmatmul.mubr.bf16.gmra.mrb[24].mxu0 %v6368_v35 }
 0x178   :  { %2603 = vmatprep.mubr.bf16.mxu0 %v6376_v41 }
 0x17f   :  { %2604 = vmatmul.mubr.bf16.gmra.mrb[28].mxu0 %v6378_v42 }
 0x180   :  { %6040 = vmatprep.mubr.msk.bf16.mxu0 %vm6531_vm0, %v6530_v36 }
 0x21a   :  { %v5748_v52 = vpop.f32.mrb[0].mxu0 }
 0x21b   :  { %v5749_v54 = vpop.f32.mrb[1].mxu0 }
 0x21c   :  { %v5750_v55 = vadd.f32 %v5749_v54, %v5748_v52  ;;  %v5751_v56 = vpop.f32.mrb[2].mxu0 }
 0x21d   :  { %v5752_v57 = vpop.f32.mrb[3].mxu0 }
 0x21e   :  { %v2550_v58 = vadd.f32 %v5750_v55, %v8273_v53  ;;  %v5753_v59 = vadd.f32 %v5752_v57, %v5751_v56  ;;  %v6382_v57 = vld [vmem:[%s8882_s3 + $0x8] sm:$0xff]  }
 0x220   :  { %v2553_v60 = vadd.f32 %v5753_v59, %v8273_v53  ;;  %v2612_v61 = vmax.f32 %v2550_v58, 0.0 }
 0x222   :  { %v2613_v62 = vmax.f32 %v2553_v60, 0.0  ;;  %v5754_v63 = vpop.f32.mrb[4].mxu0  ;;  %v6397_v60 = vld [vmem:[%s8882_s3 + $0x100] sm:$0xff]  }
 0x223   :  { %v5755_v0 = vpop.f32.mrb[5].mxu0 }
 0x224   :  { %v2628_v1 = vpack.c.bf16 %v2613_v62, %v2612_v61  ;;  %v5756_v34 = vadd.f32 %v5755_v0, %v5754_v63  ;;  %v5757_v35 = vpop.f32.mrb[6].mxu0 }
 0x225   :  { %v5758_v37 = vpop.f32.mrb[7].mxu0 }
 0x226   :  { %2636 = vst [vmem:[#allocation5] sm:$0xff] %v2628_v1  ;;  %v2558_v38 = vadd.f32 %v5756_v34, %v8273_v53  ;;  %v5759_v39 = vadd.f32 %v5758_v37, %v5757_v35  ;;  %v6384_v1 = vld [vmem:[%s8882_s3 + $0x10] sm:$0xff]  }
 0x228   :  { %v2614_v40 = vmax.f32 %v2558_v38, 0.0  ;;  %v2561_v41 = vadd.f32 %v5759_v39, %v8273_v53  ;;  %v6399_v39 = vld [vmem:[%s8882_s3 + $0x108] sm:$0xff]  }
 0x22a   :  { %v2615_v42 = vmax.f32 %v2561_v41, 0.0  ;;  %v5760_v43 = vpop.f32.mrb[8].mxu0 }
 0x22b   :  { %v5761_v44 = vpop.f32.mrb[9].mxu0 }
 0x22c   :  { %v2629_v45 = vpack.c.bf16 %v2615_v42, %v2614_v40  ;;  %v5762_v46 = vadd.f32 %v5761_v44, %v5760_v43  ;;  %v5763_v47 = vpop.f32.mrb[10].mxu0  ;;  %v6386_v42 = vld [vmem:[%s8882_s3 + $0x18] sm:$0xff]  }
 0x22d   :  { %v2661_v48 = vld [vmem:[#allocation5] sm:$0xf0]  ;;  %v5764_v50 = vpop.f32.mrb[11].mxu0 }
 0x22e   :  { %v2680_v51 = vrot.slane %v2661_v48, 4  ;;  %2637 = vst [vmem:[#allocation5 + $0x8] sm:$0xff] %v2629_v45  ;;  %v2566_v52 = vadd.f32 %v5762_v46, %v8273_v53  ;;  %v5765_v54 = vadd.f32 %v5764_v50, %v5763_v47  ;;  %v6401_v45 = vld [vmem:[%s8882_s3 + $0x110] sm:$0xff]   ;;  %v6388_v50 = vld [vmem:[%s8882_s3 + $0x20] sm:$0xff]  }
 0x230   :  { %6001 = vmatmul.mubr.bf16.vlgmr.msra.gmra.mrb[0].mxu1 %v2680_v51  ;;  %v2616_v55 = vmax.f32 %v2566_v52, 0.0  ;;  %v2569_v56 = vadd.f32 %v5765_v54, %v8273_v53 }
 0x231   :  { %6005 = vmatpush3.bf16.msra.mxu1 %v6381_v49  ;;  %6020 = vmatprep.mubr.msk.bf16.mxu1 %vm6531_vm0, %v6530_v36 }
 0x232   :  { %6006 = vmatprep.subr.bf16.mxu1 %v6530_v36  ;;  %v2617_v58 = vmax.f32 %v2569_v56, 0.0  ;;  %v5766_v59 = vpop.f32.mrb[12].mxu0 }
 0x233   :  { %v5767_v61 = vpop.f32.mrb[13].mxu0 }
 0x234   :  { %v2630_v62 = vpack.c.bf16 %v2617_v58, %v2616_v55  ;;  %v5768_v63 = vadd.f32 %v5767_v61, %v5766_v59  ;;  %v5769_v0 = vpop.f32.mrb[14].mxu0  ;;  %v6403_v55 = vld [vmem:[%s8882_s3 + $0x118] sm:$0xff]   ;;  %v6390_v58 = vld [vmem:[%s8882_s3 + $0x28] sm:$0xff]   ;;  %v6405_v61 = vld [vmem:[%s8882_s3 + $0x120] sm:$0xff]  }
 0x235   :  { %6007 = vmatpush3.bf16.msra.mxu1 %v6382_v57  ;;  %v2858_v34 = vld [vmem:[#allocation5 + $0x8] sm:$0xf]  ;;  %v5770_v35 = vpop.f32.mrb[15].mxu0 }
 0x236   :  { %6008 = vmatprep.subr.bf16.mxu1 %v6530_v36  ;;  %6041 = vmatmul.mubr.bf16.vlgmr.msra.gmra.mrb[32].mxu0 %v2858_v34  ;;  %2638 = vst [vmem:[#allocation5 + $0x10] sm:$0xff] %v2630_v62  ;;  %v2574_v37 = vadd.f32 %v5768_v63, %v8273_v53  ;;  %v5771_v38 = vadd.f32 %v5770_v35, %v5769_v0  ;;  %v6392_v34 = vld [vmem:[%s8882_s3 + $0x30] sm:$0xff]  }
 0x237   :  { %6065 = vmatpush3.bf16.msra.mxu0 %v6397_v60  ;;  %6080 = vmatprep.mubr.msk.bf16.mxu0 %vm6531_vm0, %v6530_v36 }
 0x238   :  { %6066 = vmatprep.subr.bf16.mxu0 %v6530_v36  ;;  %v2618_v40 = vmax.f32 %v2574_v37, 0.0  ;;  %v2577_v41 = vadd.f32 %v5771_v38, %v8273_v53 }
 0x239   :  { %6009 = vmatpush3.bf16.msra.mxu1 %v6384_v1 }
 0x23a   :  { %6010 = vmatprep.subr.bf16.mxu1 %v6530_v36  ;;  %v2619_v43 = vmax.f32 %v2577_v41, 0.0  ;;  %v5772_v44 = vpop.f32.mrb[16].mxu0 }
 0x23b   :  { %6067 = vmatpush3.bf16.msra.mxu0 %v6399_v39  ;;  %v5773_v46 = vpop.f32.mrb[17].mxu0  ;;  %v6407_v39 = vld [vmem:[%s8882_s3 + $0x128] sm:$0xff]  }
 0x23c   :  { %6068 = vmatprep.subr.bf16.mxu0 %v6530_v36  ;;  %v2631_v47 = vpack.c.bf16 %v2619_v43, %v2618_v40  ;;  %v5774_v48 = vadd.f32 %v5773_v46, %v5772_v44  ;;  %v5775_v49 = vpop.f32.mrb[18].mxu0  ;;  %v6409_v44 = vld [vmem:[%s8882_s3 + $0x130] sm:$0xff]   ;;  %v6396_v46 = vld [vmem:[%s8882_s3 + $0xc0] sm:$0xff]  }
 0x23d   :  { %6011 = vmatpush3.bf16.msra.mxu1 %v6386_v42  ;;  %v5776_v51 = vpop.f32.mrb[19].mxu0  ;;  %v6394_v42 = vld [vmem:[%s8882_s3 + $0x38] sm:$0xff]  }
 0x23e   :  { %6012 = vmatprep.subr.bf16.mxu1 %v6530_v36  ;;  %2639 = vst [vmem:[#allocation5 + $0x18] sm:$0xff] %v2631_v47  ;;  %v2582_v52 = vadd.f32 %v5774_v48, %v8273_v53  ;;  %v5777_v54 = vadd.f32 %v5776_v51, %v5775_v49  ;;  %v2644_v47 = vld [vmem:[#allocation5] sm:$0xf]  ;;  %v6411_v48 = vld [vmem:[%s8882_s3 + $0x138] sm:$0xff]   ;;  %v6398_v49 = vld [vmem:[%s8882_s3 + $0xc8] sm:$0xff]  }
 0x23f   :  { %6069 = vmatpush3.bf16.msra.mxu0 %v6401_v45  ;;  %v6413_v51 = vld [vmem:[%s8882_s3 + $0x180] sm:$0xff]  }
 0x240   :  { %6070 = vmatprep.subr.bf16.mxu0 %v6530_v36  ;;  %v2620_v56 = vmax.f32 %v2582_v52, 0.0  ;;  %v2585_v57 = vadd.f32 %v5777_v54, %v8273_v53  ;;  %v6400_v52 = vld [vmem:[%s8882_s3 + $0xd0] sm:$0xff]   ;;  %v6415_v54 = vld [vmem:[%s8882_s3 + $0x188] sm:$0xff]  }
 0x241   :  { %6013 = vmatpush3.bf16.msra.mxu1 %v6388_v50  ;;  %v3075_v50 = vld [vmem:[#allocation5 + $0x10] sm:$0xf] }
 0x242   :  { %6014 = vmatprep.subr.bf16.mxu1 %v6530_v36  ;;  %v2621_v59 = vmax.f32 %v2585_v57, 0.0  ;;  %v5778_v60 = vpop.f32.mrb[20].mxu0  ;;  %v6404_v57 = vld [vmem:[%s8882_s3 + $0xe0] sm:$0xff]  }
 0x243   :  { %6071 = vmatpush3.bf16.msra.mxu0 %v6403_v55  ;;  %v5779_v62 = vpop.f32.mrb[21].mxu0  ;;  %v6402_v55 = vld [vmem:[%s8882_s3 + $0xd8] sm:$0xff]  }
 0x244   :  { %6072 = vmatprep.subr.bf16.mxu0 %v6530_v36  ;;  %v2632_v63 = vpack.c.bf16 %v2621_v59, %v2620_v56  ;;  %v5780_v0 = vadd.f32 %v5779_v62, %v5778_v60  ;;  %v5781_v1 = vpop.f32.mrb[22].mxu0  ;;  %v6417_v56 = vld [vmem:[%s8882_s3 + $0x190] sm:$0xff]   ;;  %v6419_v60 = vld [vmem:[%s8882_s3 + $0x198] sm:$0xff]  }
 0x245   :  { %6015 = vmatpush3.bf16.msra.mxu1 %v6390_v58  ;;  %v5782_v35 = vpop.f32.mrb[23].mxu0 }
 0x246   :  { %6016 = vmatprep.subr.bf16.mxu1 %v6530_v36  ;;  %2640 = vst [vmem:[#allocation5 + $0x20] sm:$0xff] %v2632_v63  ;;  %v2590_v37 = vadd.f32 %v5780_v0, %v8273_v53  ;;  %v5783_v38 = vadd.f32 %v5782_v35, %v5781_v1  ;;  %v6406_v0 = vld [vmem:[%s8882_s3 + $0xe8] sm:$0xff]   ;;  %v6421_v35 = vld [vmem:[%s8882_s3 + $0x1a0] sm:$0xff]  }
 0x247   :  { %6073 = vmatpush3.bf16.msra.mxu0 %v6405_v61 }
 0x248   :  { %6074 = vmatprep.subr.bf16.mxu0 %v6530_v36  ;;  %v2622_v40 = vmax.f32 %v2590_v37, 0.0  ;;  %v2593_v41 = vadd.f32 %v5783_v38, %v8273_v53 }
 0x249   :  { %6017 = vmatpush3.bf16.msra.mxu1 %v6392_v34 }
 0x24a   :  { %6018 = vmatprep.subr.bf16.mxu1 %v6530_v36  ;;  %v2623_v43 = vmax.f32 %v2593_v41, 0.0  ;;  %v5784_v58 = vpop.f32.mrb[24].mxu0  ;;  %v6423_v41 = vld [vmem:[%s8882_s3 + $0x1a8] sm:$0xff]  }
 0x24b   :  { %6075 = vmatpush3.bf16.msra.mxu0 %v6407_v39  ;;  %v5785_v59 = vpop.f32.mrb[25].mxu0  ;;  %v6408_v39 = vld [vmem:[%s8882_s3 + $0xf0] sm:$0xff]  }
 0x24c   :  { %6076 = vmatprep.subr.bf16.mxu0 %v6530_v36  ;;  %v2633_v45 = vpack.c.bf16 %v2623_v43, %v2622_v40  ;;  %v5786_v61 = vadd.f32 %v5785_v59, %v5784_v58  ;;  %v5787_v62 = vpop.f32.mrb[26].mxu0  ;;  %v6410_v43 = vld [vmem:[%s8882_s3 + $0xf8] sm:$0xff]  }
 0x24d   :  { %6019 = vmatpush3.bf16.msra.mxu1 %v6394_v42  ;;  %v5788_v63 = vpop.f32.mrb[27].mxu0 }
 0x24e   :  { %6044 = vmatprep.subr.bf16.mxu1 %v6530_v36  ;;  %2641 = vst [vmem:[#allocation5 + $0x28] sm:$0xff] %v2633_v45  ;;  %v2598_v1 = vadd.f32 %v5786_v61, %v8273_v53  ;;  %v5789_v34 = vadd.f32 %v5788_v63, %v5787_v62  ;;  %v6425_v45 = vld [vmem:[%s8882_s3 + $0x1b0] sm:$0xff]  }
 0x24f   :  { %6077 = vmatpush3.bf16.msra.mxu0 %v6409_v44  ;;  %v2965_v44 = vld [vmem:[#allocation5 + $0x8] sm:$0xf0] }
 0x250   :  { %6021 = vmatmul.mubr.bf16.vlgmr.msra.gmra.mrb[4].mxu1 %v2644_v47  ;;  %6078 = vmatprep.subr.bf16.mxu0 %v6530_v36  ;;  %v2624_v37 = vmax.f32 %v2598_v1, 0.0  ;;  %v2601_v38 = vadd.f32 %v5789_v34, %v8273_v53  ;;  %v2984_v47 = vrot.slane %v2965_v44, 4  ;;  %v6441_v44 = vld [vmem:[%s8882_s3 + $0x230] sm:$0xff]  }
 0x251   :  { %6045 = vmatpush3.bf16.msra.mxu1 %v6396_v46  ;;  %6060 = vmatprep.mubr.msk.bf16.mxu1 %vm6531_vm0, %v6530_v36  ;;  %v6412_v46 = vld [vmem:[%s8882_s3 + $0x140] sm:$0xff]  }
 0x252   :  { %6046 = vmatprep.subr.bf16.mxu1 %v6530_v36  ;;  %v2625_v40 = vmax.f32 %v2601_v38, 0.0  ;;  %v5790_v58 = vpop.f32.mrb[28].mxu0 }
 0x253   :  { %6079 = vmatpush3.bf16.msra.mxu0 %v6411_v48  ;;  %v6427_v48 = vld [vmem:[%s8882_s3 + $0x1b8] sm:$0xff]   ;;  %v5791_v59 = vpop.f32.mrb[29].mxu0 }
 0x254   :  { %6104 = vmatprep.subr.bf16.mxu0 %v6530_v36  ;;  %v2634_v42 = vpack.c.bf16 %v2625_v40, %v2624_v37  ;;  %v5792_v61 = vadd.f32 %v5791_v59, %v5790_v58  ;;  %v5793_v62 = vpop.f32.mrb[30].mxu0  ;;  %v6438_v58 = vld [vmem:[%s8882_s3 + $0x1e8] sm:$0xff]   ;;  %v6453_v59 = vld [vmem:[%s8882_s3 + $0x2a0] sm:$0xff]  }
 0x255   :  { %6047 = vmatpush3.bf16.msra.mxu1 %v6398_v49  ;;  %v6414_v49 = vld [vmem:[%s8882_s3 + $0x148] sm:$0xff]   ;;  %v5794_v63 = vpop.f32.mrb[31].mxu0 }
 0x256   :  { %6048 = vmatprep.subr.bf16.mxu1 %v6530_v36  ;;  %6081 = vmatmul.mubr.bf16.vlgmr.msra.gmra.mrb[36].mxu0 %v3075_v50  ;;  %2642 = vst [vmem:[#allocation5 + $0x30] sm:$0xff] %v2634_v42  ;;  %v3292_v50 = vld [vmem:[#allocation5 + $0x18] sm:$0xf]  ;;  %v2606_v1 = vadd.f32 %v5792_v61, %v8273_v53  ;;  %v5795_v34 = vadd.f32 %v5794_v63, %v5793_v62  ;;  %v6455_v61 = vld [vmem:[%s8882_s3 + $0x2a8] sm:$0xff]   ;;  %v3399_v63 = vld [vmem:[#allocation5 + $0x18] sm:$0xf0] }
 0x257   :  { %6105 = vmatpush3.bf16.msra.mxu0 %v6413_v51  ;;  %6120 = vmatprep.mubr.msk.bf16.mxu0 %vm6531_vm0, %v6530_v36  ;;  %v6429_v51 = vld [vmem:[%s8882_s3 + $0x200] sm:$0xff]   ;;  %v6442_v62 = vld [vmem:[%s8882_s3 + $0x1f8] sm:$0xff]  }
 0x258   :  { %6106 = vmatprep.subr.bf16.mxu0 %v6530_v36  ;;  %v2626_v37 = vmax.f32 %v2606_v1, 0.0  ;;  %v2609_v38 = vadd.f32 %v5795_v34, %v8273_v53  ;;  %v6426_v53 = vld [vmem:[%s8882_s3 + $0x178] sm:$0xff]   ;;  %v6444_v1 = vld [vmem:[%s8882_s3 + $0x240] sm:$0xff]   ;;  %v3418_v34 = vrot.slane %v3399_v63, 4 }
 0x259   :  { %6049 = vmatpush3.bf16.msra.mxu1 %v6400_v52  ;;  %v6416_v52 = vld [vmem:[%s8882_s3 + $0x150] sm:$0xff]   ;;  %v6468_v63 = vld [vmem:[%s8882_s3 + $0x2e0] sm:$0xff]  }
 0x25a   :  { %6050 = vmatprep.subr.bf16.mxu1 %v6530_v36  ;;  %v2627_v40 = vmax.f32 %v2609_v38, 0.0  ;;  %v3726_v38 = vld [vmem:[#allocation5 + $0x28] sm:$0xf] }
 0x25b   :  { %6107 = vmatpush3.bf16.msra.mxu0 %v6415_v54  ;;  %v6431_v54 = vld [vmem:[%s8882_s3 + $0x208] sm:$0xff]  }
 0x25c   :  { %6108 = vmatprep.subr.bf16.mxu0 %v6530_v36  ;;  %v2635_v42 = vpack.c.bf16 %v2627_v40, %v2626_v37  ;;  %v6446_v37 = vld [vmem:[%s8882_s3 + $0x248] sm:$0xff]   ;;  %v6448_v40 = vld [vmem:[%s8882_s3 + $0x250] sm:$0xff]  }
 0x25d   :  { %6051 = vmatpush3.bf16.msra.mxu1 %v6402_v55  ;;  %v6418_v55 = vld [vmem:[%s8882_s3 + $0x158] sm:$0xff]  }
 0x25e   :  { %6052 = vmatprep.subr.bf16.mxu1 %v6530_v36  ;;  %2643 = vst [vmem:[#allocation5 + $0x38] sm:$0xff] %v2635_v42  ;;  %v6450_v42 = vld [vmem:[%s8882_s3 + $0x258] sm:$0xff]  }
 0x25f   :  { %6109 = vmatpush3.bf16.msra.mxu0 %v6417_v56  ;;  %v6433_v56 = vld [vmem:[%s8882_s3 + $0x210] sm:$0xff]  }
 0x260   :  { %6110 = vmatprep.subr.bf16.mxu0 %v6530_v36 }
 0x261   :  { %6053 = vmatpush3.bf16.msra.mxu1 %v6404_v57  ;;  %v6420_v57 = vld [vmem:[%s8882_s3 + $0x160] sm:$0xff]  }
 0x262   :  { %6054 = vmatprep.subr.bf16.mxu1 %v6530_v36 }
 0x263   :  { %6111 = vmatpush3.bf16.msra.mxu0 %v6419_v60  ;;  %v6435_v60 = vld [vmem:[%s8882_s3 + $0x218] sm:$0xff]  }
 0x264   :  { %6112 = vmatprep.subr.bf16.mxu0 %v6530_v36 }
 0x265   :  { %6055 = vmatpush3.bf16.msra.mxu1 %v6406_v0  ;;  %v6422_v0 = vld [vmem:[%s8882_s3 + $0x168] sm:$0xff]  }
 0x266   :  { %6056 = vmatprep.subr.bf16.mxu1 %v6530_v36 }
 0x267   :  { %6113 = vmatpush3.bf16.msra.mxu0 %v6421_v35  ;;  %v6437_v35 = vld [vmem:[%s8882_s3 + $0x220] sm:$0xff]  }
 0x268   :  { %6114 = vmatprep.subr.bf16.mxu0 %v6530_v36 }
 0x269   :  { %6057 = vmatpush3.bf16.msra.mxu1 %v6408_v39  ;;  %v6424_v39 = vld [vmem:[%s8882_s3 + $0x170] sm:$0xff]  }
 0x26a   :  { %6058 = vmatprep.subr.bf16.mxu1 %v6530_v36 }
 0x26b   :  { %6115 = vmatpush3.bf16.msra.mxu0 %v6423_v41  ;;  %v6439_v41 = vld [vmem:[%s8882_s3 + $0x228] sm:$0xff]  }
 0x26c   :  { %6116 = vmatprep.subr.bf16.mxu0 %v6530_v36 }
 0x26d   :  { %6059 = vmatpush3.bf16.msra.mxu1 %v6410_v43  ;;  %v3182_v43 = vld [vmem:[#allocation5 + $0x10] sm:$0xf0] }
 0x26e   :  { %6084 = vmatprep.subr.bf16.mxu1 %v6530_v36 }
 0x26f   :  { %6117 = vmatpush3.bf16.msra.mxu0 %v6425_v45  ;;  %v6428_v45 = vld [vmem:[%s8882_s3 + $0x1c0] sm:$0xff]  }
 0x270   :  { %6061 = vmatmul.mubr.bf16.vlgmr.msra.gmra.mrb[8].mxu1 %v2984_v47  ;;  %6118 = vmatprep.subr.bf16.mxu0 %v6530_v36  ;;  %v6443_v47 = vld [vmem:[%s8882_s3 + $0x238] sm:$0xff]  }
 0x271   :  { %6085 = vmatpush3.bf16.msra.mxu1 %v6412_v46  ;;  %6100 = vmatprep.mubr.msk.bf16.mxu1 %vm6531_vm0, %v6530_v36  ;;  %v3201_v46 = vrot.slane %v3182_v43, 4  ;;  %v6452_v43 = vld [vmem:[%s8882_s3 + $0x260] sm:$0xff]  }
 0x272   :  { %6086 = vmatprep.subr.bf16.mxu1 %v6530_v36 }
 0x273   :  { %6119 = vmatpush3.bf16.msra.mxu0 %v6427_v48  ;;  %v6430_v48 = vld [vmem:[%s8882_s3 + $0x1c8] sm:$0xff]  }
 0x274   :  { %6144 = vmatprep.subr.bf16.mxu0 %v6530_v36 }
 0x275   :  { %6087 = vmatpush3.bf16.msra.mxu1 %v6414_v49  ;;  %v3509_v49 = vld [vmem:[#allocation5 + $0x20] sm:$0xf] }
 0x276   :  { %6088 = vmatprep.subr.bf16.mxu1 %v6530_v36  ;;  %6121 = vmatmul.mubr.bf16.vlgmr.msra.gmra.mrb[40].mxu0 %v3292_v50  ;;  %v6445_v50 = vld [vmem:[%s8882_s3 + $0x280] sm:$0xff]  }
 0x277   :  { %6145 = vmatpush3.bf16.msra.mxu0 %v6429_v51  ;;  %6160 = vmatprep.mubr.msk.bf16.mxu0 %vm6531_vm0, %v6530_v36  ;;  %v6432_v51 = vld [vmem:[%s8882_s3 + $0x1d0] sm:$0xff]  }
 0x278   :  { %6146 = vmatprep.subr.bf16.mxu0 %v6530_v36 }
 0x279   :  { %6089 = vmatpush3.bf16.msra.mxu1 %v6416_v52  ;;  %v6447_v52 = vld [vmem:[%s8882_s3 + $0x288] sm:$0xff]  }
 0x27a   :  { %6090 = vmatprep.subr.bf16.mxu1 %v6530_v36 }
 0x27b   :  { %6147 = vmatpush3.bf16.msra.mxu0 %v6431_v54  ;;  %v6434_v54 = vld [vmem:[%s8882_s3 + $0x1d8] sm:$0xff]  }
 0x27c   :  { %6148 = vmatprep.subr.bf16.mxu0 %v6530_v36 }
 0x27d   :  { %6091 = vmatpush3.bf16.msra.mxu1 %v6418_v55  ;;  %v6449_v55 = vld [vmem:[%s8882_s3 + $0x290] sm:$0xff]  }
 0x27e   :  { %6092 = vmatprep.subr.bf16.mxu1 %v6530_v36 }
 0x27f   :  { %6149 = vmatpush3.bf16.msra.mxu0 %v6433_v56  ;;  %v6436_v56 = vld [vmem:[%s8882_s3 + $0x1e0] sm:$0xff]  }
 0x280   :  { %6150 = vmatprep.subr.bf16.mxu0 %v6530_v36 }
 0x281   :  { %6093 = vmatpush3.bf16.msra.mxu1 %v6420_v57  ;;  %v6451_v57 = vld [vmem:[%s8882_s3 + $0x298] sm:$0xff]  }
 0x282   :  { %6094 = vmatprep.subr.bf16.mxu1 %v6530_v36 }
 0x283   :  { %6151 = vmatpush3.bf16.msra.mxu0 %v6435_v60  ;;  %v6440_v60 = vld [vmem:[%s8882_s3 + $0x1f0] sm:$0xff]  }
 0x284   :  { %6152 = vmatprep.subr.bf16.mxu0 %v6530_v36 }
 0x285   :  { %6095 = vmatpush3.bf16.msra.mxu1 %v6422_v0  ;;  %v6457_v0 = vld [vmem:[%s8882_s3 + $0x2b0] sm:$0xff]  }
 0x286   :  { %6096 = vmatprep.subr.bf16.mxu1 %v6530_v36 }
 0x287   :  { %6153 = vmatpush3.bf16.msra.mxu0 %v6437_v35  ;;  %v6459_v35 = vld [vmem:[%s8882_s3 + $0x2b8] sm:$0xff]  }
 0x288   :  { %6154 = vmatprep.subr.bf16.mxu0 %v6530_v36 }
 0x289   :  { %6097 = vmatpush3.bf16.msra.mxu1 %v6424_v39  ;;  %v6461_v39 = vld [vmem:[%s8882_s3 + $0x300] sm:$0xff]  }
 0x28a   :  { %6098 = vmatprep.subr.bf16.mxu1 %v6530_v36 }
 0x28b   :  { %6155 = vmatpush3.bf16.msra.mxu0 %v6439_v41  ;;  %v6463_v41 = vld [vmem:[%s8882_s3 + $0x308] sm:$0xff]  }
 0x28c   :  { %6156 = vmatprep.subr.bf16.mxu0 %v6530_v36 }
 0x28d   :  { %6099 = vmatpush3.bf16.msra.mxu1 %v6426_v53  ;;  %v6465_v53 = vld [vmem:[%s8882_s3 + $0x310] sm:$0xff]  }
 0x28e   :  { %6124 = vmatprep.subr.bf16.mxu1 %v6530_v36 }
 0x28f   :  { %6157 = vmatpush3.bf16.msra.mxu0 %v6441_v44  ;;  %v6467_v44 = vld [vmem:[%s8882_s3 + $0x318] sm:$0xff]  }
 0x290   :  { %6101 = vmatmul.mubr.bf16.vlgmr.msra.gmra.mrb[12].mxu1 %v3201_v46  ;;  %6158 = vmatprep.subr.bf16.mxu0 %v6530_v36  ;;  %v6469_v46 = vld [vmem:[%s8882_s3 + $0x320] sm:$0xff]  }
 0x291   :  { %6125 = vmatpush3.bf16.msra.mxu1 %v6428_v45  ;;  %6140 = vmatprep.mubr.msk.bf16.mxu1 %vm6531_vm0, %v6530_v36  ;;  %v6454_v45 = vld [vmem:[%s8882_s3 + $0x268] sm:$0xff]  }
 0x292   :  { %6126 = vmatprep.subr.bf16.mxu1 %v6530_v36 }
 0x293   :  { %6159 = vmatpush3.bf16.msra.mxu0 %v6443_v47  ;;  %v6456_v47 = vld [vmem:[%s8882_s3 + $0x270] sm:$0xff]  }
 0x294   :  { %6184 = vmatprep.subr.bf16.mxu0 %v6530_v36 }
 0x295   :  { %6127 = vmatpush3.bf16.msra.mxu1 %v6430_v48  ;;  %v6471_v48 = vld [vmem:[%s8882_s3 + $0x328] sm:$0xff]  }
 0x296   :  { %6128 = vmatprep.subr.bf16.mxu1 %v6530_v36  ;;  %6161 = vmatmul.mubr.bf16.vlgmr.msra.gmra.mrb[44].mxu0 %v3509_v49  ;;  %v6458_v49 = vld [vmem:[%s8882_s3 + $0x278] sm:$0xff]  }
 0x297   :  { %6185 = vmatpush3.bf16.msra.mxu0 %v6445_v50  ;;  %6200 = vmatprep.mubr.msk.bf16.mxu0 %vm6531_vm0, %v6530_v36  ;;  %v3616_v50 = vld [vmem:[#allocation5 + $0x20] sm:$0xf0] }
 0x298   :  { %6186 = vmatprep.subr.bf16.mxu0 %v6530_v36 }
 0x299   :  { %6129 = vmatpush3.bf16.msra.mxu1 %v6432_v51  ;;  %v6473_v51 = vld [vmem:[%s8882_s3 + $0x330] sm:$0xff]  }
 0x29a   :  { %6130 = vmatprep.subr.bf16.mxu1 %v6530_v36 }
 0x29b   :  { %6187 = vmatpush3.bf16.msra.mxu0 %v6447_v52  ;;  %v6460_v52 = vld [vmem:[%s8882_s3 + $0x2c0] sm:$0xff]  }
 0x29c   :  { %6188 = vmatprep.subr.bf16.mxu0 %v6530_v36 }
 0x29d   :  { %6131 = vmatpush3.bf16.msra.mxu1 %v6434_v54  ;;  %v3635_v54 = vrot.slane %v3616_v50, 4 }
 0x29e   :  { %6132 = vmatprep.subr.bf16.mxu1 %v6530_v36 }
 0x29f   :  { %6189 = vmatpush3.bf16.msra.mxu0 %v6449_v55  ;;  %v6475_v55 = vld [vmem:[%s8882_s3 + $0x338] sm:$0xff]  }
 0x2a0   :  { %6190 = vmatprep.subr.bf16.mxu0 %v6530_v36 }
 0x2a1   :  { %6133 = vmatpush3.bf16.msra.mxu1 %v6436_v56  ;;  %v6462_v56 = vld [vmem:[%s8882_s3 + $0x2c8] sm:$0xff]  }
 0x2a2   :  { %6134 = vmatprep.subr.bf16.mxu1 %v6530_v36 }
 0x2a3   :  { %6191 = vmatpush3.bf16.msra.mxu0 %v6451_v57  ;;  %v3943_v57 = vld [vmem:[#allocation5 + $0x30] sm:$0xf] }
 0x2a4   :  { %6192 = vmatprep.subr.bf16.mxu0 %v6530_v36 }
 0x2a5   :  { %6135 = vmatpush3.bf16.msra.mxu1 %v6438_v58  ;;  %v6477_v58 = vld [vmem:[%s8882_s3 + $0x380] sm:$0xff]  }
 0x2a6   :  { %6136 = vmatprep.subr.bf16.mxu1 %v6530_v36 }
 0x2a7   :  { %6193 = vmatpush3.bf16.msra.mxu0 %v6453_v59  ;;  %v6464_v59 = vld [vmem:[%s8882_s3 + $0x2d0] sm:$0xff]  }
 0x2a8   :  { %6194 = vmatprep.subr.bf16.mxu0 %v6530_v36 }
 0x2a9   :  { %6137 = vmatpush3.bf16.msra.mxu1 %v6440_v60  ;;  %v6479_v60 = vld [vmem:[%s8882_s3 + $0x388] sm:$0xff]  }
 0x2aa   :  { %6138 = vmatprep.subr.bf16.mxu1 %v6530_v36 }
 0x2ab   :  { %6195 = vmatpush3.bf16.msra.mxu0 %v6455_v61  ;;  %v6466_v61 = vld [vmem:[%s8882_s3 + $0x2d8] sm:$0xff]  }
 0x2ac   :  { %6196 = vmatprep.subr.bf16.mxu0 %v6530_v36 }
 0x2ad   :  { %6139 = vmatpush3.bf16.msra.mxu1 %v6442_v62  ;;  %v6481_v62 = vld [vmem:[%s8882_s3 + $0x390] sm:$0xff]  }
 0x2ae   :  { %6164 = vmatprep.subr.bf16.mxu1 %v6530_v36 }
 0x2af   :  { %6197 = vmatpush3.bf16.msra.mxu0 %v6457_v0  ;;  %v6483_v0 = vld [vmem:[%s8882_s3 + $0x398] sm:$0xff]  }
 0x2b0   :  { %6141 = vmatmul.mubr.bf16.vlgmr.msra.gmra.mrb[16].mxu1 %v3418_v34  ;;  %6198 = vmatprep.subr.bf16.mxu0 %v6530_v36  ;;  %v6485_v34 = vld [vmem:[%s8882_s3 + $0x3a0] sm:$0xff]  }
 0x2b1   :  { %6165 = vmatpush3.bf16.msra.mxu1 %v6444_v1  ;;  %6180 = vmatprep.mubr.msk.bf16.mxu1 %vm6531_vm0, %v6530_v36  ;;  %v6470_v1 = vld [vmem:[%s8882_s3 + $0x2e8] sm:$0xff]  }
 0x2b2   :  { %6166 = vmatprep.subr.bf16.mxu1 %v6530_v36 }
 0x2b3   :  { %6199 = vmatpush3.bf16.msra.mxu0 %v6459_v35  ;;  %v6472_v35 = vld [vmem:[%s8882_s3 + $0x2f0] sm:$0xff]  }
 0x2b4   :  { %6224 = vmatprep.subr.bf16.mxu0 %v6530_v36 }
 0x2b5   :  { %6167 = vmatpush3.bf16.msra.mxu1 %v6446_v37  ;;  %v6487_v37 = vld [vmem:[%s8882_s3 + $0x3a8] sm:$0xff]  }
 0x2b6   :  { %6168 = vmatprep.subr.bf16.mxu1 %v6530_v36  ;;  %6201 = vmatmul.mubr.bf16.vlgmr.msra.gmra.mrb[48].mxu0 %v3726_v38  ;;  %v6474_v38 = vld [vmem:[%s8882_s3 + $0x2f8] sm:$0xff]  }
 0x2b7   :  { %6225 = vmatpush3.bf16.msra.mxu0 %v6461_v39  ;;  %6240 = vmatprep.mubr.msk.bf16.mxu0 %vm6531_vm0, %v6530_v36  ;;  %v3833_v39 = vld [vmem:[#allocation5 + $0x28] sm:$0xf0] }
 0x2b8   :  { %6226 = vmatprep.subr.bf16.mxu0 %v6530_v36 }
 0x2b9   :  { %6169 = vmatpush3.bf16.msra.mxu1 %v6448_v40  ;;  %v6489_v40 = vld [vmem:[%s8882_s3 + $0x3b0] sm:$0xff]  }
 0x2ba   :  { %6170 = vmatprep.subr.bf16.mxu1 %v6530_v36 }
 0x2bb   :  { %6227 = vmatpush3.bf16.msra.mxu0 %v6463_v41  ;;  %v6476_v41 = vld [vmem:[%s8882_s3 + $0x340] sm:$0xff]  }
 0x2bc   :  { %6228 = vmatprep.subr.bf16.mxu0 %v6530_v36 }
 0x2bd   :  { %6171 = vmatpush3.bf16.msra.mxu1 %v6450_v42  ;;  %v3852_v42 = vrot.slane %v3833_v39, 4 }
 0x2be   :  { %6172 = vmatprep.subr.bf16.mxu1 %v6530_v36 }
 0x2bf   :  { %6229 = vmatpush3.bf16.msra.mxu0 %v6465_v53  ;;  %v6491_v53 = vld [vmem:[%s8882_s3 + $0x3b8] sm:$0xff]  }
 0x2c0   :  { %6230 = vmatprep.subr.bf16.mxu0 %v6530_v36 }
 0x2c1   :  { %6173 = vmatpush3.bf16.msra.mxu1 %v6452_v43  ;;  %v6478_v43 = vld [vmem:[%s8882_s3 + $0x348] sm:$0xff]  }
 0x2c2   :  { %6174 = vmatprep.subr.bf16.mxu1 %v6530_v36 }
 0x2c3   :  { %6231 = vmatpush3.bf16.msra.mxu0 %v6467_v44  ;;  %v4160_v44 = vld [vmem:[#allocation5 + $0x38] sm:$0xf] }
 0x2c4   :  { %6232 = vmatprep.subr.bf16.mxu0 %v6530_v36 }
 0x2c5   :  { %6175 = vmatpush3.bf16.msra.mxu1 %v6454_v45  ;;  %v6480_v45 = vld [vmem:[%s8882_s3 + $0x350] sm:$0xff]  }
 0x2c6   :  { %6176 = vmatprep.subr.bf16.mxu1 %v6530_v36 }
 0x2c7   :  { %6233 = vmatpush3.bf16.msra.mxu0 %v6469_v46  ;;  %v6482_v46 = vld [vmem:[%s8882_s3 + $0x358] sm:$0xff]  }
 0x2c8   :  { %6234 = vmatprep.subr.bf16.mxu0 %v6530_v36 }
 0x2c9   :  { %6177 = vmatpush3.bf16.msra.mxu1 %v6456_v47  ;;  %v6484_v47 = vld [vmem:[%s8882_s3 + $0x360] sm:$0xff]  }
 0x2ca   :  { %6178 = vmatprep.subr.bf16.mxu1 %v6530_v36 }
 0x2cb   :  { %6235 = vmatpush3.bf16.msra.mxu0 %v6471_v48  ;;  %v6486_v48 = vld [vmem:[%s8882_s3 + $0x368] sm:$0xff]  }
 0x2cc   :  { %6236 = vmatprep.subr.bf16.mxu0 %v6530_v36 }
 0x2cd   :  { %6179 = vmatpush3.bf16.msra.mxu1 %v6458_v49 }
 0x2ce   :  { %6204 = vmatprep.subr.bf16.mxu1 %v6530_v36 }
 0x2cf   :  { %6237 = vmatpush3.bf16.msra.mxu0 %v6473_v51 }
 0x2d0   :  { %6181 = vmatmul.mubr.bf16.vlgmr.msra.gmra.mrb[20].mxu1 %v3635_v54  ;;  %6238 = vmatprep.subr.bf16.mxu0 %v6530_v36 }
 0x2d1   :  { %6205 = vmatpush3.bf16.msra.mxu1 %v6460_v52  ;;  %6220 = vmatprep.mubr.msk.bf16.mxu1 %vm6531_vm0, %v6530_v36  ;;  %v6488_v52 = vld [vmem:[%s8882_s3 + $0x370] sm:$0xff]  }
 0x2d2   :  { %6206 = vmatprep.subr.bf16.mxu1 %v6530_v36 }
 0x2d3   :  { %6239 = vmatpush3.bf16.msra.mxu0 %v6475_v55  ;;  %v6490_v55 = vld [vmem:[%s8882_s3 + $0x378] sm:$0xff]  }
 0x2d4   :  { %6264 = vmatprep.subr.bf16.mxu0 %v6530_v36 }
 0x2d5   :  { %6207 = vmatpush3.bf16.msra.mxu1 %v6462_v56 }
 0x2d6   :  { %6208 = vmatprep.subr.bf16.mxu1 %v6530_v36  ;;  %6241 = vmatmul.mubr.bf16.vlgmr.msra.gmra.mrb[52].mxu0 %v3943_v57 }
 0x2d7   :  { %6265 = vmatpush3.bf16.msra.mxu0 %v6477_v58  ;;  %6280 = vmatprep.mubr.msk.bf16.mxu0 %vm6531_vm0, %v6530_v36  ;;  %v4050_v58 = vld [vmem:[#allocation5 + $0x30] sm:$0xf0] }
 0x2d8   :  { %6266 = vmatprep.subr.bf16.mxu0 %v6530_v36 }
 0x2d9   :  { %6209 = vmatpush3.bf16.msra.mxu1 %v6464_v59 }
 0x2da   :  { %6210 = vmatprep.subr.bf16.mxu1 %v6530_v36 }
 0x2db   :  { %6267 = vmatpush3.bf16.msra.mxu0 %v6479_v60 }
 0x2dc   :  { %6268 = vmatprep.subr.bf16.mxu0 %v6530_v36 }
 0x2dd   :  { %6211 = vmatpush3.bf16.msra.mxu1 %v6466_v61  ;;  %v6492_v61 = vld [vmem:[%s8882_s3 + $0x3c0] sm:$0xff]  }
 0x2de   :  { %6212 = vmatprep.subr.bf16.mxu1 %v6530_v36 }
 0x2df   :  { %6269 = vmatpush3.bf16.msra.mxu0 %v6481_v62  ;;  %v4069_v62 = vrot.slane %v4050_v58, 4 }
 0x2e0   :  { %6270 = vmatprep.subr.bf16.mxu0 %v6530_v36 }
 0x2e1   :  { %6213 = vmatpush3.bf16.msra.mxu1 %v6468_v63  ;;  %v6493_v63 = vld [vmem:[%s8882_s3 + $0x3c8] sm:$0xff]  }
 0x2e2   :  { %6214 = vmatprep.subr.bf16.mxu1 %v6530_v36 }
 0x2e3   :  { %6271 = vmatpush3.bf16.msra.mxu0 %v6483_v0  ;;  %v6494_v0 = vld [vmem:[%s8882_s3 + $0x3d0] sm:$0xff]  }
 0x2e4   :  { %6272 = vmatprep.subr.bf16.mxu0 %v6530_v36 }
 0x2e5   :  { %6215 = vmatpush3.bf16.msra.mxu1 %v6470_v1  ;;  %v6495_v1 = vld [vmem:[%s8882_s3 + $0x3d8] sm:$0xff]  }
 0x2e6   :  { %6216 = vmatprep.subr.bf16.mxu1 %v6530_v36 }
 0x2e7   :  { %6273 = vmatpush3.bf16.msra.mxu0 %v6485_v34  ;;  %v6496_v34 = vld [vmem:[%s8882_s3 + $0x3e0] sm:$0xff]  }
 0x2e8   :  { %6274 = vmatprep.subr.bf16.mxu0 %v6530_v36 }
 0x2e9   :  { %6217 = vmatpush3.bf16.msra.mxu1 %v6472_v35  ;;  %v6497_v35 = vld [vmem:[%s8882_s3 + $0x3e8] sm:$0xff]  }
 0x2ea   :  { %6218 = vmatprep.subr.bf16.mxu1 %v6530_v36 }
 0x2eb   :  { %6275 = vmatpush3.bf16.msra.mxu0 %v6487_v37 }
 0x2ec   :  { %6276 = vmatprep.subr.bf16.mxu0 %v6530_v36 }
 0x2ed   :  { %6219 = vmatpush3.bf16.msra.mxu1 %v6474_v38 }
 0x2ee   :  { %6244 = vmatprep.subr.bf16.mxu1 %v6530_v36 }
 0x2ef   :  { %6277 = vmatpush3.bf16.msra.mxu0 %v6489_v40 }
 0x2f0   :  { %6221 = vmatmul.mubr.bf16.vlgmr.msra.gmra.mrb[24].mxu1 %v3852_v42  ;;  %6278 = vmatprep.subr.bf16.mxu0 %v6530_v36 }
 0x2f1   :  { %6245 = vmatpush3.bf16.msra.mxu1 %v6476_v41  ;;  %6260 = vmatprep.mubr.msk.bf16.mxu1 %vm6531_vm0, %v6530_v36  ;;  %v6498_v41 = vld [vmem:[%s8882_s3 + $0x3f0] sm:$0xff]  }
 0x2f2   :  { %6246 = vmatprep.subr.bf16.mxu1 %v6530_v36 }
 0x2f3   :  { %6279 = vmatpush3.bf16.msra.mxu0 %v6491_v53 }
 0x2f5   :  { %6247 = vmatpush3.bf16.msra.mxu1 %v6478_v43  ;;  %v6499_v43 = vld [vmem:[%s8882_s3 + $0x3f8] sm:$0xff]  }
 0x2f6   :  { %6248 = vmatprep.subr.bf16.mxu1 %v6530_v36  ;;  %6281 = vmatmul.mubr.bf16.vlgmr.msra.gmra.mrb[56].mxu0 %v4160_v44 }
 0x2f9   :  { %6249 = vmatpush3.bf16.msra.mxu1 %v6480_v45 }
 0x2fa   :  { %6250 = vmatprep.subr.bf16.mxu1 %v6530_v36 }
 0x2fd   :  { %6251 = vmatpush3.bf16.msra.mxu1 %v6482_v46  ;;  %v4267_v46 = vld [vmem:[#allocation5 + $0x38] sm:$0xf0] }
 0x2fe   :  { %6252 = vmatprep.subr.bf16.mxu1 %v6530_v36 }
 0x301   :  { %6253 = vmatpush3.bf16.msra.mxu1 %v6484_v47 }
 0x302   :  { %6254 = vmatprep.subr.bf16.mxu1 %v6530_v36 }
 0x303   :  { %v2764_v49 = vpop.f32.mrb[0].mxu1 }
 0x304   :  { %v6002_v50 = vpop.f32.mrb[1].mxu1 }
 0x305   :  { %6255 = vmatpush3.bf16.msra.mxu1 %v6486_v48  ;;  %v2767_v51 = vpop.f32.mrb[2].mxu1 }
 0x306   :  { %v6003_v54 = vpop.f32.mrb[3].mxu1  ;;  %6256 = vmatprep.subr.bf16.mxu1 %v6530_v36 }
 0x309   :  { %6257 = vmatpush3.bf16.msra.mxu1 %v6488_v52  ;;  %v2958_v56 = vpop.f32.mrb[32].mxu0 }
 0x30a   :  { %6258 = vmatprep.subr.bf16.mxu1 %v6530_v36  ;;  %v6042_v57 = vpop.f32.mrb[33].mxu0 }
 0x30b   :  { %v2961_v59 = vpop.f32.mrb[34].mxu0 }
 0x30c   :  { %v6043_v60 = vpop.f32.mrb[35].mxu0 }
 0x30d   :  { %6259 = vmatpush3.bf16.msra.mxu1 %v6490_v55 }
 0x30e   :  { %6284 = vmatprep.subr.bf16.mxu1 %v6530_v36 }
 0x310   :  { %6261 = vmatmul.mubr.bf16.vlgmr.msra.gmra.mrb[28].mxu1 %v4069_v62 }
 0x311   :  { %6285 = vmatpush3.bf16.msra.mxu1 %v6492_v61  ;;  %6300 = vmatprep.mubr.msk.bf16.mxu1 %vm6531_vm0, %v6530_v36 }
 0x312   :  { %6286 = vmatprep.subr.bf16.mxu1 %v6530_v36 }
 0x315   :  { %6287 = vmatpush3.bf16.msra.mxu1 %v6493_v63 }
 0x316   :  { %6288 = vmatprep.subr.bf16.mxu1 %v6530_v36 }
 0x319   :  { %6289 = vmatpush3.bf16.msra.mxu1 %v6494_v0 }
 0x31a   :  { %6290 = vmatprep.subr.bf16.mxu1 %v6530_v36 }
 0x31d   :  { %6291 = vmatpush3.bf16.msra.mxu1 %v6495_v1 }
 0x31e   :  { %6292 = vmatprep.subr.bf16.mxu1 %v6530_v36 }
 0x321   :  { %6293 = vmatpush3.bf16.msra.mxu1 %v6496_v34 }
 0x322   :  { %6294 = vmatprep.subr.bf16.mxu1 %v6530_v36 }
 0x323   :  { %v2852_v37 = vpop.f32.mrb[4].mxu1 }
 0x324   :  { %v2853_v38 = vadd.f32 %v2852_v37, %v2764_v49  ;;  %v6022_v39 = vpop.f32.mrb[5].mxu1  ;;  %v4286_v49 = vrot.slane %v4267_v46, 4 }
 0x325   :  { %v2855_v40 = vpop.f32.mrb[6].mxu1  ;;  %6295 = vmatpush3.bf16.msra.mxu1 %v6497_v35 }
 0x326   :  { %v2964_v42 = vadd.f32 %v2958_v56, %v2853_v38  ;;  %v6023_v53 = vpop.f32.mrb[7].mxu1  ;;  %6296 = vmatprep.subr.bf16.mxu1 %v6530_v36 }
 0x329   :  { %6297 = vmatpush3.bf16.msra.mxu1 %v6498_v41  ;;  %v3175_v44 = vpop.f32.mrb[36].mxu0 }
 0x32a   :  { %6298 = vmatprep.subr.bf16.mxu1 %v6530_v36  ;;  %v6082_v45 = vpop.f32.mrb[37].mxu0 }
 0x32b   :  { %v3178_v47 = vpop.f32.mrb[38].mxu0 }
 0x32c   :  { %v6083_v48 = vpop.f32.mrb[39].mxu0 }
 0x32d   :  { %6299 = vmatpush3.bf16.msra.mxu1 %v6499_v43 }
 0x330   :  { %6301 = vmatmul.mubr.bf16.vlgmr.msra.gmra.mrb[32].mxu1 %v4286_v49 }
 0x343   :  { %v3068_v50 = vpop.f32.mrb[8].mxu1 }
 0x344   :  { %v3074_v51 = vadd.f32 %v3068_v50, %v2964_v42  ;;  %v6062_v52 = vpop.f32.mrb[9].mxu1 }
 0x345   :  { %v3071_v54 = vpop.f32.mrb[10].mxu1 }
 0x346   :  { %v3181_v55 = vadd.f32 %v3175_v44, %v3074_v51  ;;  %v6063_v56 = vpop.f32.mrb[11].mxu1 }
 0x349   :  { %v3392_v57 = vpop.f32.mrb[40].mxu0 }
 0x34a   :  { %v6122_v58 = vpop.f32.mrb[41].mxu0 }
 0x34b   :  { %v3395_v59 = vpop.f32.mrb[42].mxu0 }
 0x34c   :  { %v6123_v60 = vpop.f32.mrb[43].mxu0 }
 0x363   :  { %v3285_v61 = vpop.f32.mrb[12].mxu1 }
 0x364   :  { %v3291_v62 = vadd.f32 %v3285_v61, %v3181_v55  ;;  %v6102_v36 = vpop.f32.mrb[13].mxu1 }
 0x365   :  { %v3288_v63 = vpop.f32.mrb[14].mxu1 }
 0x366   :  { %v3398_v0 = vadd.f32 %v3392_v57, %v3291_v62  ;;  %v6103_v1 = vpop.f32.mrb[15].mxu1 }
 0x369   :  { %v3609_v34 = vpop.f32.mrb[44].mxu0 }
 0x36a   :  { %v6162_v35 = vpop.f32.mrb[45].mxu0 }
 0x36b   :  { %v3612_v37 = vpop.f32.mrb[46].mxu0 }
 0x36c   :  { %v6163_v38 = vpop.f32.mrb[47].mxu0 }
 0x383   :  { %v3502_v39 = vpop.f32.mrb[16].mxu1 }
 0x384   :  { %v3508_v40 = vadd.f32 %v3502_v39, %v3398_v0  ;;  %v6142_v41 = vpop.f32.mrb[17].mxu1 }
 0x385   :  { %v3505_v42 = vpop.f32.mrb[18].mxu1 }
 0x386   :  { %v3615_v53 = vadd.f32 %v3609_v34, %v3508_v40  ;;  %v6143_v43 = vpop.f32.mrb[19].mxu1 }
 0x387   :  { %v5722_v43 = vld [vmem:[%s8883_s4] ss:$0 sm:$0xff] }
 0x389   :  { %v3826_v44 = vpop.f32.mrb[48].mxu0 }
 0x38a   :  { %v6202_v45 = vpop.f32.mrb[49].mxu0 }
 0x38b   :  { %v3829_v46 = vpop.f32.mrb[50].mxu0 }
 0x38c   :  { %v6203_v47 = vpop.f32.mrb[51].mxu0 }
 0x3a3   :  { %v3719_v48 = vpop.f32.mrb[20].mxu1 }
 0x3a4   :  { %v3725_v49 = vadd.f32 %v3719_v48, %v3615_v53  ;;  %v6182_v50 = vpop.f32.mrb[21].mxu1 }
 0x3a5   :  { %v3722_v51 = vpop.f32.mrb[22].mxu1  ;;  %v6532_v50 = vmov 1966171168  }
 0x3a6   :  { %v3832_v52 = vadd.f32 %v3826_v44, %v3725_v49  ;;  %v6183_v54 = vpop.f32.mrb[23].mxu1  ;;  %v4419_v51 = vunpack.c.l.s4 %v6532_v50 }
 0x3a9   :  { %v4043_v55 = vpop.f32.mrb[52].mxu0 }
 0x3aa   :  { %v6242_v56 = vpop.f32.mrb[53].mxu0 }
 0x3ab   :  { %v4046_v57 = vpop.f32.mrb[54].mxu0 }
 0x3ac   :  { %v6243_v58 = vpop.f32.mrb[55].mxu0 }
 0x3c3   :  { %v3936_v59 = vpop.f32.mrb[24].mxu1 }
 0x3c4   :  { %v3942_v60 = vadd.f32 %v3936_v59, %v3832_v52  ;;  %v6222_v61 = vpop.f32.mrb[25].mxu1  ;;  %v4421_v52 = vlaneseq }
 0x3c5   :  { %v3939_v62 = vpop.f32.mrb[26].mxu1 }
 0x3c6   :  { %v4049_v36 = vadd.f32 %v4043_v55, %v3942_v60  ;;  %v6223_v63 = vpop.f32.mrb[27].mxu1  ;;  %v4420_v55 = vunpack.c.0.s8 %v4419_v51  ;;  %v8768_v56 = vshrl.u32 %v4421_v52, 7 }
 0x3c8   :  { %v8771_v57 = vsub.s32 %v4420_v55, %v8768_v56 }
 0x3c9   :  { %v4260_v0 = vpop.f32.mrb[56].mxu0 }
 0x3ca   :  { %v6282_v1 = vpop.f32.mrb[57].mxu0 }
 0x3cb   :  { %v4263_v34 = vpop.f32.mrb[58].mxu0 }
 0x3cc   :  { %v6283_v35 = vpop.f32.mrb[59].mxu0 }
 0x3e3   :  { %v4153_v37 = vpop.f32.mrb[28].mxu1 }
 0x3e4   :  { %v4159_v38 = vadd.f32 %v4153_v37, %v4049_v36  ;;  %v6262_v39 = vpop.f32.mrb[29].mxu1 }
 0x3e5   :  { %v4156_v40 = vpop.f32.mrb[30].mxu1 }
 0x3e6   :  { %v4266_v41 = vadd.f32 %v4260_v0, %v4159_v38  ;;  %v6263_v42 = vpop.f32.mrb[31].mxu1 }
 0x403   :  { %v4370_v53 = vpop.f32.mrb[32].mxu1 }
 0x404   :  { %v4376_v44 = vadd.f32 %v4370_v53, %v4266_v41  ;;  %v6302_v45 = vpop.f32.mrb[33].mxu1 }
 0x405   :  { %v4373_v46 = vpop.f32.mrb[34].mxu1 }
 0x406   :  { %v4384_v47 = vadd.f32 %v5722_v43, %v4376_v44  ;;  %v6303_v48 = vpop.f32.mrb[35].mxu1 }
 0x408   :  { %v4385_v49 = vmax.f32 %v4384_v47, 0.0 }
 0x40a   :  { %v4386_v54 = vpack.c.bf16 %v4385_v49, %v4385_v49 }
 0x40c   :  { %4387 = vst [vmem:[#allocation6] sm:$0xf] %v4386_v54 }
 0x413   :  { %v4388_v58 = vld [vmem:[#allocation6] sm:$0x1]  ;;  %v5723_v59 = vld.sshfl [vmem:[#allocation6] sm:$0x10 pattern:$0x75316420] }
 0x414   :  { %4389 = vst [vmem:[#allocation7] sm:$0x1] %v4388_v58  ;;  %v4399_v60 = vcombine.high %v5723_v59, %v5723_v59  ;;  %v5725_v61 = vld.sshfl [vmem:[#allocation6] sm:$0x2 pattern:$0x75316420] }
 0x415   :  { %v4424_v62 = vrot.slane %v5725_v61, %v8771_v57  ;;  %v5726_v36 = vld.sshfl [vmem:[#allocation6] sm:$0x20 pattern:$0x75316420] }
 0x416   :  { %5724 = vst.sshfl [vmem:[#allocation7 + $0x1] sm:$0x1 pattern:$0x73625140] %v4399_v60  ;;  %v4437_v63 = vcombine.high %v5726_v36, %v5726_v36 }
 0x417   :  { %v4425_v0 = vcombine.high %v4424_v62, %v4424_v62 }
 0x418   :  { %v4444_v1 = vrot.slane %v4437_v63, %v8771_v57 }
 0x419   :  { %4427 = vst [vmem:[#allocation7 + $0x2] sm:$0x1] %v4425_v0 }
 0x41a   :  { %v4445_v34 = vcombine.high %v4444_v1, %v4444_v1 }
 0x41c   :  { %4447 = vst [vmem:[#allocation7 + $0x3] sm:$0x1] %v4445_v34 }
 0x423   :  { %v8775_v35 = vld.sshfl [vmem:[#allocation7] sm:$0x33 pattern:$0x75316420] }
 0x424   :  { %6522 = dma.done.wait [#allocation8], 16384 }
 0x425   :  { %6523 = vsyncadd [#allocation8], 4294950912  ;;  %v4611_v37 = vcombine.high %v8775_v35, %v8775_v35  ;;  %v4454_v39 = vld [vmem:[#allocation2 + $0x8] sm:$0xff]  ;;  %v4456_v40 = vld [vmem:[#allocation2 + $0x18] sm:$0xff] }
 0x426   :  { %v4453_v41 = vld [vmem:[#allocation2] sm:$0xff]  ;;  %4632 = vmatprep.subr.bf16.mxu0 %v4454_v39  ;;  %4714 = vmatprep.subr.bf16.mxu1 %v4456_v40  ;;  %v4455_v42 = vld [vmem:[#allocation2 + $0x10] sm:$0xff]  ;;  %v4458_v53 = vld [vmem:[#allocation2 + $0x28] sm:$0xff] }
 0x427   :  { %v8780_v38 = vrot.slane %v4611_v37, %v8771_v57  ;;  %v4460_v43 = vld [vmem:[#allocation2 + $0x38] sm:$0xff]  ;;  %4633 = vmatpush1.bf16.msra.mxu0 %v4453_v41  ;;  %4715 = vmatpush1.bf16.msra.mxu1 %v4455_v42  ;;  %v4457_v44 = vld [vmem:[#allocation2 + $0x20] sm:$0xff]  ;;  %v4459_v45 = vld [vmem:[#allocation2 + $0x30] sm:$0xff] }
 0x428   :  { %4634 = vmatprep.subr.bf16.mxu0 %v4458_v53  ;;  %4716 = vmatprep.subr.bf16.mxu1 %v4460_v43  ;;  %v4462_v46 = vld [vmem:[#allocation2 + $0x48] sm:$0xff]  ;;  %v4464_v47 = vld [vmem:[#allocation2 + $0x58] sm:$0xff]  ;;  %v4461_v48 = vld [vmem:[#allocation2 + $0x40] sm:$0xff] }
 0x429   :  { %4664 = vmatprep.mubr.bf16.mxu0 %v8780_v38  ;;  %4746 = vmatprep.mubr.bf16.mxu1 %v8780_v38  ;;  %v4463_v49 = vld [vmem:[#allocation2 + $0x50] sm:$0xff]  ;;  %v4466_v50 = vld [vmem:[#allocation2 + $0x68] sm:$0xff]  ;;  %v4468_v51 = vld [vmem:[#allocation2 + $0x78] sm:$0xff] }
 0x42a   :  { %v4465_v52 = vld [vmem:[#allocation2 + $0x60] sm:$0xff]  ;;  %v4467_v54 = vld [vmem:[#allocation2 + $0x70] sm:$0xff]  ;;  %v4470_v55 = vld [vmem:[#allocation2 + $0x88] sm:$0xff] }
 0x42b   :  { %4635 = vmatpush1.bf16.msra.mxu0 %v4457_v44  ;;  %4717 = vmatpush1.bf16.msra.mxu1 %v4459_v45  ;;  %v4472_v58 = vld [vmem:[#allocation2 + $0x98] sm:$0xff]  ;;  %v4469_v59 = vld [vmem:[#allocation2 + $0x80] sm:$0xff]  ;;  %v4471_v60 = vld [vmem:[#allocation2 + $0x90] sm:$0xff] }
 0x42c   :  { %4636 = vmatprep.subr.bf16.mxu0 %v4462_v46  ;;  %4718 = vmatprep.subr.bf16.mxu1 %v4464_v47  ;;  %v4474_v61 = vld [vmem:[#allocation2 + $0xa8] sm:$0xff]  ;;  %v4476_v62 = vld [vmem:[#allocation2 + $0xb8] sm:$0xff]  ;;  %v4473_v36 = vld [vmem:[#allocation2 + $0xa0] sm:$0xff] }
 0x42d   :  { %v4475_v63 = vld [vmem:[#allocation2 + $0xb0] sm:$0xff]  ;;  %v4478_v0 = vld [vmem:[#allocation2 + $0xc8] sm:$0xff]  ;;  %v4480_v1 = vld [vmem:[#allocation2 + $0xd8] sm:$0xff] }
 0x42e   :  { %v4477_v34 = vld [vmem:[#allocation2 + $0xc0] sm:$0xff]  ;;  %v4479_v37 = vld [vmem:[#allocation2 + $0xd0] sm:$0xff]  ;;  %v4482_v39 = vld [vmem:[#allocation2 + $0xe8] sm:$0xff] }
 0x42f   :  { %4637 = vmatpush1.bf16.msra.mxu0 %v4461_v48  ;;  %4719 = vmatpush1.bf16.msra.mxu1 %v4463_v49  ;;  %v4484_v40 = vld [vmem:[#allocation2 + $0xf8] sm:$0xff]  ;;  %v4481_v41 = vld [vmem:[#allocation2 + $0xe0] sm:$0xff]  ;;  %v4483_v42 = vld [vmem:[#allocation2 + $0xf0] sm:$0xff] }
 0x430   :  { %4638 = vmatprep.subr.bf16.mxu0 %v4466_v50  ;;  %4720 = vmatprep.subr.bf16.mxu1 %v4468_v51  ;;  %v4486_v53 = vld [vmem:[#allocation2 + $0x108] sm:$0xff]  ;;  %v4488_v43 = vld [vmem:[#allocation2 + $0x118] sm:$0xff]  ;;  %v4485_v44 = vld [vmem:[#allocation2 + $0x100] sm:$0xff] }
 0x431   :  { %v4487_v45 = vld [vmem:[#allocation2 + $0x110] sm:$0xff]  ;;  %v4490_v46 = vld [vmem:[#allocation2 + $0x128] sm:$0xff]  ;;  %v4492_v47 = vld [vmem:[#allocation2 + $0x138] sm:$0xff] }
 0x432   :  { %v4489_v48 = vld [vmem:[#allocation2 + $0x120] sm:$0xff]  ;;  %v4491_v49 = vld [vmem:[#allocation2 + $0x130] sm:$0xff]  ;;  %v4494_v50 = vld [vmem:[#allocation2 + $0x148] sm:$0xff] }
 0x433   :  { %4639 = vmatpush1.bf16.msra.mxu0 %v4465_v52  ;;  %4721 = vmatpush1.bf16.msra.mxu1 %v4467_v54  ;;  %v4496_v51 = vld [vmem:[#allocation2 + $0x158] sm:$0xff]  ;;  %v4493_v52 = vld [vmem:[#allocation2 + $0x140] sm:$0xff]  ;;  %v4495_v54 = vld [vmem:[#allocation2 + $0x150] sm:$0xff] }
 0x434   :  { %4640 = vmatprep.subr.bf16.mxu0 %v4470_v55  ;;  %4722 = vmatprep.subr.bf16.mxu1 %v4472_v58  ;;  %v4498_v55 = vld [vmem:[#allocation2 + $0x168] sm:$0xff]  ;;  %v4500_v58 = vld [vmem:[#allocation2 + $0x178] sm:$0xff] }
 0x437   :  { %4641 = vmatpush1.bf16.msra.mxu0 %v4469_v59  ;;  %4723 = vmatpush1.bf16.msra.mxu1 %v4471_v60  ;;  %v4497_v59 = vld [vmem:[#allocation2 + $0x160] sm:$0xff]  ;;  %v4499_v60 = vld [vmem:[#allocation2 + $0x170] sm:$0xff] }
 0x438   :  { %4642 = vmatprep.subr.bf16.mxu0 %v4474_v61  ;;  %4724 = vmatprep.subr.bf16.mxu1 %v4476_v62  ;;  %v4502_v61 = vld [vmem:[#allocation2 + $0x188] sm:$0xff]  ;;  %v4504_v62 = vld [vmem:[#allocation2 + $0x198] sm:$0xff] }
 0x43b   :  { %4643 = vmatpush1.bf16.msra.mxu0 %v4473_v36  ;;  %4725 = vmatpush1.bf16.msra.mxu1 %v4475_v63  ;;  %v4501_v36 = vld [vmem:[#allocation2 + $0x180] sm:$0xff]  ;;  %v4503_v63 = vld [vmem:[#allocation2 + $0x190] sm:$0xff] }
 0x43c   :  { %4644 = vmatprep.subr.bf16.mxu0 %v4478_v0  ;;  %4726 = vmatprep.subr.bf16.mxu1 %v4480_v1  ;;  %v4506_v0 = vld [vmem:[#allocation2 + $0x1a8] sm:$0xff]  ;;  %v4508_v1 = vld [vmem:[#allocation2 + $0x1b8] sm:$0xff] }
 0x43f   :  { %4645 = vmatpush1.bf16.msra.mxu0 %v4477_v34  ;;  %4727 = vmatpush1.bf16.msra.mxu1 %v4479_v37  ;;  %v4505_v34 = vld [vmem:[#allocation2 + $0x1a0] sm:$0xff]  ;;  %v4507_v37 = vld [vmem:[#allocation2 + $0x1b0] sm:$0xff] }
 0x440   :  { %4646 = vmatprep.subr.bf16.mxu0 %v4482_v39  ;;  %4728 = vmatprep.subr.bf16.mxu1 %v4484_v40  ;;  %v4510_v39 = vld [vmem:[#allocation2 + $0x1c8] sm:$0xff]  ;;  %v4512_v40 = vld [vmem:[#allocation2 + $0x1d8] sm:$0xff] }
 0x443   :  { %4647 = vmatpush1.bf16.msra.mxu0 %v4481_v41  ;;  %4729 = vmatpush1.bf16.msra.mxu1 %v4483_v42  ;;  %v4509_v41 = vld [vmem:[#allocation2 + $0x1c0] sm:$0xff]  ;;  %v4511_v42 = vld [vmem:[#allocation2 + $0x1d0] sm:$0xff] }
 0x444   :  { %4648 = vmatprep.subr.bf16.mxu0 %v4486_v53  ;;  %4730 = vmatprep.subr.bf16.mxu1 %v4488_v43  ;;  %v4514_v53 = vld [vmem:[#allocation2 + $0x1e8] sm:$0xff]  ;;  %v4516_v43 = vld [vmem:[#allocation2 + $0x1f8] sm:$0xff] }
 0x447   :  { %4649 = vmatpush1.bf16.msra.mxu0 %v4485_v44  ;;  %4731 = vmatpush1.bf16.msra.mxu1 %v4487_v45  ;;  %v4513_v44 = vld [vmem:[#allocation2 + $0x1e0] sm:$0xff]  ;;  %v4515_v45 = vld [vmem:[#allocation2 + $0x1f0] sm:$0xff] }
 0x448   :  { %4650 = vmatprep.subr.bf16.mxu0 %v4490_v46  ;;  %4732 = vmatprep.subr.bf16.mxu1 %v4492_v47  ;;  %v4518_v46 = vld [vmem:[#allocation2 + $0x208] sm:$0xff]  ;;  %v4520_v47 = vld [vmem:[#allocation2 + $0x218] sm:$0xff] }
 0x44b   :  { %4651 = vmatpush1.bf16.msra.mxu0 %v4489_v48  ;;  %4733 = vmatpush1.bf16.msra.mxu1 %v4491_v49  ;;  %v8786_v48 = vrot.slane %v8775_v35, %v8771_v57  ;;  %v4517_v49 = vld [vmem:[#allocation2 + $0x200] sm:$0xff]  ;;  %v4523_v35 = vld [vmem:[#allocation2 + $0x230] sm:$0xff] }
 0x44c   :  { %4652 = vmatprep.subr.bf16.mxu0 %v4494_v50  ;;  %4734 = vmatprep.subr.bf16.mxu1 %v4496_v51  ;;  %v4519_v50 = vld [vmem:[#allocation2 + $0x210] sm:$0xff]  ;;  %v4522_v51 = vld [vmem:[#allocation2 + $0x228] sm:$0xff]  ;;  %v4521_v57 = vld [vmem:[#allocation2 + $0x220] sm:$0xff] }
 0x44f   :  { %4653 = vmatpush1.bf16.msra.mxu0 %v4493_v52  ;;  %4735 = vmatpush1.bf16.msra.mxu1 %v4495_v54  ;;  %v4524_v52 = vld [vmem:[#allocation2 + $0x238] sm:$0xff]  ;;  %v4627_v54 = vcombine.high %v8780_v38, %v8780_v38  ;;  %v4527_v38 = vld [vmem:[#allocation2 + $0x250] sm:$0xff] }
 0x450   :  { %4654 = vmatprep.subr.bf16.mxu0 %v4498_v55  ;;  %4736 = vmatprep.subr.bf16.mxu1 %v4500_v58  ;;  %v4526_v55 = vld [vmem:[#allocation2 + $0x248] sm:$0xff]  ;;  %v4528_v58 = vld [vmem:[#allocation2 + $0x258] sm:$0xff] }
 0x453   :  { %4655 = vmatpush1.bf16.msra.mxu0 %v4497_v59  ;;  %4737 = vmatpush1.bf16.msra.mxu1 %v4499_v60  ;;  %v4525_v59 = vld [vmem:[#allocation2 + $0x240] sm:$0xff]  ;;  %v4530_v60 = vld [vmem:[#allocation2 + $0x268] sm:$0xff] }
 0x454   :  { %4656 = vmatprep.subr.bf16.mxu0 %v4502_v61  ;;  %4738 = vmatprep.subr.bf16.mxu1 %v4504_v62  ;;  %v4532_v61 = vld [vmem:[#allocation2 + $0x278] sm:$0xff]  ;;  %v4529_v62 = vld [vmem:[#allocation2 + $0x260] sm:$0xff] }
 0x457   :  { %4657 = vmatpush1.bf16.msra.mxu0 %v4501_v36  ;;  %4739 = vmatpush1.bf16.msra.mxu1 %v4503_v63  ;;  %v4531_v36 = vld [vmem:[#allocation2 + $0x270] sm:$0xff]  ;;  %v4534_v63 = vld [vmem:[#allocation2 + $0x288] sm:$0xff] }
 0x458   :  { %4658 = vmatprep.subr.bf16.mxu0 %v4506_v0  ;;  %4740 = vmatprep.subr.bf16.mxu1 %v4508_v1  ;;  %v4536_v0 = vld [vmem:[#allocation2 + $0x298] sm:$0xff]  ;;  %v4533_v1 = vld [vmem:[#allocation2 + $0x280] sm:$0xff] }
 0x45b   :  { %4659 = vmatpush1.bf16.msra.mxu0 %v4505_v34  ;;  %4741 = vmatpush1.bf16.msra.mxu1 %v4507_v37  ;;  %v4535_v34 = vld [vmem:[#allocation2 + $0x290] sm:$0xff]  ;;  %v4538_v37 = vld [vmem:[#allocation2 + $0x2a8] sm:$0xff] }
 0x45c   :  { %4660 = vmatprep.subr.bf16.mxu0 %v4510_v39  ;;  %4742 = vmatprep.subr.bf16.mxu1 %v4512_v40  ;;  %v4540_v39 = vld [vmem:[#allocation2 + $0x2b8] sm:$0xff]  ;;  %v4537_v40 = vld [vmem:[#allocation2 + $0x2a0] sm:$0xff] }
 0x45f   :  { %4661 = vmatpush1.bf16.msra.mxu0 %v4509_v41  ;;  %4743 = vmatpush1.bf16.msra.mxu1 %v4511_v42  ;;  %v4539_v41 = vld [vmem:[#allocation2 + $0x2b0] sm:$0xff]  ;;  %v4542_v42 = vld [vmem:[#allocation2 + $0x2c8] sm:$0xff] }
 0x460   :  { %4662 = vmatprep.subr.bf16.mxu0 %v4514_v53  ;;  %4744 = vmatprep.subr.bf16.mxu1 %v4516_v43  ;;  %v4544_v53 = vld [vmem:[#allocation2 + $0x2d8] sm:$0xff]  ;;  %v4541_v43 = vld [vmem:[#allocation2 + $0x2c0] sm:$0xff] }
 0x463   :  { %4663 = vmatpush1.bf16.msra.mxu0 %v4513_v44  ;;  %4745 = vmatpush1.bf16.msra.mxu1 %v4515_v45  ;;  %v4543_v44 = vld [vmem:[#allocation2 + $0x2d0] sm:$0xff]  ;;  %v4546_v45 = vld [vmem:[#allocation2 + $0x2e8] sm:$0xff] }
 0x464   :  { %4673 = vmatprep.subr.bf16.mxu0 %v4518_v46  ;;  %4755 = vmatprep.subr.bf16.mxu1 %v4520_v47  ;;  %v4548_v46 = vld [vmem:[#allocation2 + $0x2f8] sm:$0xff]  ;;  %v4545_v47 = vld [vmem:[#allocation2 + $0x2e0] sm:$0xff] }
 0x466   :  { %4665 = vmatmul.mubr.bf16.vlgmr.msra.gmra.mrb[60].mxu0 %v8786_v48  ;;  %4747 = vmatmul.mubr.bf16.vlgmr.msra.gmra.mrb[36].mxu1 %v8786_v48 }
 0x467   :  { %4674 = vmatpush1.bf16.msra.mxu0 %v4517_v49  ;;  %4756 = vmatpush1.bf16.msra.mxu1 %v4519_v50  ;;  %v4547_v49 = vld [vmem:[#allocation2 + $0x2f0] sm:$0xff]  ;;  %v4550_v50 = vld [vmem:[#allocation2 + $0x308] sm:$0xff] }
 0x468   :  { %4675 = vmatprep.subr.bf16.mxu0 %v4522_v51  ;;  %4757 = vmatprep.subr.bf16.mxu1 %v4524_v52  ;;  %v4552_v51 = vld [vmem:[#allocation2 + $0x318] sm:$0xff]  ;;  %v4549_v52 = vld [vmem:[#allocation2 + $0x300] sm:$0xff] }
 0x469   :  { %4705 = vmatprep.mubr.bf16.mxu0 %v4627_v54  ;;  %4787 = vmatprep.mubr.bf16.mxu1 %v4627_v54  ;;  %v4551_v54 = vld [vmem:[#allocation2 + $0x310] sm:$0xff] }
 0x46b   :  { %4676 = vmatpush1.bf16.msra.mxu0 %v4521_v57  ;;  %4758 = vmatpush1.bf16.msra.mxu1 %v4523_v35  ;;  %v4554_v57 = vld [vmem:[#allocation2 + $0x328] sm:$0xff]  ;;  %v4556_v35 = vld [vmem:[#allocation2 + $0x338] sm:$0xff] }
 0x46c   :  { %4677 = vmatprep.subr.bf16.mxu0 %v4526_v55  ;;  %4759 = vmatprep.subr.bf16.mxu1 %v4528_v58  ;;  %v4553_v55 = vld [vmem:[#allocation2 + $0x320] sm:$0xff]  ;;  %v4555_v58 = vld [vmem:[#allocation2 + $0x330] sm:$0xff] }
 0x46f   :  { %4678 = vmatpush1.bf16.msra.mxu0 %v4525_v59  ;;  %4760 = vmatpush1.bf16.msra.mxu1 %v4527_v38  ;;  %v4558_v59 = vld [vmem:[#allocation2 + $0x348] sm:$0xff]  ;;  %v4560_v38 = vld [vmem:[#allocation2 + $0x358] sm:$0xff] }
 0x470   :  { %4679 = vmatprep.subr.bf16.mxu0 %v4530_v60  ;;  %4761 = vmatprep.subr.bf16.mxu1 %v4532_v61  ;;  %v4557_v60 = vld [vmem:[#allocation2 + $0x340] sm:$0xff]  ;;  %v4559_v61 = vld [vmem:[#allocation2 + $0x350] sm:$0xff] }
 0x473   :  { %4680 = vmatpush1.bf16.msra.mxu0 %v4529_v62  ;;  %4762 = vmatpush1.bf16.msra.mxu1 %v4531_v36  ;;  %v4562_v62 = vld [vmem:[#allocation2 + $0x368] sm:$0xff]  ;;  %v4564_v36 = vld [vmem:[#allocation2 + $0x378] sm:$0xff] }
 0x474   :  { %4681 = vmatprep.subr.bf16.mxu0 %v4534_v63  ;;  %4763 = vmatprep.subr.bf16.mxu1 %v4536_v0  ;;  %v4561_v63 = vld [vmem:[#allocation2 + $0x360] sm:$0xff]  ;;  %v4563_v0 = vld [vmem:[#allocation2 + $0x370] sm:$0xff] }
 0x477   :  { %4682 = vmatpush1.bf16.msra.mxu0 %v4533_v1  ;;  %4764 = vmatpush1.bf16.msra.mxu1 %v4535_v34  ;;  %v4566_v1 = vld [vmem:[#allocation2 + $0x388] sm:$0xff]  ;;  %v4568_v34 = vld [vmem:[#allocation2 + $0x398] sm:$0xff] }
 0x478   :  { %4683 = vmatprep.subr.bf16.mxu0 %v4538_v37  ;;  %4765 = vmatprep.subr.bf16.mxu1 %v4540_v39  ;;  %v4565_v37 = vld [vmem:[#allocation2 + $0x380] sm:$0xff]  ;;  %v4567_v39 = vld [vmem:[#allocation2 + $0x390] sm:$0xff] }
 0x47b   :  { %4684 = vmatpush1.bf16.msra.mxu0 %v4537_v40  ;;  %4766 = vmatpush1.bf16.msra.mxu1 %v4539_v41  ;;  %v4570_v40 = vld [vmem:[#allocation2 + $0x3a8] sm:$0xff]  ;;  %v4572_v41 = vld [vmem:[#allocation2 + $0x3b8] sm:$0xff] }
 0x47c   :  { %4685 = vmatprep.subr.bf16.mxu0 %v4542_v42  ;;  %4767 = vmatprep.subr.bf16.mxu1 %v4544_v53  ;;  %v4569_v42 = vld [vmem:[#allocation2 + $0x3a0] sm:$0xff]  ;;  %v4571_v53 = vld [vmem:[#allocation2 + $0x3b0] sm:$0xff] }
 0x47f   :  { %4686 = vmatpush1.bf16.msra.mxu0 %v4541_v43  ;;  %4768 = vmatpush1.bf16.msra.mxu1 %v4543_v44  ;;  %v4574_v43 = vld [vmem:[#allocation2 + $0x3c8] sm:$0xff]  ;;  %v4576_v44 = vld [vmem:[#allocation2 + $0x3d8] sm:$0xff] }
 0x480   :  { %4687 = vmatprep.subr.bf16.mxu0 %v4546_v45  ;;  %4769 = vmatprep.subr.bf16.mxu1 %v4548_v46  ;;  %v4573_v45 = vld [vmem:[#allocation2 + $0x3c0] sm:$0xff]  ;;  %v4575_v46 = vld [vmem:[#allocation2 + $0x3d0] sm:$0xff] }
 0x483   :  { %4688 = vmatpush1.bf16.msra.mxu0 %v4545_v47  ;;  %4770 = vmatpush1.bf16.msra.mxu1 %v4547_v49  ;;  %v4578_v47 = vld [vmem:[#allocation2 + $0x3e8] sm:$0xff]  ;;  %v4580_v49 = vld [vmem:[#allocation2 + $0x3f8] sm:$0xff] }
 0x484   :  { %4689 = vmatprep.subr.bf16.mxu0 %v4550_v50  ;;  %4771 = vmatprep.subr.bf16.mxu1 %v4552_v51  ;;  %v4577_v50 = vld [vmem:[#allocation2 + $0x3e0] sm:$0xff]  ;;  %v4579_v51 = vld [vmem:[#allocation2 + $0x3f0] sm:$0xff] }
 0x487   :  { %4690 = vmatpush1.bf16.msra.mxu0 %v4549_v52  ;;  %4772 = vmatpush1.bf16.msra.mxu1 %v4551_v54  ;;  %v4626_v52 = vcombine.high %v8786_v48, %v8786_v48  ;;  %v4585_v54 = vsub.s32 0, %v8768_v56 }
 0x488   :  { %4691 = vmatprep.subr.bf16.mxu0 %v4554_v57  ;;  %4773 = vmatprep.subr.bf16.mxu1 %v4556_v35  ;;  %v4593_v57 = vsub.s32 2, %v8768_v56  ;;  %v4581_v35 = vld [vmem:[%s8884_s5] sm:$0xf] }
 0x48a   :  { %v4594_v48 = vrot.slane %v4581_v35, %v4593_v57 }
 0x48b   :  { %4692 = vmatpush1.bf16.msra.mxu0 %v4553_v55  ;;  %4774 = vmatpush1.bf16.msra.mxu1 %v4555_v58  ;;  %v4589_v55 = vsub.s32 1, %v8768_v56  ;;  %v4597_v58 = vsub.s32 3, %v8768_v56 }
 0x48c   :  { %4693 = vmatprep.subr.bf16.mxu0 %v4558_v59  ;;  %4775 = vmatprep.subr.bf16.mxu1 %v4560_v38  ;;  %v4586_v59 = vrot.slane %v4581_v35, %v4585_v54 }
 0x48d   :  { %v4590_v38 = vrot.slane %v4581_v35, %v4589_v55 }
 0x48f   :  { %4694 = vmatpush1.bf16.msra.mxu0 %v4557_v60  ;;  %4776 = vmatpush1.bf16.msra.mxu1 %v4559_v61  ;;  %v4598_v60 = vrot.slane %v4581_v35, %v4597_v58 }
 0x490   :  { %4695 = vmatprep.subr.bf16.mxu0 %v4562_v62  ;;  %4777 = vmatprep.subr.bf16.mxu1 %v4564_v36 }
 0x493   :  { %4696 = vmatpush1.bf16.msra.mxu0 %v4561_v63  ;;  %4778 = vmatpush1.bf16.msra.mxu1 %v4563_v0 }
 0x494   :  { %4697 = vmatprep.subr.bf16.mxu0 %v4566_v1  ;;  %4779 = vmatprep.subr.bf16.mxu1 %v4568_v34 }
 0x497   :  { %4698 = vmatpush1.bf16.msra.mxu0 %v4565_v37  ;;  %4780 = vmatpush1.bf16.msra.mxu1 %v4567_v39 }
 0x498   :  { %4699 = vmatprep.subr.bf16.mxu0 %v4570_v40  ;;  %4781 = vmatprep.subr.bf16.mxu1 %v4572_v41 }
 0x49b   :  { %4700 = vmatpush1.bf16.msra.mxu0 %v4569_v42  ;;  %4782 = vmatpush1.bf16.msra.mxu1 %v4571_v53 }
 0x49c   :  { %4701 = vmatprep.subr.bf16.mxu0 %v4574_v43  ;;  %4783 = vmatprep.subr.bf16.mxu1 %v4576_v44 }
 0x49f   :  { %4702 = vmatpush1.bf16.msra.mxu0 %v4573_v45  ;;  %4784 = vmatpush1.bf16.msra.mxu1 %v4575_v46 }
 0x4a0   :  { %4703 = vmatprep.subr.bf16.mxu0 %v4578_v47  ;;  %4785 = vmatprep.subr.bf16.mxu1 %v4580_v49 }
 0x4a3   :  { %4704 = vmatpush1.bf16.msra.mxu0 %v4577_v50  ;;  %4786 = vmatpush1.bf16.msra.mxu1 %v4579_v51 }
 0x4a6   :  { %4706 = vmatmul.mubr.bf16.vlgmr.msra.gmra.mrb[60].mxu0 %v4626_v52  ;;  %4788 = vmatmul.mubr.bf16.vlgmr.msra.gmra.mrb[36].mxu1 %v4626_v52 }
 0x579   :  { %v4707_v61 = vpop.f32.mrb[60].mxu0  ;;  %v4789_v62 = vpop.f32.mrb[36].mxu1 }
 0x57a   :  { %v6304_v36 = vadd.f32 %v4707_v61, %v4586_v59  ;;  %v6306_v63 = vadd.f32 %v4789_v62, %v4594_v48  ;;  %v4709_v0 = vpop.f32.mrb[61].mxu0  ;;  %v4791_v1 = vpop.f32.mrb[37].mxu1 }
 0x57b   :  { %v6305_v34 = vadd.f32 %v4709_v0, %v4590_v38  ;;  %v6307_v37 = vadd.f32 %v4791_v1, %v4598_v60  ;;  %v4711_v39 = vpop.f32.mrb[62].mxu0  ;;  %v4793_v40 = vpop.f32.mrb[38].mxu1 }
 0x57c   :  { %v4796_v41 = vmax.f32 %v6304_v36, 0.0  ;;  %v4798_v42 = vmax.f32 %v6306_v63, 0.0  ;;  %v4712_v53 = vpop.f32.mrb[63].mxu0  ;;  %v4794_v43 = vpop.f32.mrb[39].mxu1 }
 0x57d   :  { %v4797_v44 = vmax.f32 %v6305_v34, 0.0  ;;  %v4799_v45 = vmax.f32 %v6307_v37, 0.0 }
 0x57e   :  { %v8809_v46 = vpack.c.bf16 %v4796_v41, %v4796_v41  ;;  %v8811_v47 = vpack.c.bf16 %v4798_v42, %v4798_v42 }
 0x57f   :  { %v4801_v49 = vpack.c.bf16 %v4797_v44, %v4797_v44  ;;  %v8813_v50 = vpack.c.bf16 %v4799_v45, %v4799_v45 }
 0x580   :  { %6524 = dma.done.wait [#allocation8 + $0x1], 16384 }
 0x581   :  { %6525 = vsyncadd [#allocation8 + $0x1], 4294950912  ;;  %4988 = vmatprep.mubr.bf16.mxu0 %v4801_v49  ;;  %5070 = vmatprep.mubr.bf16.mxu1 %v4801_v49  ;;  %v4807_v51 = vld [vmem:[#allocation3 + $0x8] sm:$0xff]  ;;  %v4809_v52 = vld [vmem:[#allocation3 + $0x18] sm:$0xff] }
 0x582   :  { %v4806_v35 = vld [vmem:[#allocation3] sm:$0xff]  ;;  %4956 = vmatprep.subr.bf16.mxu0 %v4807_v51  ;;  %5038 = vmatprep.subr.bf16.mxu1 %v4809_v52  ;;  %v4808_v59 = vld [vmem:[#allocation3 + $0x10] sm:$0xff]  ;;  %v4811_v48 = vld [vmem:[#allocation3 + $0x28] sm:$0xff] }
 0x583   :  { %v4813_v38 = vld [vmem:[#allocation3 + $0x38] sm:$0xff]  ;;  %4957 = vmatpush1.bf16.msra.mxu0 %v4806_v35  ;;  %5039 = vmatpush1.bf16.msra.mxu1 %v4808_v59  ;;  %v4810_v60 = vld [vmem:[#allocation3 + $0x20] sm:$0xff]  ;;  %v4812_v61 = vld [vmem:[#allocation3 + $0x30] sm:$0xff] }
 0x584   :  { %4958 = vmatprep.subr.bf16.mxu0 %v4811_v48  ;;  %5040 = vmatprep.subr.bf16.mxu1 %v4813_v38  ;;  %v4815_v62 = vld [vmem:[#allocation3 + $0x48] sm:$0xff]  ;;  %v4817_v36 = vld [vmem:[#allocation3 + $0x58] sm:$0xff]  ;;  %v4814_v63 = vld [vmem:[#allocation3 + $0x40] sm:$0xff] }
 0x585   :  { %v4816_v0 = vld [vmem:[#allocation3 + $0x50] sm:$0xff]  ;;  %v4819_v1 = vld [vmem:[#allocation3 + $0x68] sm:$0xff]  ;;  %v4821_v34 = vld [vmem:[#allocation3 + $0x78] sm:$0xff] }
 0x586   :  { %v4818_v37 = vld [vmem:[#allocation3 + $0x60] sm:$0xff]  ;;  %v4820_v39 = vld [vmem:[#allocation3 + $0x70] sm:$0xff]  ;;  %v4823_v40 = vld [vmem:[#allocation3 + $0x88] sm:$0xff] }
 0x587   :  { %4959 = vmatpush1.bf16.msra.mxu0 %v4810_v60  ;;  %5041 = vmatpush1.bf16.msra.mxu1 %v4812_v61  ;;  %v4825_v41 = vld [vmem:[#allocation3 + $0x98] sm:$0xff]  ;;  %v4822_v42 = vld [vmem:[#allocation3 + $0x80] sm:$0xff]  ;;  %v4824_v53 = vld [vmem:[#allocation3 + $0x90] sm:$0xff] }
 0x588   :  { %4960 = vmatprep.subr.bf16.mxu0 %v4815_v62  ;;  %5042 = vmatprep.subr.bf16.mxu1 %v4817_v36  ;;  %v4827_v43 = vld [vmem:[#allocation3 + $0xa8] sm:$0xff]  ;;  %v4829_v44 = vld [vmem:[#allocation3 + $0xb8] sm:$0xff]  ;;  %v4826_v45 = vld [vmem:[#allocation3 + $0xa0] sm:$0xff] }
 0x589   :  { %v4828_v49 = vld [vmem:[#allocation3 + $0xb0] sm:$0xff]  ;;  %v4831_v51 = vld [vmem:[#allocation3 + $0xc8] sm:$0xff]  ;;  %v4833_v52 = vld [vmem:[#allocation3 + $0xd8] sm:$0xff] }
 0x58a   :  { %v4830_v35 = vld [vmem:[#allocation3 + $0xc0] sm:$0xff]  ;;  %v4832_v59 = vld [vmem:[#allocation3 + $0xd0] sm:$0xff]  ;;  %v4835_v48 = vld [vmem:[#allocation3 + $0xe8] sm:$0xff] }
 0x58b   :  { %4961 = vmatpush1.bf16.msra.mxu0 %v4814_v63  ;;  %5043 = vmatpush1.bf16.msra.mxu1 %v4816_v0  ;;  %v4837_v38 = vld [vmem:[#allocation3 + $0xf8] sm:$0xff]  ;;  %v4834_v60 = vld [vmem:[#allocation3 + $0xe0] sm:$0xff]  ;;  %v4836_v61 = vld [vmem:[#allocation3 + $0xf0] sm:$0xff] }
 0x58c   :  { %4962 = vmatprep.subr.bf16.mxu0 %v4819_v1  ;;  %5044 = vmatprep.subr.bf16.mxu1 %v4821_v34  ;;  %v4839_v62 = vld [vmem:[#allocation3 + $0x108] sm:$0xff]  ;;  %v4841_v36 = vld [vmem:[#allocation3 + $0x118] sm:$0xff]  ;;  %v4838_v63 = vld [vmem:[#allocation3 + $0x100] sm:$0xff] }
 0x58d   :  { %v4840_v0 = vld [vmem:[#allocation3 + $0x110] sm:$0xff]  ;;  %v4843_v1 = vld [vmem:[#allocation3 + $0x128] sm:$0xff]  ;;  %v4845_v34 = vld [vmem:[#allocation3 + $0x138] sm:$0xff] }
 0x58f   :  { %4963 = vmatpush1.bf16.msra.mxu0 %v4818_v37  ;;  %5045 = vmatpush1.bf16.msra.mxu1 %v4820_v39  ;;  %v4842_v37 = vld [vmem:[#allocation3 + $0x120] sm:$0xff]  ;;  %v4844_v39 = vld [vmem:[#allocation3 + $0x130] sm:$0xff] }
 0x590   :  { %4964 = vmatprep.subr.bf16.mxu0 %v4823_v40  ;;  %5046 = vmatprep.subr.bf16.mxu1 %v4825_v41  ;;  %v4847_v40 = vld [vmem:[#allocation3 + $0x148] sm:$0xff]  ;;  %v4849_v41 = vld [vmem:[#allocation3 + $0x158] sm:$0xff] }
 0x593   :  { %4965 = vmatpush1.bf16.msra.mxu0 %v4822_v42  ;;  %5047 = vmatpush1.bf16.msra.mxu1 %v4824_v53  ;;  %v4846_v42 = vld [vmem:[#allocation3 + $0x140] sm:$0xff]  ;;  %v4848_v53 = vld [vmem:[#allocation3 + $0x150] sm:$0xff] }
 0x594   :  { %4966 = vmatprep.subr.bf16.mxu0 %v4827_v43  ;;  %5048 = vmatprep.subr.bf16.mxu1 %v4829_v44  ;;  %v4851_v43 = vld [vmem:[#allocation3 + $0x168] sm:$0xff]  ;;  %v4853_v44 = vld [vmem:[#allocation3 + $0x178] sm:$0xff] }
 0x597   :  { %4967 = vmatpush1.bf16.msra.mxu0 %v4826_v45  ;;  %5049 = vmatpush1.bf16.msra.mxu1 %v4828_v49  ;;  %v4850_v45 = vld [vmem:[#allocation3 + $0x160] sm:$0xff]  ;;  %v4852_v49 = vld [vmem:[#allocation3 + $0x170] sm:$0xff] }
 0x598   :  { %4968 = vmatprep.subr.bf16.mxu0 %v4831_v51  ;;  %5050 = vmatprep.subr.bf16.mxu1 %v4833_v52  ;;  %v4855_v51 = vld [vmem:[#allocation3 + $0x188] sm:$0xff]  ;;  %v4857_v52 = vld [vmem:[#allocation3 + $0x198] sm:$0xff] }
 0x59b   :  { %4969 = vmatpush1.bf16.msra.mxu0 %v4830_v35  ;;  %5051 = vmatpush1.bf16.msra.mxu1 %v4832_v59  ;;  %v4854_v35 = vld [vmem:[#allocation3 + $0x180] sm:$0xff]  ;;  %v4856_v59 = vld [vmem:[#allocation3 + $0x190] sm:$0xff] }
 0x59c   :  { %4970 = vmatprep.subr.bf16.mxu0 %v4835_v48  ;;  %5052 = vmatprep.subr.bf16.mxu1 %v4837_v38  ;;  %v4859_v48 = vld [vmem:[#allocation3 + $0x1a8] sm:$0xff]  ;;  %v4861_v38 = vld [vmem:[#allocation3 + $0x1b8] sm:$0xff] }
 0x59f   :  { %4971 = vmatpush1.bf16.msra.mxu0 %v4834_v60  ;;  %5053 = vmatpush1.bf16.msra.mxu1 %v4836_v61  ;;  %v4858_v60 = vld [vmem:[#allocation3 + $0x1a0] sm:$0xff]  ;;  %v4860_v61 = vld [vmem:[#allocation3 + $0x1b0] sm:$0xff] }
 0x5a0   :  { %4972 = vmatprep.subr.bf16.mxu0 %v4839_v62  ;;  %5054 = vmatprep.subr.bf16.mxu1 %v4841_v36  ;;  %v4863_v62 = vld [vmem:[#allocation3 + $0x1c8] sm:$0xff]  ;;  %v4865_v36 = vld [vmem:[#allocation3 + $0x1d8] sm:$0xff] }
 0x5a3   :  { %4973 = vmatpush1.bf16.msra.mxu0 %v4838_v63  ;;  %5055 = vmatpush1.bf16.msra.mxu1 %v4840_v0  ;;  %v4862_v63 = vld [vmem:[#allocation3 + $0x1c0] sm:$0xff]  ;;  %v4864_v0 = vld [vmem:[#allocation3 + $0x1d0] sm:$0xff] }
 0x5a4   :  { %4974 = vmatprep.subr.bf16.mxu0 %v4843_v1  ;;  %5056 = vmatprep.subr.bf16.mxu1 %v4845_v34  ;;  %v4867_v1 = vld [vmem:[#allocation3 + $0x1e8] sm:$0xff]  ;;  %v4869_v34 = vld [vmem:[#allocation3 + $0x1f8] sm:$0xff] }
 0x5a7   :  { %4975 = vmatpush1.bf16.msra.mxu0 %v4842_v37  ;;  %5057 = vmatpush1.bf16.msra.mxu1 %v4844_v39  ;;  %v4866_v37 = vld [vmem:[#allocation3 + $0x1e0] sm:$0xff]  ;;  %v4868_v39 = vld [vmem:[#allocation3 + $0x1f0] sm:$0xff] }
 0x5a8   :  { %4976 = vmatprep.subr.bf16.mxu0 %v4847_v40  ;;  %5058 = vmatprep.subr.bf16.mxu1 %v4849_v41  ;;  %v4871_v40 = vld [vmem:[#allocation3 + $0x208] sm:$0xff]  ;;  %v4873_v41 = vld [vmem:[#allocation3 + $0x218] sm:$0xff] }
 0x5ab   :  { %4977 = vmatpush1.bf16.msra.mxu0 %v4846_v42  ;;  %5059 = vmatpush1.bf16.msra.mxu1 %v4848_v53  ;;  %v4870_v42 = vld [vmem:[#allocation3 + $0x200] sm:$0xff]  ;;  %v4872_v53 = vld [vmem:[#allocation3 + $0x210] sm:$0xff] }
 0x5ac   :  { %4978 = vmatprep.subr.bf16.mxu0 %v4851_v43  ;;  %5060 = vmatprep.subr.bf16.mxu1 %v4853_v44  ;;  %v4875_v43 = vld [vmem:[#allocation3 + $0x228] sm:$0xff]  ;;  %v4877_v44 = vld [vmem:[#allocation3 + $0x238] sm:$0xff] }
 0x5af   :  { %4979 = vmatpush1.bf16.msra.mxu0 %v4850_v45  ;;  %5061 = vmatpush1.bf16.msra.mxu1 %v4852_v49  ;;  %v4874_v45 = vld [vmem:[#allocation3 + $0x220] sm:$0xff]  ;;  %v4876_v49 = vld [vmem:[#allocation3 + $0x230] sm:$0xff] }
 0x5b0   :  { %4980 = vmatprep.subr.bf16.mxu0 %v4855_v51  ;;  %5062 = vmatprep.subr.bf16.mxu1 %v4857_v52  ;;  %v4879_v51 = vld [vmem:[#allocation3 + $0x248] sm:$0xff]  ;;  %v4881_v52 = vld [vmem:[#allocation3 + $0x258] sm:$0xff] }
 0x5b3   :  { %4981 = vmatpush1.bf16.msra.mxu0 %v4854_v35  ;;  %5063 = vmatpush1.bf16.msra.mxu1 %v4856_v59  ;;  %v4878_v35 = vld [vmem:[#allocation3 + $0x240] sm:$0xff]  ;;  %v4880_v59 = vld [vmem:[#allocation3 + $0x250] sm:$0xff] }
 0x5b4   :  { %4982 = vmatprep.subr.bf16.mxu0 %v4859_v48  ;;  %5064 = vmatprep.subr.bf16.mxu1 %v4861_v38  ;;  %v4883_v48 = vld [vmem:[#allocation3 + $0x268] sm:$0xff]  ;;  %v4882_v38 = vld [vmem:[#allocation3 + $0x260] sm:$0xff] }
 0x5b7   :  { %4983 = vmatpush1.bf16.msra.mxu0 %v4858_v60  ;;  %5065 = vmatpush1.bf16.msra.mxu1 %v4860_v61  ;;  %v4884_v60 = vld [vmem:[#allocation3 + $0x270] sm:$0xff]  ;;  %v4887_v61 = vld [vmem:[#allocation3 + $0x288] sm:$0xff] }
 0x5b8   :  { %4984 = vmatprep.subr.bf16.mxu0 %v4863_v62  ;;  %5066 = vmatprep.subr.bf16.mxu1 %v4865_v36  ;;  %v4889_v62 = vld [vmem:[#allocation3 + $0x298] sm:$0xff]  ;;  %v4888_v36 = vld [vmem:[#allocation3 + $0x290] sm:$0xff] }
 0x5bb   :  { %4985 = vmatpush1.bf16.msra.mxu0 %v4862_v63  ;;  %5067 = vmatpush1.bf16.msra.mxu1 %v4864_v0  ;;  %v4891_v63 = vld [vmem:[#allocation3 + $0x2a8] sm:$0xff]  ;;  %v4893_v0 = vld [vmem:[#allocation3 + $0x2b8] sm:$0xff] }
 0x5bc   :  { %4986 = vmatprep.subr.bf16.mxu0 %v4867_v1  ;;  %5068 = vmatprep.subr.bf16.mxu1 %v4869_v34  ;;  %v4890_v1 = vld [vmem:[#allocation3 + $0x2a0] sm:$0xff]  ;;  %v4892_v34 = vld [vmem:[#allocation3 + $0x2b0] sm:$0xff] }
 0x5bf   :  { %4987 = vmatpush1.bf16.msra.mxu0 %v4866_v37  ;;  %5069 = vmatpush1.bf16.msra.mxu1 %v4868_v39  ;;  %v4895_v37 = vld [vmem:[#allocation3 + $0x2c8] sm:$0xff]  ;;  %v4897_v39 = vld [vmem:[#allocation3 + $0x2d8] sm:$0xff] }
 0x5c0   :  { %4997 = vmatprep.subr.bf16.mxu0 %v4871_v40  ;;  %5079 = vmatprep.subr.bf16.mxu1 %v4873_v41  ;;  %v4894_v40 = vld [vmem:[#allocation3 + $0x2c0] sm:$0xff]  ;;  %v4896_v41 = vld [vmem:[#allocation3 + $0x2d0] sm:$0xff] }
 0x5c2   :  { %4989 = vmatmul.mubr.bf16.vlgmr.msra.gmra.mrb[64].mxu0 %v8809_v46  ;;  %5071 = vmatmul.mubr.bf16.vlgmr.msra.gmra.mrb[40].mxu1 %v8809_v46  ;;  %v4885_v46 = vld [vmem:[#allocation3 + $0x278] sm:$0xff] }
 0x5c3   :  { %4998 = vmatpush1.bf16.msra.mxu0 %v4870_v42  ;;  %5080 = vmatpush1.bf16.msra.mxu1 %v4872_v53  ;;  %v4899_v42 = vld [vmem:[#allocation3 + $0x2e8] sm:$0xff]  ;;  %v4901_v53 = vld [vmem:[#allocation3 + $0x2f8] sm:$0xff] }
 0x5c4   :  { %4999 = vmatprep.subr.bf16.mxu0 %v4875_v43  ;;  %5081 = vmatprep.subr.bf16.mxu1 %v4877_v44  ;;  %v4898_v43 = vld [vmem:[#allocation3 + $0x2e0] sm:$0xff]  ;;  %v4900_v44 = vld [vmem:[#allocation3 + $0x2f0] sm:$0xff] }
 0x5c5   :  { %5029 = vmatprep.mubr.bf16.mxu0 %v8813_v50  ;;  %5111 = vmatprep.mubr.bf16.mxu1 %v8813_v50  ;;  %v4886_v50 = vld [vmem:[#allocation3 + $0x280] sm:$0xff] }
 0x5c7   :  { %5000 = vmatpush1.bf16.msra.mxu0 %v4874_v45  ;;  %5082 = vmatpush1.bf16.msra.mxu1 %v4876_v49  ;;  %v4903_v45 = vld [vmem:[#allocation3 + $0x308] sm:$0xff]  ;;  %v4905_v49 = vld [vmem:[#allocation3 + $0x318] sm:$0xff] }
 0x5c8   :  { %5001 = vmatprep.subr.bf16.mxu0 %v4879_v51  ;;  %5083 = vmatprep.subr.bf16.mxu1 %v4881_v52  ;;  %v4902_v51 = vld [vmem:[#allocation3 + $0x300] sm:$0xff]  ;;  %v4904_v52 = vld [vmem:[#allocation3 + $0x310] sm:$0xff] }
 0x5cb   :  { %5002 = vmatpush1.bf16.msra.mxu0 %v4878_v35  ;;  %5084 = vmatpush1.bf16.msra.mxu1 %v4880_v59  ;;  %v4907_v35 = vld [vmem:[#allocation3 + $0x328] sm:$0xff]  ;;  %v4909_v59 = vld [vmem:[#allocation3 + $0x338] sm:$0xff] }
 0x5cc   :  { %5003 = vmatprep.subr.bf16.mxu0 %v4883_v48  ;;  %5085 = vmatprep.subr.bf16.mxu1 %v4885_v46  ;;  %v4906_v48 = vld [vmem:[#allocation3 + $0x320] sm:$0xff]  ;;  %v4908_v46 = vld [vmem:[#allocation3 + $0x330] sm:$0xff] }
 0x5cf   :  { %5004 = vmatpush1.bf16.msra.mxu0 %v4882_v38  ;;  %5086 = vmatpush1.bf16.msra.mxu1 %v4884_v60  ;;  %v4911_v38 = vld [vmem:[#allocation3 + $0x348] sm:$0xff]  ;;  %v4913_v60 = vld [vmem:[#allocation3 + $0x358] sm:$0xff] }
 0x5d0   :  { %5005 = vmatprep.subr.bf16.mxu0 %v4887_v61  ;;  %5087 = vmatprep.subr.bf16.mxu1 %v4889_v62  ;;  %v4910_v61 = vld [vmem:[#allocation3 + $0x340] sm:$0xff]  ;;  %v4912_v62 = vld [vmem:[#allocation3 + $0x350] sm:$0xff] }
 0x5d3   :  { %5006 = vmatpush1.bf16.msra.mxu0 %v4886_v50  ;;  %5088 = vmatpush1.bf16.msra.mxu1 %v4888_v36  ;;  %v4915_v50 = vld [vmem:[#allocation3 + $0x368] sm:$0xff]  ;;  %v4917_v36 = vld [vmem:[#allocation3 + $0x378] sm:$0xff] }
 0x5d4   :  { %5007 = vmatprep.subr.bf16.mxu0 %v4891_v63  ;;  %5089 = vmatprep.subr.bf16.mxu1 %v4893_v0  ;;  %v4914_v63 = vld [vmem:[#allocation3 + $0x360] sm:$0xff]  ;;  %v4916_v0 = vld [vmem:[#allocation3 + $0x370] sm:$0xff] }
 0x5d7   :  { %5008 = vmatpush1.bf16.msra.mxu0 %v4890_v1  ;;  %5090 = vmatpush1.bf16.msra.mxu1 %v4892_v34  ;;  %v4919_v1 = vld [vmem:[#allocation3 + $0x388] sm:$0xff]  ;;  %v4921_v34 = vld [vmem:[#allocation3 + $0x398] sm:$0xff] }
 0x5d8   :  { %5009 = vmatprep.subr.bf16.mxu0 %v4895_v37  ;;  %5091 = vmatprep.subr.bf16.mxu1 %v4897_v39  ;;  %v4918_v37 = vld [vmem:[#allocation3 + $0x380] sm:$0xff]  ;;  %v4920_v39 = vld [vmem:[#allocation3 + $0x390] sm:$0xff] }
 0x5db   :  { %5010 = vmatpush1.bf16.msra.mxu0 %v4894_v40  ;;  %5092 = vmatpush1.bf16.msra.mxu1 %v4896_v41  ;;  %v4923_v40 = vld [vmem:[#allocation3 + $0x3a8] sm:$0xff]  ;;  %v4925_v41 = vld [vmem:[#allocation3 + $0x3b8] sm:$0xff] }
 0x5dc   :  { %5011 = vmatprep.subr.bf16.mxu0 %v4899_v42  ;;  %5093 = vmatprep.subr.bf16.mxu1 %v4901_v53  ;;  %v4922_v42 = vld [vmem:[#allocation3 + $0x3a0] sm:$0xff]  ;;  %v4924_v53 = vld [vmem:[#allocation3 + $0x3b0] sm:$0xff] }
 0x5df   :  { %5012 = vmatpush1.bf16.msra.mxu0 %v4898_v43  ;;  %5094 = vmatpush1.bf16.msra.mxu1 %v4900_v44  ;;  %v4927_v43 = vld [vmem:[#allocation3 + $0x3c8] sm:$0xff]  ;;  %v4929_v44 = vld [vmem:[#allocation3 + $0x3d8] sm:$0xff] }
 0x5e0   :  { %5013 = vmatprep.subr.bf16.mxu0 %v4903_v45  ;;  %5095 = vmatprep.subr.bf16.mxu1 %v4905_v49  ;;  %v4926_v45 = vld [vmem:[#allocation3 + $0x3c0] sm:$0xff]  ;;  %v4928_v49 = vld [vmem:[#allocation3 + $0x3d0] sm:$0xff] }
 0x5e3   :  { %5014 = vmatpush1.bf16.msra.mxu0 %v4902_v51  ;;  %5096 = vmatpush1.bf16.msra.mxu1 %v4904_v52  ;;  %v4931_v51 = vld [vmem:[#allocation3 + $0x3e8] sm:$0xff]  ;;  %v4933_v52 = vld [vmem:[#allocation3 + $0x3f8] sm:$0xff] }
 0x5e4   :  { %5015 = vmatprep.subr.bf16.mxu0 %v4907_v35  ;;  %5097 = vmatprep.subr.bf16.mxu1 %v4909_v59  ;;  %v4930_v35 = vld [vmem:[#allocation3 + $0x3e0] sm:$0xff]  ;;  %v4932_v59 = vld [vmem:[#allocation3 + $0x3f0] sm:$0xff] }
 0x5e7   :  { %5016 = vmatpush1.bf16.msra.mxu0 %v4906_v48  ;;  %5098 = vmatpush1.bf16.msra.mxu1 %v4908_v46  ;;  %v4934_v48 = vld [vmem:[%s8885_s6] sm:$0xf] }
 0x5e8   :  { %5017 = vmatprep.subr.bf16.mxu0 %v4911_v38  ;;  %5099 = vmatprep.subr.bf16.mxu1 %v4913_v60  ;;  %v4939_v46 = vrot.slane %v4934_v48, %v4585_v54  ;;  %v4947_v38 = vrot.slane %v4934_v48, %v4593_v57  ;;  %v4943_v60 = vrot.slane %v4934_v48, %v4589_v55 }
 0x5eb   :  { %5018 = vmatpush1.bf16.msra.mxu0 %v4910_v61  ;;  %5100 = vmatpush1.bf16.msra.mxu1 %v4912_v62  ;;  %v4951_v61 = vrot.slane %v4934_v48, %v4597_v58 }
 0x5ec   :  { %5019 = vmatprep.subr.bf16.mxu0 %v4915_v50  ;;  %5101 = vmatprep.subr.bf16.mxu1 %v4917_v36 }
 0x5ef   :  { %5020 = vmatpush1.bf16.msra.mxu0 %v4914_v63  ;;  %5102 = vmatpush1.bf16.msra.mxu1 %v4916_v0 }
 0x5f0   :  { %5021 = vmatprep.subr.bf16.mxu0 %v4919_v1  ;;  %5103 = vmatprep.subr.bf16.mxu1 %v4921_v34 }
 0x5f3   :  { %5022 = vmatpush1.bf16.msra.mxu0 %v4918_v37  ;;  %5104 = vmatpush1.bf16.msra.mxu1 %v4920_v39 }
 0x5f4   :  { %5023 = vmatprep.subr.bf16.mxu0 %v4923_v40  ;;  %5105 = vmatprep.subr.bf16.mxu1 %v4925_v41 }
 0x5f7   :  { %5024 = vmatpush1.bf16.msra.mxu0 %v4922_v42  ;;  %5106 = vmatpush1.bf16.msra.mxu1 %v4924_v53 }
 0x5f8   :  { %5025 = vmatprep.subr.bf16.mxu0 %v4927_v43  ;;  %5107 = vmatprep.subr.bf16.mxu1 %v4929_v44 }
 0x5fb   :  { %5026 = vmatpush1.bf16.msra.mxu0 %v4926_v45  ;;  %5108 = vmatpush1.bf16.msra.mxu1 %v4928_v49 }
 0x5fc   :  { %5027 = vmatprep.subr.bf16.mxu0 %v4931_v51  ;;  %5109 = vmatprep.subr.bf16.mxu1 %v4933_v52 }
 0x5ff   :  { %5028 = vmatpush1.bf16.msra.mxu0 %v4930_v35  ;;  %5110 = vmatpush1.bf16.msra.mxu1 %v4932_v59 }
 0x600   :  { %5940 = vmatprep.subr.bf16.mxu0 %v7987_v10  ;;  %5962 = vmatprep.subr.bf16.mxu1 %v8067_v26 }
 0x602   :  { %5030 = vmatmul.mubr.bf16.vlgmr.msra.gmra.mrb[64].mxu0 %v8811_v47  ;;  %5112 = vmatmul.mubr.bf16.vlgmr.msra.gmra.mrb[40].mxu1 %v8811_v47 }
 0x6d5   :  { %v5031_v62 = vpop.f32.mrb[64].mxu0  ;;  %v5113_v50 = vpop.f32.mrb[40].mxu1 }
 0x6d6   :  { %v6308_v36 = vadd.f32 %v5031_v62, %v4939_v46  ;;  %v6310_v47 = vadd.f32 %v5113_v50, %v4947_v38  ;;  %v5033_v63 = vpop.f32.mrb[65].mxu0  ;;  %v5115_v0 = vpop.f32.mrb[41].mxu1 }
 0x6d7   :  { %v6309_v1 = vadd.f32 %v5033_v63, %v4943_v60  ;;  %v6311_v34 = vadd.f32 %v5115_v0, %v4951_v61  ;;  %v5035_v37 = vpop.f32.mrb[66].mxu0  ;;  %v5117_v39 = vpop.f32.mrb[42].mxu1 }
 0x6d8   :  { %v5120_v54 = vmax.f32 %v6308_v36, 0.0  ;;  %v5122_v40 = vmax.f32 %v6310_v47, 0.0  ;;  %v5036_v41 = vpop.f32.mrb[67].mxu0  ;;  %v5118_v57 = vpop.f32.mrb[43].mxu1 }
 0x6d9   :  { %v5121_v42 = vmax.f32 %v6309_v1, 0.0  ;;  %v5123_v53 = vmax.f32 %v6311_v34, 0.0 }
 0x6da   :  { %v5124_v55 = vpack.c.bf16 %v5120_v54, %v5120_v54  ;;  %v5126_v43 = vpack.c.bf16 %v5122_v40, %v5122_v40 }
 0x6db   :  { %v5125_v56 = vpack.c.bf16 %v5121_v42, %v5121_v42  ;;  %v5127_v58 = vpack.c.bf16 %v5123_v53, %v5123_v53 }
 0x6dc   :  { %6526 = dma.done.wait [#allocation8 + $0x2], 4096 }
 0x6dd   :  { %6527 = vsyncadd [#allocation8 + $0x2], 4294963200  ;;  %5941 = vmatpush3.bf16.msra.mxu0 %v7947_v2  ;;  %5963 = vmatpush3.bf16.msra.mxu1 %v8027_v18  ;;  %s6533_s9 = smov [#allocation9]  }
 0x6de   :  { %5942 = vmatprep.subr.bf16.mxu0 %v7992_v11  ;;  %5964 = vmatprep.subr.bf16.mxu1 %v8072_v27  ;;  %s5257_s28 = sshll.u32 %s6533_s9, 4  ;;  %s5258_s28 = int_to_ptr.vmem [resolvable:$true] %s5257_s28 }
 0x6df   :  { %5202 = vmatprep.mubr.bf16.mxu0 %v5125_v56  ;;  %5242 = vmatprep.mubr.bf16.mxu1 %v5127_v58  ;;  %s6500_s29 = scalar_lea.vmem %s5258_s28, 32  ;;  %p6505_p1 = scmp.lt.s32.totalorder %s5258_s28, %s5258_s28 }
 0x6e0   :  { %p6501_p0 = scmp.ne.s32.totalorder %s5258_s28, %s6500_s29  ;;  %p6506_p2 = scmp.lt.s32.totalorder %s6500_s29, %s6500_s29 }
 0x6e1   :  { %5943 = vmatpush3.bf16.msra.mxu0 %v7952_v3  ;;  %5965 = vmatpush3.bf16.msra.mxu1 %v8032_v19 }
 0x6e2   :  { %5944 = vmatprep.subr.bf16.mxu0 %v7997_v12  ;;  %5966 = vmatprep.subr.bf16.mxu1 %v8077_v28  ;;  %p6507_p3 = por %p6506_p2, %p6505_p1 }
 0x6e4   :  { %p6508_p4 = pnand %p6507_p3, %p6501_p0 }
 0x6e5   :  { %5945 = vmatpush3.bf16.msra.mxu0 %v7957_v4  ;;  %5967 = vmatpush3.bf16.msra.mxu1 %v8037_v20  ;;  %v5728_v4 = vld [vmem:[%s8886_s7] ss:$0 sm:$0xff] }
 0x6e6   :  { %5946 = vmatprep.subr.bf16.mxu0 %v8002_v13  ;;  %5968 = vmatprep.subr.bf16.mxu1 %v8082_v29 }
 0x6e9   :  { %5947 = vmatpush3.bf16.msra.mxu0 %v7962_v5  ;;  %5969 = vmatpush3.bf16.msra.mxu1 %v8042_v21 }
 0x6ea   :  { %5948 = vmatprep.subr.bf16.mxu0 %v8007_v14  ;;  %5970 = vmatprep.subr.bf16.mxu1 %v8087_v30 }
 0x6ed   :  { %5949 = vmatpush3.bf16.msra.mxu0 %v7967_v6  ;;  %5971 = vmatpush3.bf16.msra.mxu1 %v8047_v22 }
 0x6ee   :  { %5950 = vmatprep.subr.bf16.mxu0 %v8012_v15  ;;  %5972 = vmatprep.subr.bf16.mxu1 %v8092_v31 }
 0x6f1   :  { %5951 = vmatpush3.bf16.msra.mxu0 %v7972_v7  ;;  %5973 = vmatpush3.bf16.msra.mxu1 %v8052_v23 }
 0x6f2   :  { %5952 = vmatprep.subr.bf16.mxu0 %v8017_v16  ;;  %5974 = vmatprep.subr.bf16.mxu1 %v8097_v32 }
 0x6f5   :  { %5953 = vmatpush3.bf16.msra.mxu0 %v7977_v8  ;;  %5975 = vmatpush3.bf16.msra.mxu1 %v8057_v24 }
 0x6f6   :  { %5954 = vmatprep.subr.bf16.mxu0 %v8022_v17  ;;  %5976 = vmatprep.subr.bf16.mxu1 %v8102_v33 }
 0x6f9   :  { %5955 = vmatpush3.bf16.msra.mxu0 %v7982_v9  ;;  %5977 = vmatpush3.bf16.msra.mxu1 %v8062_v25 }
 0x6fc   :  { %5203 = vmatmul.mubr.bf16.vlgmr.msra.gmra.mrb[68].mxu0 %v5124_v55  ;;  %5243 = vmatmul.mubr.bf16.vlgmr.msra.gmra.mrb[44].mxu1 %v5126_v43 }
 0x7cf   :  { %v5956_v2 = vpop.f32.mrb[68].mxu0  ;;  %v5978_v3 = vpop.f32.mrb[44].mxu1 }
 0x7d0   :  { %v5957_v5 = vpop.f32.mrb[69].mxu0  ;;  %v5979_v6 = vpop.f32.mrb[45].mxu1 }
 0x7d1   :  { %v5958_v7 = vadd.f32 %v5957_v5, %v5956_v2  ;;  %v5980_v8 = vadd.f32 %v5979_v6, %v5978_v3  ;;  %v5959_v10 = vpop.f32.mrb[70].mxu0  ;;  %v5981_v11 = vpop.f32.mrb[46].mxu1 }
 0x7d2   :  { %v5960_v12 = vpop.f32.mrb[71].mxu0  ;;  %v5982_v13 = vpop.f32.mrb[47].mxu1 }
 0x7d3   :  { %v5205_v9 = vadd.f32 %v5958_v7, %v5728_v4 }
 0x7d5   :  { %v5245_v14 = vadd.f32 %v5980_v8, %v5205_v9 }
 0x7d7   :  { %5250 = vst [vmem:[#allocation9] sm:$0x3] %v5245_v14 }
 0x7d8   :  { %6511 = shalt.err (!%p6508_p4)
}
 0x7d9   :  { %s6512_s12 = scalar_lea.hbm %s8890_s11, 32 }
 0x7da   :  { %p6513_p5 = scmp.ne.s32.totalorder %s8890_s11, %s6512_s12  ;;  %p6516_p6 = scmp.lt.u32.totalorder %s6512_s12, %s8890_s11 }
 0x7dc   :  { %p6518_p7 = pnand %p6516_p6, %p6513_p5 }
 0x7de   :  { %6521 = shalt.err (!%p6518_p7)
}
 0x7df   :  { %5260 = dma.vmem_to_hbm [thread:$0]  %s5258_s28, 32, %s8890_s11, [#allocation10]  }
 0x7e0   :  { %6528 = dma.done.wait [#allocation10], 32  }
 0x7e1   :  { %6529 = vsyncadd [#allocation10], 4294967264 }
 0x7e2   :  { %5264 = vsyncpa [#allocation10], 1 }
 0x7e3   :  { %5265 = vsyncmov [#allocation8] }
 0x7e6   :  { %s5266_s18 = vpop.sfrf %5265 }
 0x7e7   :  { %p5729_p8 = scmp.ne.s32.totalorder %s5266_s18, 0 }
 0x7e9   :  { %5270 = shalt.err (%p5729_p8)  }
 0x7ea   :  { %5272 = vsyncmov [#allocation8 + $0x1] }
 0x7ed   :  { %s5273_s8 = vpop.sfrf %5272 }
 0x7ee   :  { %p5730_p9 = scmp.ne.s32.totalorder %s5273_s8, 0 }
 0x7f0   :  { %5277 = shalt.err (%p5730_p9)  }
 0x7f1   :  { %5279 = vsyncmov [#allocation8 + $0x2] }
 0x7f4   :  { %s5280_s19 = vpop.sfrf %5279 }
 0x7f5   :  { %p5731_p10 = scmp.ne.s32.totalorder %s5280_s19, 0 }
 0x7f7   :  { %5284 = shalt.err (%p5731_p10)  }

</bundles_post_ra>
